<compile_context>
chip_gen: v7x
topology: tpu7x:2x2x1
jax: 0.10.0
libtpu: 0.0.40
codegen_flags: <defaults>
</compile_context>

<pallas_src>
import functools
from math import sqrt

import numpy as np
import jax
import jax.numpy as jnp
from jax import lax
from jax.experimental import pallas as pl
from jax.experimental.pallas import tpu as pltpu


def _mha_flash_kernel(x_ref, kt_ref, v_ref, wqt_ref, wot_ref, o_ref,
                      q_scr, m_scr, l_scr, acc_scr,
                      *, scale, num_heads, dk, dv, compute_dtype):
    """One grid step: (batch ib, q-block iq, kv-block ik); all heads inside."""
    ik = pl.program_id(2)
    n_kv = pl.num_programs(2)

    # New q-block: project Q for all heads once (scale folded in) and reset
    # the per-head online-softmax state.
    @pl.when(ik == 0)
    def _start_q_block():
        q = jnp.dot(x_ref[0], wqt_ref[...],
                    preferred_element_type=jnp.float32)           # (bq, dim_k)
        q_scr[...] = (q * scale).astype(q_scr.dtype)
        m_scr[...] = jnp.full(m_scr.shape, -jnp.inf, m_scr.dtype)
        l_scr[...] = jnp.zeros(l_scr.shape, l_scr.dtype)
        acc_scr[...] = jnp.zeros(acc_scr.shape, acc_scr.dtype)

    # Per-head flash update for this kv block.  num_heads is small & static,
    # so the loop is unrolled with static slice offsets (no dynamic lane
    # addressing).  K arrives pre-transposed -> NN score matmul.
    # TODO(synk): optional attention mask (masked_fill with -inf) not wired
    # up; the reference forward is exercised with mask=None.
    for h in range(num_heads):
        q_h = q_scr[:, h * dk:(h + 1) * dk]                        # (bq, dk)
        kt_h = kt_ref[0, h * dk:(h + 1) * dk, :]                   # (dk, bk)
        s = jnp.dot(q_h, kt_h, preferred_element_type=jnp.float32)  # (bq, bk)

        m_prev = m_scr[:, h:h + 1]                                 # (bq, 1)
        m_new = jnp.maximum(m_prev, jnp.max(s, axis=-1, keepdims=True))
        alpha = jnp.exp(m_prev - m_new)                            # (bq, 1)
        p = jnp.exp(s - m_new)                                     # (bq, bk) fp32
        l_scr[:, h:h + 1] = alpha * l_scr[:, h:h + 1] + jnp.sum(
            p, axis=-1, keepdims=True)

        v_h = v_ref[0, :, h * dv:(h + 1) * dv]                     # (bk, dv)
        pv = jnp.dot(p.astype(compute_dtype), v_h,
                     preferred_element_type=jnp.float32)           # (bq, dv)
        acc_scr[:, h * dv:(h + 1) * dv] = (
            alpha * acc_scr[:, h * dv:(h + 1) * dv] + pv)
        m_scr[:, h:h + 1] = m_new

    # Last kv block: normalize each head in place, then ONE big output
    # projection (contraction depth dim_v) into the lane-dense output tile.
    @pl.when(ik == n_kv - 1)
    def _finish_q_block():
        for h in range(num_heads):
            inv_l = pl.reciprocal(l_scr[:, h:h + 1], approx=True)  # EUP slot
            acc_scr[:, h * dv:(h + 1) * dv] = (
                acc_scr[:, h * dv:(h + 1) * dv] * inv_l)
        att = acc_scr[...].astype(compute_dtype)                   # (bq, dim_v)
        o_ref[0] = jnp.dot(att, wot_ref[...],
                           preferred_element_type=jnp.float32).astype(o_ref.dtype)


def _pick_block(seq_len, target, *, lane, sub_mult=8):
    """Largest block <= target that divides seq_len.

    Lane-dim blocks (the K^T stream) must be a multiple of 128 or the full
    sequence; sublane-dim blocks a multiple of `sub_mult` (8 fp32, 16 bf16).
    Raises instead of silently returning an oversized single block.
    """
    if seq_len <= target:
        return seq_len
    mults = (128,) if lane else (128, sub_mult)
    for mult in mults:
        cand = (min(target, seq_len) // mult) * mult
        while cand >= mult:
            if seq_len % cand == 0:
                return cand
            cand -= mult
    if seq_len <= 2 * target:
        return seq_len
    raise ValueError(
        f"No block size <= {target} (multiple of {mults[-1]}) divides "
        f"seq_len={seq_len}; pad the sequence or pass explicit block sizes.")


def multi_head_attention(x, wq, wk, wv, wo, *, num_heads,
                         block_q=512, block_k=512, compute_dtype=None):
    """Fused MHA forward (mask=None).

    x: (b, s, dim_in); wq/wk: (dim_k, dim_in); wv: (dim_v, dim_in);
    wo: (dim_in, dim_v)  -- PyTorch nn.Linear layout, bias-free.
    compute_dtype: dtype fed to DMA/MXU (e.g. jnp.bfloat16); accumulation and
    softmax statistics are always fp32.
    """
    b, s, dim_in = x.shape
    dim_k = wq.shape[0]
    dim_v = wv.shape[0]
    assert wq.shape == (dim_k, dim_in) and wk.shape == (dim_k, dim_in)
    assert wv.shape == (dim_v, dim_in) and wo.shape == (dim_in, dim_v)
    assert dim_k % num_heads == 0 and dim_v % num_heads == 0
    dk = dim_k // num_heads
    dv = dim_v // num_heads
    scale = 1.0 / sqrt(dk)
    if compute_dtype is None:
        compute_dtype = x.dtype
    compute_dtype = np.dtype(compute_dtype)
    cs = compute_dtype.itemsize
    ob = np.dtype(x.dtype).itemsize
    sub_mult = 8 if cs >= 4 else 32 // cs        # bf16 -> 16 (sublane packing)

    bq = _pick_block(s, block_q, lane=False, sub_mult=sub_mult)
    bk = _pick_block(s, block_k, lane=True)

    def footprint(bq_, bk_):
        est = 2 * bq_ * dim_in * cs              # x blocks (double-buffered)
        est += 2 * dim_k * bk_ * cs              # K^T blocks
        est += 2 * bk_ * dim_v * cs              # V blocks
        est += 2 * dim_in * dim_k * cs           # resident Wq^T (counted x2)
        est += 2 * dim_v * dim_in * cs           # resident Wo^T (counted x2)
        est += 2 * bq_ * dim_in * ob             # output blocks
        est += bq_ * dim_k * cs                  # Q scratch
        est += 2 * bq_ * 128 * 4                 # m / l scratch (lane-padded)
        est += bq_ * max(dim_v, 128) * 4         # attention accumulator scratch
        return est

    try:
        vmem_cap = int(getattr(pltpu.get_tpu_info(), "vmem_capacity_bytes",
                               64 * 1024 * 1024))
    except Exception:
        vmem_cap = 64 * 1024 * 1024              # v7x-safe fallback
    budget = vmem_cap * 3 // 4                   # headroom for compiler temps

    # Shrink bk first (never the output/bq tile) until the footprint fits.
    while footprint(bq, bk) > budget and bk > 128:
        nbk = _pick_block(s, bk // 2, lane=True)
        if nbk >= bk:
            break
        bk = nbk
    while footprint(bq, bk) > budget and bq > sub_mult:
        nbq = _pick_block(s, bq // 2, lane=False, sub_mult=sub_mult)
        if nbq >= bq:
            break
        bq = nbq
    if footprint(bq, bk) > budget:
        raise ValueError(
            f"MHA tile footprint {footprint(bq, bk)} B exceeds VMEM budget "
            f"{budget} B; reduce block_q/block_k or the model dims.")
    vmem_limit = int(min(budget, max(32 * 1024 * 1024,
                                     footprint(bq, bk) + 8 * 1024 * 1024)))

    n_q = s // bq
    n_kv = s // bk

    # One-time operand prep (cache/hoist under jit in real use):
    #  * everything fed to DMA / MXU is cast to compute_dtype once here,
    #  * K is produced pre-transposed -> NN score matmul inside the kernel,
    #  * K / V are projected once for all q-blocks and heads (XLA GEMMs).
    prec = (lax.Precision.HIGHEST if compute_dtype == np.dtype(jnp.float32)
            else lax.Precision.DEFAULT)
    x_c = x.astype(compute_dtype)
    k_t = jnp.einsum("bsi,ki->bks", x_c, wk.astype(compute_dtype),
                     precision=prec)             # (b, dim_k, s)
    v_p = jnp.einsum("bsi,vi->bsv", x_c, wv.astype(compute_dtype),
                     precision=prec)             # (b, s, dim_v)
    wq_t = wq.astype(compute_dtype).T            # (dim_in, dim_k)
    wo_t = wo.astype(compute_dtype).T            # (dim_v, dim_in)

    kernel = functools.partial(_mha_flash_kernel, scale=scale,
                               num_heads=num_heads, dk=dk, dv=dv,
                               compute_dtype=compute_dtype)

    return pl.pallas_call(
        kernel,
        out_shape=jax.ShapeDtypeStruct((b, s, dim_in), x.dtype),
        grid_spec=pltpu.PrefetchScalarGridSpec(
            num_scalar_prefetch=0,
            grid=(b, n_q, n_kv),
            in_specs=[
                pl.BlockSpec((1, bq, dim_in), lambda ib, iq, ik: (ib, iq, 0)),
                pl.BlockSpec((1, dim_k, bk), lambda ib, iq, ik: (ib, 0, ik)),
                pl.BlockSpec((1, bk, dim_v), lambda ib, iq, ik: (ib, ik, 0)),
                pl.BlockSpec((dim_in, dim_k), lambda ib, iq, ik: (0, 0)),
                pl.BlockSpec((dim_v, dim_in), lambda ib, iq, ik: (0, 0)),
            ],
            out_specs=pl.BlockSpec((1, bq, dim_in),
                                   lambda ib, iq, ik: (ib, iq, 0)),
            scratch_shapes=[
                pltpu.VMEM((bq, dim_k), compute_dtype),     # scaled Q, all heads
                pltpu.VMEM((bq, num_heads), jnp.float32),   # running max / head
                pltpu.VMEM((bq, num_heads), jnp.float32),   # running sum / head
                pltpu.VMEM((bq, dim_v), jnp.float32),       # attention accumulator
            ],
        ),
        compiler_params=pltpu.CompilerParams(
            # (batch, q-blocks) are parallel -> megacore sharding on v7x;
            # keep b * n_q even there so both TensorCores get balanced shards.
            dimension_semantics=("parallel", "parallel", "arbitrary"),
            vmem_limit_bytes=vmem_limit,
        ),
    )(x_c, k_t, v_p, wq_t, wo_t)


def _reference(x, wq, wk, wv, wo, *, num_heads):
    """Pure-JAX replica of the PyTorch forward (mask=None), high precision."""
    b, s, dim_in = x.shape
    dim_k = wq.shape[0]
    dim_v = wv.shape[0]
    dk = dim_k // num_heads
    dv = dim_v // num_heads
    scale = 1.0 / sqrt(dk)
    with jax.default_matmul_precision("highest"):
        q = (x @ wq.T).reshape(b, s, num_heads, dk).transpose(0, 2, 1, 3)
        k = (x @ wk.T).reshape(b, s, num_heads, dk).transpose(0, 2, 1, 3)
        v = (x @ wv.T).reshape(b, s, num_heads, dv).transpose(0, 2, 1, 3)
        dist = jnp.einsum('bhqd,bhkd->bhqk', q, k) * scale
        dist = jax.nn.softmax(dist, axis=-1)
        att = jnp.einsum('bhqk,bhkd->bhqd', dist, v)
        att = att.transpose(0, 2, 1, 3).reshape(b, s, dim_v)
        return att @ wo.T


if __name__ == "__main__":
    # batch=2, seq=256, dim_in=32, dim_k=dim_v=32, 4 heads.  block_q=block_k=128
    # so the flash tiling (grid = (2, 2, 2)) and the in-kernel head loop are
    # actually exercised (multiple q-blocks and kv-blocks).
    b, s, dim_in = 2, 256, 32
    dim_k, dim_v, num_heads = 32, 32, 4

    key = jax.random.PRNGKey(0)
    kx, kq, kk, kv, ko = jax.random.split(key, 5)

    x = jax.random.normal(kx, (b, s, dim_in), dtype=jnp.float32)
    # Deterministic synthetic weights in PyTorch nn.Linear layout (out, in).
    wq = jax.random.normal(kq, (dim_k, dim_in), dtype=jnp.float32) * 0.1
    wk = jax.random.normal(kk, (dim_k, dim_in), dtype=jnp.float32) * 0.1
    wv = jax.random.normal(kv, (dim_v, dim_in), dtype=jnp.float32) * 0.1
    wo = jax.random.normal(ko, (dim_in, dim_v), dtype=jnp.float32) * 0.1

    ref = _reference(x, wq, wk, wv, wo, num_heads=num_heads)

    # fp32 compute path (tight numeric check; the approx reciprocal is the
    # only intentional approximation).
    out = multi_head_attention(x, wq, wk, wv, wo, num_heads=num_heads,
                               block_q=128, block_k=128)
    out = jax.block_until_ready(out)
    assert out.shape == (b, s, dim_in)
    err = float(jnp.max(jnp.abs(out - ref)))
    assert jnp.allclose(out, ref, atol=5e-3, rtol=5e-3), \
        f"fp32 max abs diff {err}"

    # bf16 DMA/MXU-operand path (fp32 accumulation) -- flash-style tolerance.
    out_bf16 = multi_head_attention(x, wq, wk, wv, wo, num_heads=num_heads,
                                    block_q=128, block_k=128,
                                    compute_dtype=jnp.bfloat16)
    out_bf16 = jax.block_until_ready(out_bf16)
    err16 = float(jnp.max(jnp.abs(out_bf16 - ref)))
    assert jnp.allclose(out_bf16, ref, atol=5e-2, rtol=5e-2), \
        f"bf16 max abs diff {err16}"

    print("KERNEL_OK")
</pallas_src>

<mosaic_0001>
module attributes {stable_mosaic.version = 11 : i64} {
  func.func @_mha_flash_kernel(%arg0: i32, %arg1: i32, %arg2: i32, %arg3: memref<1x128x32xf32, #tpu.memory_space<vmem>>, %arg4: memref<1x32x128xf32, #tpu.memory_space<vmem>>, %arg5: memref<1x128x32xf32, #tpu.memory_space<vmem>>, %arg6: memref<32x32xf32, #tpu.memory_space<vmem>>, %arg7: memref<32x32xf32, #tpu.memory_space<vmem>>, %arg8: memref<1x128x32xf32, #tpu.memory_space<vmem>>, %arg9: memref<128x32xf32, #tpu.memory_space<vmem>>, %arg10: memref<128x4xf32, #tpu.memory_space<vmem>>, %arg11: memref<128x4xf32, #tpu.memory_space<vmem>>, %arg12: memref<128x32xf32, #tpu.memory_space<vmem>>) attributes {dimension_semantics = [#tpu.dimension_semantics<parallel>, #tpu.dimension_semantics<parallel>, #tpu.dimension_semantics<arbitrary>], iteration_bounds = array<i64: 2, 2, 2>, scalar_prefetch = 0 : i64, scratch_operands = 4 : i64, tpu.core_type = #tpu.core_type<tc>, window_params = [{transform_indices = @transform_0, window_bounds = array<i64: 1, 128, 32>}, {transform_indices = @transform_1, window_bounds = array<i64: 1, 32, 128>}, {transform_indices = @transform_2, window_bounds = array<i64: 1, 128, 32>}, {pipeline_mode = #tpu.pipeline_mode<synchronous>, transform_indices = @transform_3, window_bounds = array<i64: 32, 32>}, {pipeline_mode = #tpu.pipeline_mode<synchronous>, transform_indices = @transform_4, window_bounds = array<i64: 32, 32>}, {transform_indices = @transform_5, window_bounds = array<i64: 1, 128, 32>}]} {
    %c0_i32 = arith.constant 0 : i32
    %0 = arith.cmpi eq, %arg2, %c0_i32 : i32
    %1 = arith.extui %0 : i1 to i32
    %c0_i32_0 = arith.constant 0 : i32
    %2 = arith.cmpi ne, %1, %c0_i32_0 : i32
    scf.if %2 {
      %c0_90 = arith.constant 0 : index
      %c0_91 = arith.constant 0 : index
      %c0_92 = arith.constant 0 : index
      %118 = vector.load %arg3[%c0_90, %c0_91, %c0_92] : memref<1x128x32xf32, #tpu.memory_space<vmem>>, vector<1x128x32xf32>
      %119 = vector.shape_cast %118 : vector<1x128x32xf32> to vector<128x32xf32>
      %c0_93 = arith.constant 0 : index
      %c0_94 = arith.constant 0 : index
      %120 = vector.load %arg6[%c0_93, %c0_94] : memref<32x32xf32, #tpu.memory_space<vmem>>, vector<32x32xf32>
      %cst_95 = arith.constant dense<0.000000e+00> : vector<128x32xf32>
      %121 = tpu.matmul %119, %120, %cst_95 {dimension_numbers = #tpu.dot_dimension_numbers<[1], [0], [0], [1], [0, 0, 1, 1], [], []>} : vector<128x32xf32>, vector<32x32xf32>, vector<128x32xf32> -> vector<128x32xf32>
      %cst_96 = arith.constant 0.353553385 : f32
      %122 = vector.broadcast %cst_96 : f32 to vector<128x32xf32>
      %123 = arith.mulf %121, %122 : vector<128x32xf32>
      %c0_97 = arith.constant 0 : index
      %c0_98 = arith.constant 0 : index
      %124 = vector.load %arg9[%c0_97, %c0_98] : memref<128x32xf32, #tpu.memory_space<vmem>>, vector<128x32xf32>
      tpu.vector_store %arg9[%c0_97, %c0_98], %123 {strides = array<i32>} : memref<128x32xf32, #tpu.memory_space<vmem>>, vector<128x32xf32>,
      %cst_99 = arith.constant 0xFF800000 : f32
      %125 = vector.broadcast %cst_99 : f32 to vector<128x4xf32>
      %c0_100 = arith.constant 0 : index
      %c0_101 = arith.constant 0 : index
      %126 = vector.load %arg10[%c0_100, %c0_101] : memref<128x4xf32, #tpu.memory_space<vmem>>, vector<128x4xf32>
      tpu.vector_store %arg10[%c0_100, %c0_101], %125 {strides = array<i32>} : memref<128x4xf32, #tpu.memory_space<vmem>>, vector<128x4xf32>,
      %cst_102 = arith.constant 0.000000e+00 : f32
      %127 = vector.broadcast %cst_102 : f32 to vector<128x4xf32>
      %c0_103 = arith.constant 0 : index
      %c0_104 = arith.constant 0 : index
      %128 = vector.load %arg11[%c0_103, %c0_104] : memref<128x4xf32, #tpu.memory_space<vmem>>, vector<128x4xf32>
      tpu.vector_store %arg11[%c0_103, %c0_104], %127 {strides = array<i32>} : memref<128x4xf32, #tpu.memory_space<vmem>>, vector<128x4xf32>,
      %cst_105 = arith.constant 0.000000e+00 : f32
      %129 = vector.broadcast %cst_105 : f32 to vector<128x32xf32>
      %c0_106 = arith.constant 0 : index
      %c0_107 = arith.constant 0 : index
      %130 = vector.load %arg12[%c0_106, %c0_107] : memref<128x32xf32, #tpu.memory_space<vmem>>, vector<128x32xf32>
      tpu.vector_store %arg12[%c0_106, %c0_107], %129 {strides = array<i32>} : memref<128x32xf32, #tpu.memory_space<vmem>>, vector<128x32xf32>,
    } else {
    }
    %c0 = arith.constant 0 : index
    %c0_1 = arith.constant 0 : index
    %3 = vector.load %arg9[%c0, %c0_1] : memref<128x32xf32, #tpu.memory_space<vmem>>, vector<128x8xf32>
    %c0_2 = arith.constant 0 : index
    %c0_3 = arith.constant 0 : index
    %c0_4 = arith.constant 0 : index
    %4 = vector.load %arg4[%c0_2, %c0_3, %c0_4] : memref<1x32x128xf32, #tpu.memory_space<vmem>>, vector<1x8x128xf32>
    %5 = vector.shape_cast %4 : vector<1x8x128xf32> to vector<8x128xf32>
    %cst = arith.constant dense<0.000000e+00> : vector<128x128xf32>
    %6 = tpu.matmul %3, %5, %cst {dimension_numbers = #tpu.dot_dimension_numbers<[1], [0], [0], [1], [0, 0, 1, 1], [], []>} : vector<128x8xf32>, vector<8x128xf32>, vector<128x128xf32> -> vector<128x128xf32>
    %c0_5 = arith.constant 0 : index
    %c0_6 = arith.constant 0 : index
    %7 = vector.load %arg10[%c0_5, %c0_6] : memref<128x4xf32, #tpu.memory_space<vmem>>, vector<128x1xf32>
    %cst_7 = arith.constant dense<0xFF800000> : vector<128xf32>
    %8 = vector.multi_reduction <maximumf>, %6, %cst_7 [1] : vector<128x128xf32> to vector<128xf32>
    %9 = vector.shape_cast %8 : vector<128xf32> to vector<128x1xf32>
    %10 = arith.maximumf %7, %9 : vector<128x1xf32>
    %11 = arith.subf %7, %10 : vector<128x1xf32>
    %12 = math.exp %11 : vector<128x1xf32>
    %13 = vector.broadcast %10 : vector<128x1xf32> to vector<128x128xf32>
    %14 = arith.subf %6, %13 : vector<128x128xf32>
    %15 = math.exp %14 : vector<128x128xf32>
    %c0_8 = arith.constant 0 : index
    %c0_9 = arith.constant 0 : index
    %16 = vector.load %arg11[%c0_8, %c0_9] : memref<128x4xf32, #tpu.memory_space<vmem>>, vector<128x1xf32>
    %17 = arith.mulf %12, %16 : vector<128x1xf32>
    %cst_10 = arith.constant dense<0.000000e+00> : vector<128xf32>
    %18 = vector.multi_reduction <add>, %15, %cst_10 [1] : vector<128x128xf32> to vector<128xf32>
    %19 = vector.shape_cast %18 : vector<128xf32> to vector<128x1xf32>
    %20 = arith.addf %17, %19 : vector<128x1xf32>
    %c0_11 = arith.constant 0 : index
    %c0_12 = arith.constant 0 : index
    %21 = vector.load %arg11[%c0_11, %c0_12] : memref<128x4xf32, #tpu.memory_space<vmem>>, vector<128x1xf32>
    tpu.vector_store %arg11[%c0_11, %c0_12], %20 {strides = array<i32>} : memref<128x4xf32, #tpu.memory_space<vmem>>, vector<128x1xf32>,
    %c0_13 = arith.constant 0 : index
    %c0_14 = arith.constant 0 : index
    %c0_15 = arith.constant 0 : index
    %22 = vector.load %arg5[%c0_13, %c0_14, %c0_15] : memref<1x128x32xf32, #tpu.memory_space<vmem>>, vector<1x128x8xf32>
    %23 = vector.shape_cast %22 : vector<1x128x8xf32> to vector<128x8xf32>
    %cst_16 = arith.constant dense<0.000000e+00> : vector<128x8xf32>
    %24 = tpu.matmul %15, %23, %cst_16 {dimension_numbers = #tpu.dot_dimension_numbers<[1], [0], [0], [1], [0, 0, 1, 1], [], []>} : vector<128x128xf32>, vector<128x8xf32>, vector<128x8xf32> -> vector<128x8xf32>
    %c0_17 = arith.constant 0 : index
    %c0_18 = arith.constant 0 : index
    %25 = vector.load %arg12[%c0_17, %c0_18] : memref<128x32xf32, #tpu.memory_space<vmem>>, vector<128x8xf32>
    %26 = vector.broadcast %12 : vector<128x1xf32> to vector<128x8xf32>
    %27 = arith.mulf %26, %25 : vector<128x8xf32>
    %28 = arith.addf %27, %24 : vector<128x8xf32>
    %c0_19 = arith.constant 0 : index
    %c0_20 = arith.constant 0 : index
    %29 = vector.load %arg12[%c0_19, %c0_20] : memref<128x32xf32, #tpu.memory_space<vmem>>, vector<128x8xf32>
    tpu.vector_store %arg12[%c0_19, %c0_20], %28 {strides = array<i32>} : memref<128x32xf32, #tpu.memory_space<vmem>>, vector<128x8xf32>,
    %c0_21 = arith.constant 0 : index
    %c0_22 = arith.constant 0 : index
    %30 = vector.load %arg10[%c0_21, %c0_22] : memref<128x4xf32, #tpu.memory_space<vmem>>, vector<128x1xf32>
    tpu.vector_store %arg10[%c0_21, %c0_22], %10 {strides = array<i32>} : memref<128x4xf32, #tpu.memory_space<vmem>>, vector<128x1xf32>,
    %c0_23 = arith.constant 0 : index
    %c8 = arith.constant 8 : index
    %31 = vector.load %arg9[%c0_23, %c8] : memref<128x32xf32, #tpu.memory_space<vmem>>, vector<128x8xf32>
    %c0_24 = arith.constant 0 : index
    %c8_25 = arith.constant 8 : index
    %c0_26 = arith.constant 0 : index
    %32 = vector.load %arg4[%c0_24, %c8_25, %c0_26] : memref<1x32x128xf32, #tpu.memory_space<vmem>>, vector<1x8x128xf32>
    %33 = vector.shape_cast %32 : vector<1x8x128xf32> to vector<8x128xf32>
    %cst_27 = arith.constant dense<0.000000e+00> : vector<128x128xf32>
    %34 = tpu.matmul %31, %33, %cst_27 {dimension_numbers = #tpu.dot_dimension_numbers<[1], [0], [0], [1], [0, 0, 1, 1], [], []>} : vector<128x8xf32>, vector<8x128xf32>, vector<128x128xf32> -> vector<128x128xf32>
    %c0_28 = arith.constant 0 : index
    %c1 = arith.constant 1 : index
    %35 = vector.load %arg10[%c0_28, %c1] : memref<128x4xf32, #tpu.memory_space<vmem>>, vector<128x1xf32>
    %cst_29 = arith.constant dense<0xFF800000> : vector<128xf32>
    %36 = vector.multi_reduction <maximumf>, %34, %cst_29 [1] : vector<128x128xf32> to vector<128xf32>
    %37 = vector.shape_cast %36 : vector<128xf32> to vector<128x1xf32>
    %38 = arith.maximumf %35, %37 : vector<128x1xf32>
    %39 = arith.subf %35, %38 : vector<128x1xf32>
    %40 = math.exp %39 : vector<128x1xf32>
    %41 = vector.broadcast %38 : vector<128x1xf32> to vector<128x128xf32>
    %42 = arith.subf %34, %41 : vector<128x128xf32>
    %43 = math.exp %42 : vector<128x128xf32>
    %c0_30 = arith.constant 0 : index
    %c1_31 = arith.constant 1 : index
    %44 = vector.load %arg11[%c0_30, %c1_31] : memref<128x4xf32, #tpu.memory_space<vmem>>, vector<128x1xf32>
    %45 = arith.mulf %40, %44 : vector<128x1xf32>
    %cst_32 = arith.constant dense<0.000000e+00> : vector<128xf32>
    %46 = vector.multi_reduction <add>, %43, %cst_32 [1] : vector<128x128xf32> to vector<128xf32>
    %47 = vector.shape_cast %46 : vector<128xf32> to vector<128x1xf32>
    %48 = arith.addf %45, %47 : vector<128x1xf32>
    %c0_33 = arith.constant 0 : index
    %c1_34 = arith.constant 1 : index
    %49 = vector.load %arg11[%c0_33, %c1_34] : memref<128x4xf32, #tpu.memory_space<vmem>>, vector<128x1xf32>
    tpu.vector_store %arg11[%c0_33, %c1_34], %48 {strides = array<i32>} : memref<128x4xf32, #tpu.memory_space<vmem>>, vector<128x1xf32>,
    %c0_35 = arith.constant 0 : index
    %c0_36 = arith.constant 0 : index
    %c8_37 = arith.constant 8 : index
    %50 = vector.load %arg5[%c0_35, %c0_36, %c8_37] : memref<1x128x32xf32, #tpu.memory_space<vmem>>, vector<1x128x8xf32>
    %51 = vector.shape_cast %50 : vector<1x128x8xf32> to vector<128x8xf32>
    %cst_38 = arith.constant dense<0.000000e+00> : vector<128x8xf32>
    %52 = tpu.matmul %43, %51, %cst_38 {dimension_numbers = #tpu.dot_dimension_numbers<[1], [0], [0], [1], [0, 0, 1, 1], [], []>} : vector<128x128xf32>, vector<128x8xf32>, vector<128x8xf32> -> vector<128x8xf32>
    %c0_39 = arith.constant 0 : index
    %c8_40 = arith.constant 8 : index
    %53 = vector.load %arg12[%c0_39, %c8_40] : memref<128x32xf32, #tpu.memory_space<vmem>>, vector<128x8xf32>
    %54 = vector.broadcast %40 : vector<128x1xf32> to vector<128x8xf32>
    %55 = arith.mulf %54, %53 : vector<128x8xf32>
    %56 = arith.addf %55, %52 : vector<128x8xf32>
    %c0_41 = arith.constant 0 : index
    %c8_42 = arith.constant 8 : index
    %57 = vector.load %arg12[%c0_41, %c8_42] : memref<128x32xf32, #tpu.memory_space<vmem>>, vector<128x8xf32>
    tpu.vector_store %arg12[%c0_41, %c8_42], %56 {strides = array<i32>} : memref<128x32xf32, #tpu.memory_space<vmem>>, vector<128x8xf32>,
    %c0_43 = arith.constant 0 : index
    %c1_44 = arith.constant 1 : index
    %58 = vector.load %arg10[%c0_43, %c1_44] : memref<128x4xf32, #tpu.memory_space<vmem>>, vector<128x1xf32>
    tpu.vector_store %arg10[%c0_43, %c1_44], %38 {strides = array<i32>} : memref<128x4xf32, #tpu.memory_space<vmem>>, vector<128x1xf32>,
    %c0_45 = arith.constant 0 : index
    %c16 = arith.constant 16 : index
    %59 = vector.load %arg9[%c0_45, %c16] : memref<128x32xf32, #tpu.memory_space<vmem>>, vector<128x8xf32>
    %c0_46 = arith.constant 0 : index
    %c16_47 = arith.constant 16 : index
    %c0_48 = arith.constant 0 : index
    %60 = vector.load %arg4[%c0_46, %c16_47, %c0_48] : memref<1x32x128xf32, #tpu.memory_space<vmem>>, vector<1x8x128xf32>
    %61 = vector.shape_cast %60 : vector<1x8x128xf32> to vector<8x128xf32>
    %cst_49 = arith.constant dense<0.000000e+00> : vector<128x128xf32>
    %62 = tpu.matmul %59, %61, %cst_49 {dimension_numbers = #tpu.dot_dimension_numbers<[1], [0], [0], [1], [0, 0, 1, 1], [], []>} : vector<128x8xf32>, vector<8x128xf32>, vector<128x128xf32> -> vector<128x128xf32>
    %c0_50 = arith.constant 0 : index
    %c2 = arith.constant 2 : index
    %63 = vector.load %arg10[%c0_50, %c2] : memref<128x4xf32, #tpu.memory_space<vmem>>, vector<128x1xf32>
    %cst_51 = arith.constant dense<0xFF800000> : vector<128xf32>
    %64 = vector.multi_reduction <maximumf>, %62, %cst_51 [1] : vector<128x128xf32> to vector<128xf32>
    %65 = vector.shape_cast %64 : vector<128xf32> to vector<128x1xf32>
    %66 = arith.maximumf %63, %65 : vector<128x1xf32>
    %67 = arith.subf %63, %66 : vector<128x1xf32>
    %68 = math.exp %67 : vector<128x1xf32>
    %69 = vector.broadcast %66 : vector<128x1xf32> to vector<128x128xf32>
    %70 = arith.subf %62, %69 : vector<128x128xf32>
    %71 = math.exp %70 : vector<128x128xf32>
    %c0_52 = arith.constant 0 : index
    %c2_53 = arith.constant 2 : index
    %72 = vector.load %arg11[%c0_52, %c2_53] : memref<128x4xf32, #tpu.memory_space<vmem>>, vector<128x1xf32>
    %73 = arith.mulf %68, %72 : vector<128x1xf32>
    %cst_54 = arith.constant dense<0.000000e+00> : vector<128xf32>
    %74 = vector.multi_reduction <add>, %71, %cst_54 [1] : vector<128x128xf32> to vector<128xf32>
    %75 = vector.shape_cast %74 : vector<128xf32> to vector<128x1xf32>
    %76 = arith.addf %73, %75 : vector<128x1xf32>
    %c0_55 = arith.constant 0 : index
    %c2_56 = arith.constant 2 : index
    %77 = vector.load %arg11[%c0_55, %c2_56] : memref<128x4xf32, #tpu.memory_space<vmem>>, vector<128x1xf32>
    tpu.vector_store %arg11[%c0_55, %c2_56], %76 {strides = array<i32>} : memref<128x4xf32, #tpu.memory_space<vmem>>, vector<128x1xf32>,
    %c0_57 = arith.constant 0 : index
    %c0_58 = arith.constant 0 : index
    %c16_59 = arith.constant 16 : index
    %78 = vector.load %arg5[%c0_57, %c0_58, %c16_59] : memref<1x128x32xf32, #tpu.memory_space<vmem>>, vector<1x128x8xf32>
    %79 = vector.shape_cast %78 : vector<1x128x8xf32> to vector<128x8xf32>
    %cst_60 = arith.constant dense<0.000000e+00> : vector<128x8xf32>
    %80 = tpu.matmul %71, %79, %cst_60 {dimension_numbers = #tpu.dot_dimension_numbers<[1], [0], [0], [1], [0, 0, 1, 1], [], []>} : vector<128x128xf32>, vector<128x8xf32>, vector<128x8xf32> -> vector<128x8xf32>
    %c0_61 = arith.constant 0 : index
    %c16_62 = arith.constant 16 : index
    %81 = vector.load %arg12[%c0_61, %c16_62] : memref<128x32xf32, #tpu.memory_space<vmem>>, vector<128x8xf32>
    %82 = vector.broadcast %68 : vector<128x1xf32> to vector<128x8xf32>
    %83 = arith.mulf %82, %81 : vector<128x8xf32>
    %84 = arith.addf %83, %80 : vector<128x8xf32>
    %c0_63 = arith.constant 0 : index
    %c16_64 = arith.constant 16 : index
    %85 = vector.load %arg12[%c0_63, %c16_64] : memref<128x32xf32, #tpu.memory_space<vmem>>, vector<128x8xf32>
    tpu.vector_store %arg12[%c0_63, %c16_64], %84 {strides = array<i32>} : memref<128x32xf32, #tpu.memory_space<vmem>>, vector<128x8xf32>,
    %c0_65 = arith.constant 0 : index
    %c2_66 = arith.constant 2 : index
    %86 = vector.load %arg10[%c0_65, %c2_66] : memref<128x4xf32, #tpu.memory_space<vmem>>, vector<128x1xf32>
    tpu.vector_store %arg10[%c0_65, %c2_66], %66 {strides = array<i32>} : memref<128x4xf32, #tpu.memory_space<vmem>>, vector<128x1xf32>,
    %c0_67 = arith.constant 0 : index
    %c24 = arith.constant 24 : index
    %87 = vector.load %arg9[%c0_67, %c24] : memref<128x32xf32, #tpu.memory_space<vmem>>, vector<128x8xf32>
    %c0_68 = arith.constant 0 : index
    %c24_69 = arith.constant 24 : index
    %c0_70 = arith.constant 0 : index
    %88 = vector.load %arg4[%c0_68, %c24_69, %c0_70] : memref<1x32x128xf32, #tpu.memory_space<vmem>>, vector<1x8x128xf32>
    %89 = vector.shape_cast %88 : vector<1x8x128xf32> to vector<8x128xf32>
    %cst_71 = arith.constant dense<0.000000e+00> : vector<128x128xf32>
    %90 = tpu.matmul %87, %89, %cst_71 {dimension_numbers = #tpu.dot_dimension_numbers<[1], [0], [0], [1], [0, 0, 1, 1], [], []>} : vector<128x8xf32>, vector<8x128xf32>, vector<128x128xf32> -> vector<128x128xf32>
    %c0_72 = arith.constant 0 : index
    %c3 = arith.constant 3 : index
    %91 = vector.load %arg10[%c0_72, %c3] : memref<128x4xf32, #tpu.memory_space<vmem>>, vector<128x1xf32>
    %cst_73 = arith.constant dense<0xFF800000> : vector<128xf32>
    %92 = vector.multi_reduction <maximumf>, %90, %cst_73 [1] : vector<128x128xf32> to vector<128xf32>
    %93 = vector.shape_cast %92 : vector<128xf32> to vector<128x1xf32>
    %94 = arith.maximumf %91, %93 : vector<128x1xf32>
    %95 = arith.subf %91, %94 : vector<128x1xf32>
    %96 = math.exp %95 : vector<128x1xf32>
    %97 = vector.broadcast %94 : vector<128x1xf32> to vector<128x128xf32>
    %98 = arith.subf %90, %97 : vector<128x128xf32>
    %99 = math.exp %98 : vector<128x128xf32>
    %c0_74 = arith.constant 0 : index
    %c3_75 = arith.constant 3 : index
    %100 = vector.load %arg11[%c0_74, %c3_75] : memref<128x4xf32, #tpu.memory_space<vmem>>, vector<128x1xf32>
    %101 = arith.mulf %96, %100 : vector<128x1xf32>
    %cst_76 = arith.constant dense<0.000000e+00> : vector<128xf32>
    %102 = vector.multi_reduction <add>, %99, %cst_76 [1] : vector<128x128xf32> to vector<128xf32>
    %103 = vector.shape_cast %102 : vector<128xf32> to vector<128x1xf32>
    %104 = arith.addf %101, %103 : vector<128x1xf32>
    %c0_77 = arith.constant 0 : index
    %c3_78 = arith.constant 3 : index
    %105 = vector.load %arg11[%c0_77, %c3_78] : memref<128x4xf32, #tpu.memory_space<vmem>>, vector<128x1xf32>
    tpu.vector_store %arg11[%c0_77, %c3_78], %104 {strides = array<i32>} : memref<128x4xf32, #tpu.memory_space<vmem>>, vector<128x1xf32>,
    %c0_79 = arith.constant 0 : index
    %c0_80 = arith.constant 0 : index
    %c24_81 = arith.constant 24 : index
    %106 = vector.load %arg5[%c0_79, %c0_80, %c24_81] : memref<1x128x32xf32, #tpu.memory_space<vmem>>, vector<1x128x8xf32>
    %107 = vector.shape_cast %106 : vector<1x128x8xf32> to vector<128x8xf32>
    %cst_82 = arith.constant dense<0.000000e+00> : vector<128x8xf32>
    %108 = tpu.matmul %99, %107, %cst_82 {dimension_numbers = #tpu.dot_dimension_numbers<[1], [0], [0], [1], [0, 0, 1, 1], [], []>} : vector<128x128xf32>, vector<128x8xf32>, vector<128x8xf32> -> vector<128x8xf32>
    %c0_83 = arith.constant 0 : index
    %c24_84 = arith.constant 24 : index
    %109 = vector.load %arg12[%c0_83, %c24_84] : memref<128x32xf32, #tpu.memory_space<vmem>>, vector<128x8xf32>
    %110 = vector.broadcast %96 : vector<128x1xf32> to vector<128x8xf32>
    %111 = arith.mulf %110, %109 : vector<128x8xf32>
    %112 = arith.addf %111, %108 : vector<128x8xf32>
    %c0_85 = arith.constant 0 : index
    %c24_86 = arith.constant 24 : index
    %113 = vector.load %arg12[%c0_85, %c24_86] : memref<128x32xf32, #tpu.memory_space<vmem>>, vector<128x8xf32>
    tpu.vector_store %arg12[%c0_85, %c24_86], %112 {strides = array<i32>} : memref<128x32xf32, #tpu.memory_space<vmem>>, vector<128x8xf32>,
    %c0_87 = arith.constant 0 : index
    %c3_88 = arith.constant 3 : index
    %114 = vector.load %arg10[%c0_87, %c3_88] : memref<128x4xf32, #tpu.memory_space<vmem>>, vector<128x1xf32>
    tpu.vector_store %arg10[%c0_87, %c3_88], %94 {strides = array<i32>} : memref<128x4xf32, #tpu.memory_space<vmem>>, vector<128x1xf32>,
    %c1_i32 = arith.constant 1 : i32
    %115 = arith.cmpi eq, %arg2, %c1_i32 : i32
    %116 = arith.extui %115 : i1 to i32
    %c0_i32_89 = arith.constant 0 : i32
    %117 = arith.cmpi ne, %116, %c0_i32_89 : i32
    scf.if %117 {
      %c0_90 = arith.constant 0 : index
      %c0_91 = arith.constant 0 : index
      %118 = vector.load %arg11[%c0_90, %c0_91] : memref<128x4xf32, #tpu.memory_space<vmem>>, vector<128x1xf32>
      %119 = tpu.reciprocal %118 {approx = true} : vector<128x1xf32> -> vector<128x1xf32>
      %c0_92 = arith.constant 0 : index
      %c0_93 = arith.constant 0 : index
      %120 = vector.load %arg12[%c0_92, %c0_93] : memref<128x32xf32, #tpu.memory_space<vmem>>, vector<128x8xf32>
      %121 = vector.broadcast %119 : vector<128x1xf32> to vector<128x8xf32>
      %122 = arith.mulf %120, %121 : vector<128x8xf32>
      %c0_94 = arith.constant 0 : index
      %c0_95 = arith.constant 0 : index
      %123 = vector.load %arg12[%c0_94, %c0_95] : memref<128x32xf32, #tpu.memory_space<vmem>>, vector<128x8xf32>
      tpu.vector_store %arg12[%c0_94, %c0_95], %122 {strides = array<i32>} : memref<128x32xf32, #tpu.memory_space<vmem>>, vector<128x8xf32>,
      %c0_96 = arith.constant 0 : index
      %c1_97 = arith.constant 1 : index
      %124 = vector.load %arg11[%c0_96, %c1_97] : memref<128x4xf32, #tpu.memory_space<vmem>>, vector<128x1xf32>
      %125 = tpu.reciprocal %124 {approx = true} : vector<128x1xf32> -> vector<128x1xf32>
      %c0_98 = arith.constant 0 : index
      %c8_99 = arith.constant 8 : index
      %126 = vector.load %arg12[%c0_98, %c8_99] : memref<128x32xf32, #tpu.memory_space<vmem>>, vector<128x8xf32>
      %127 = vector.broadcast %125 : vector<128x1xf32> to vector<128x8xf32>
      %128 = arith.mulf %126, %127 : vector<128x8xf32>
      %c0_100 = arith.constant 0 : index
      %c8_101 = arith.constant 8 : index
      %129 = vector.load %arg12[%c0_100, %c8_101] : memref<128x32xf32, #tpu.memory_space<vmem>>, vector<128x8xf32>
      tpu.vector_store %arg12[%c0_100, %c8_101], %128 {strides = array<i32>} : memref<128x32xf32, #tpu.memory_space<vmem>>, vector<128x8xf32>,
      %c0_102 = arith.constant 0 : index
      %c2_103 = arith.constant 2 : index
      %130 = vector.load %arg11[%c0_102, %c2_103] : memref<128x4xf32, #tpu.memory_space<vmem>>, vector<128x1xf32>
      %131 = tpu.reciprocal %130 {approx = true} : vector<128x1xf32> -> vector<128x1xf32>
      %c0_104 = arith.constant 0 : index
      %c16_105 = arith.constant 16 : index
      %132 = vector.load %arg12[%c0_104, %c16_105] : memref<128x32xf32, #tpu.memory_space<vmem>>, vector<128x8xf32>
      %133 = vector.broadcast %131 : vector<128x1xf32> to vector<128x8xf32>
      %134 = arith.mulf %132, %133 : vector<128x8xf32>
      %c0_106 = arith.constant 0 : index
      %c16_107 = arith.constant 16 : index
      %135 = vector.load %arg12[%c0_106, %c16_107] : memref<128x32xf32, #tpu.memory_space<vmem>>, vector<128x8xf32>
      tpu.vector_store %arg12[%c0_106, %c16_107], %134 {strides = array<i32>} : memref<128x32xf32, #tpu.memory_space<vmem>>, vector<128x8xf32>,
      %c0_108 = arith.constant 0 : index
      %c3_109 = arith.constant 3 : index
      %136 = vector.load %arg11[%c0_108, %c3_109] : memref<128x4xf32, #tpu.memory_space<vmem>>, vector<128x1xf32>
      %137 = tpu.reciprocal %136 {approx = true} : vector<128x1xf32> -> vector<128x1xf32>
      %c0_110 = arith.constant 0 : index
      %c24_111 = arith.constant 24 : index
      %138 = vector.load %arg12[%c0_110, %c24_111] : memref<128x32xf32, #tpu.memory_space<vmem>>, vector<128x8xf32>
      %139 = vector.broadcast %137 : vector<128x1xf32> to vector<128x8xf32>
      %140 = arith.mulf %138, %139 : vector<128x8xf32>
      %c0_112 = arith.constant 0 : index
      %c24_113 = arith.constant 24 : index
      %141 = vector.load %arg12[%c0_112, %c24_113] : memref<128x32xf32, #tpu.memory_space<vmem>>, vector<128x8xf32>
      tpu.vector_store %arg12[%c0_112, %c24_113], %140 {strides = array<i32>} : memref<128x32xf32, #tpu.memory_space<vmem>>, vector<128x8xf32>,
      %c0_114 = arith.constant 0 : index
      %c0_115 = arith.constant 0 : index
      %142 = vector.load %arg12[%c0_114, %c0_115] : memref<128x32xf32, #tpu.memory_space<vmem>>, vector<128x32xf32>
      %c0_116 = arith.constant 0 : index
      %c0_117 = arith.constant 0 : index
      %143 = vector.load %arg7[%c0_116, %c0_117] : memref<32x32xf32, #tpu.memory_space<vmem>>, vector<32x32xf32>
      %cst_118 = arith.constant dense<0.000000e+00> : vector<128x32xf32>
      %144 = tpu.matmul %142, %143, %cst_118 {dimension_numbers = #tpu.dot_dimension_numbers<[1], [0], [0], [1], [0, 0, 1, 1], [], []>} : vector<128x32xf32>, vector<32x32xf32>, vector<128x32xf32> -> vector<128x32xf32>
      %c0_119 = arith.constant 0 : index
      %c0_120 = arith.constant 0 : index
      %c0_121 = arith.constant 0 : index
      %145 = vector.load %arg8[%c0_119, %c0_120, %c0_121] : memref<1x128x32xf32, #tpu.memory_space<vmem>>, vector<1x128x32xf32>
      %146 = vector.shape_cast %145 : vector<1x128x32xf32> to vector<128x32xf32>
      %147 = vector.shape_cast %144 : vector<128x32xf32> to vector<1x128x32xf32>
      tpu.vector_store %arg8[%c0_119, %c0_120, %c0_121], %147 {strides = array<i32>} : memref<1x128x32xf32, #tpu.memory_space<vmem>>, vector<1x128x32xf32>,
    } else {
    }
    return
  }
  func.func @transform_0(%arg0: i32, %arg1: i32, %arg2: i32) -> (i32, i32, i32) {
    %c0_i32 = arith.constant 0 : i32
    %c0_i32_0 = arith.constant 0 : i32
    return %arg0, %arg1, %c0_i32 : i32, i32, i32
  }
  func.func @transform_1(%arg0: i32, %arg1: i32, %arg2: i32) -> (i32, i32, i32) {
    %c0_i32 = arith.constant 0 : i32
    %c0_i32_0 = arith.constant 0 : i32
    return %arg0, %c0_i32, %arg2 : i32, i32, i32
  }
  func.func @transform_2(%arg0: i32, %arg1: i32, %arg2: i32) -> (i32, i32, i32) {
    %c0_i32 = arith.constant 0 : i32
    %c0_i32_0 = arith.constant 0 : i32
    return %arg0, %arg2, %c0_i32 : i32, i32, i32
  }
  func.func @transform_3(%arg0: i32, %arg1: i32, %arg2: i32) -> (i32, i32) {
    %c0_i32 = arith.constant 0 : i32
    %c0_i32_0 = arith.constant 0 : i32
    %c0_i32_1 = arith.constant 0 : i32
    return %c0_i32, %c0_i32_0 : i32, i32
  }
  func.func @transform_4(%arg0: i32, %arg1: i32, %arg2: i32) -> (i32, i32) {
    %c0_i32 = arith.constant 0 : i32
    %c0_i32_0 = arith.constant 0 : i32
    %c0_i32_1 = arith.constant 0 : i32
    return %c0_i32, %c0_i32_0 : i32, i32
  }
  func.func @transform_5(%arg0: i32, %arg1: i32, %arg2: i32) -> (i32, i32, i32) {
    %c0_i32 = arith.constant 0 : i32
    %c0_i32_0 = arith.constant 0 : i32
    return %arg0, %arg1, %c0_i32 : i32, i32, i32
  }
}

</mosaic_0001>

<bundles_post_ra>
// kernel: tpu_custom_call.1
= control target key start
LH: loop header
LB: loop body
LE: loop exit
PB: predicated region body
PF: predicated region fallthrough
CT: control target
= control target key end

     0   :  { %s9830_s0 = inlined_call_operand.vmem [shape: f32[2,256,32], index: 0, kind: input, shape index: {}]   ;;  %s9831_s1 = inlined_call_operand.vmem [shape: f32[2,32,256], index: 1, kind: input, shape index: {}]   ;;  %s9832_s2 = inlined_call_operand.vmem [shape: f32[2,256,32], index: 2, kind: input, shape index: {}]   ;;  %s9833_s3 = inlined_call_operand.vmem [shape: f32[32,32], index: 3, kind: input, shape index: {}]   ;;  %s9834_s4 = inlined_call_operand.vmem [shape: f32[32,32], index: 4, kind: input, shape index: {}]   ;;  %s9835_s5 = inlined_call_operand.vmem [shape: f32[2,256,32], index: 5, kind: output, shape index: {}]  }
   0x1   :  { %9995 = sst [smem:[#allocation110_spill]] %s9831_s1 }
   0x2   :  { %s7194_s18 = smov 0   ;;  %s7196_s19 = smov 0  }
   0x3   :  { %s7198_s20 = smov 0   ;;  %s7200_s21 = smov 0  }
   0x4   :  { %s7202_s22 = smov 0   ;;  %s7204_s23 = smov 0  }
   0x5   :  { %s7206_s24 = smov 0   ;;  %s7208_s25 = smov 0  }
   0x6   :  { %s7210_s26 = smov 0  }
   0x7 LB: > { %s27_s27 = sadd.s32 1, %s7134_s23  ;;  %s30_s28 = sadd.s32 1, %s7138_s24  ;;  %s7146_s26 = sphi %s7210_s26, %s15_s26   ;;  %s7142_s25 = sphi %s7208_s25, %s10359_s25   ;;  %s7138_s24 = sphi %s7206_s24, %s10358_s24   ;;  %s7134_s23 = sphi %s7204_s23, %s10357_s23   ;;  %s7130_s22 = sphi %s7202_s22, %s10356_s22   ;;  %s7126_s21 = sphi %s7200_s21, %s10355_s21   ;;  %s7122_s20 = sphi %s7198_s20, %s10354_s20   ;;  %s7118_s19 = sphi %s7196_s19, %s10353_s19   ;;  %s7114_s18 = sphi %s7194_s18, %s10352_s18  }
   0x8   : > { %p28_p0 = scmp.ge.s32.totalorder %s27_s27, 2  ;;  %p78_p1 = scmp.ne.s32.totalorder %s7118_s19, %s7114_s18 }
   0x9   : > { %p79_p2 = scmp.eq.s32.totalorder %s7146_s26, 0  ;;  %s34_s29 = sadd.s32 1, %s7142_s25 }
   0xa   : > { %s10361_s27 = smov (%p28_p0, %s27_s27), 0  ;;  %s10363_s28 = smov (!%p28_p0, %s30_s28), %s7138_s24 }
   0xb   : > { %p32_p3 = scmp.ge.s32.totalorder %s10363_s28, 2  ;;  %p80_p4 = por %p79_p2, %p78_p1 }
   0xc   : > { %s67_s30 = ssub.s32 %s7134_s23, %s10361_s27  ;;  %s71_s8 = sadd.s32 1, %s7118_s19 }
   0xd   : > { %s10365_s28 = smov (%p32_p3, %s10363_s28), 0  ;;  %s10367_s29 = smov (!%p32_p3, %s34_s29), %s7142_s25 }
   0xe   : > { %p36_p5 = scmp.ge.s32.totalorder %s10367_s29, 2  ;;  %p5643_p7 = scmp.ge.s32.totalorder %s7146_s26, 8 }
  0x10   : > { %s10369_s29 = smov (%p36_p5, %s10367_s29), 0  ;;  %208 = sbr.rel (%p5643_p7) target bundleno = 35 (0x23), region = 24 }
  0x11   : > { %9996 = sst [smem:[#allocation7_spill]] %s10369_s29  ;;  %s66_s6 = ssub.s32 %s7142_s25, %s10369_s29 }
  0x12   : > { %s68_s7 = sor.u32 %s67_s30, %s66_s6 }
  0x13   : > { %p69_p6 = scmp.eq.s32.totalorder %s68_s7, 0 }
  0x15   : > { %s7259_s9 = scalar_select %p69_p6, %s7118_s19, %s71_s8  }
  0x17   : > { %224 = sbr.rel (!%p80_p4) target bundleno = 35 (0x23), region = 32  ;;  %s226_s10 = sand.u32 (%p80_p4), 1, %s7118_s19  }
  0x18   : > { %s5645_s11 = sshll.u32 (%p80_p4), %s7142_s25, 3  ;;  %s5644_s12 = sshll.u32 (%p80_p4), %s226_s10, 5 }
  0x19   : > { %s230_s13 = sadd.s32 (%p80_p4), %s7134_s23, %s5645_s11  ;;  %s9997_s1 = sld [smem:[#allocation110_spill]] (%p80_p4) }
  0x1a   : > { %s5646_s14 = sshll.u32 (%p80_p4), %s230_s13, 3  ;;  %s228_s30 = scalar_lea.vmem (%p80_p4), [#allocation6], %s5644_s12 }
  0x1f   : > { %s232_s17 = scalar_lea.vmem %s9997_s1, %s5646_s14 }
  0x20   : > { %v266_v0 = vld [vmem:[%s232_s17] sm:$0xff]  ;;  %v268_v1 = vld [vmem:[%s232_s17 + $0x10] sm:$0xff] }
  0x21   : > { %v270_v2 = vld [vmem:[%s232_s17 + $0x20] sm:$0xff]  ;;  %267 = vst [vmem:[%s228_s30] sm:$0xff] %v266_v0  ;;  %269 = vst [vmem:[%s228_s30 + $0x8] sm:$0xff] %v268_v1  ;;  %v272_v3 = vld [vmem:[%s232_s17 + $0x30] sm:$0xff] }
  0x22   : > { %271 = vst [vmem:[%s228_s30 + $0x10] sm:$0xff] %v270_v2  ;;  %273 = vst [vmem:[%s228_s30 + $0x18] sm:$0xff] %v272_v3 }
  0x23 PF: > { %p5647_p8 = scmp.ge.s32.totalorder %s7146_s26, 1  ;;  %p291_p9 = scmp.lt.s32.totalorder %s7146_s26, 9 }
  0x25   : > { %p292_p10 = pnand %p5647_p8, %p291_p9 }
  0x27   : > { %295 = sbr.rel (%p292_p10) target bundleno = 2856 (0xb28), region = 74 }
  0x2e   : > { %s298_s6 = sand.u32 1, %s7114_s18   ;;  %s5649_s7 = sshll.u32 %s7126_s21, 4 }
  0x2f   : > { %s5648_s8 = sshll.u32 %s298_s6, 5  ;;  %p348_p11 = scmp.lt.s32.totalorder %s7130_s22, 1 }
  0x30   : > { %p350_p12 = scmp.lt.s32.totalorder %s5649_s7, 31  ;;  %s5652_s11 = sshll.u32 %s7122_s20, 4 }
  0x31   : > { %s10371_s22 = smov (!%p348_p11, %s7130_s22), 1  ;;  %p360_p13 = scmp.lt.s32.totalorder %s5652_s11, 31 }
  0x32   : > { %s10373_s7 = smov (!%p350_p12, %s5649_s7), 31  ;;  %s5650_s10 = sshll.u32 %s10371_s22, 5 }
  0x33   : > { %s353_s12 = sadd.s32 %s5650_s10, %s10373_s7  ;;  %s10375_s11 = smov (!%p360_p13, %s5652_s11), 31 }
  0x34   : > { %s5651_s13 = sshll.u32 %s353_s12, 3  ;;  %s363_s21 = sadd.s32 %s5650_s10, %s10375_s11 }
  0x35   : > { %s7278_s16 = scalar_lea.vmem %s9830_s0, %s5651_s13  ;;  %s7283_s18 = scalar_lea.vmem %s9835_s5, %s5651_s13 }
  0x36   : > { %s5654_s6 = sshll.u32 %s363_s21, 3  ;;  %s7290_s7 = scalar_lea.vmem [#allocation6], %s5648_s8 }
  0x37   : > { %s7288_s22 = scalar_lea.vmem %s9832_s2, %s5654_s6  ;;  %p5658_p0 = scmp.ne.s32.totalorder %s7122_s20, 0 }
  0x38   : > { %v397_v4 = vld [vmem:[%s9833_s3] sm:$0xff] (!%p5658_p0)  ;;  %v398_v5 = vld [vmem:[%s9833_s3 + $0x8] sm:$0xff] (!%p5658_p0)  ;;  %v399_v6 = vld [vmem:[%s9833_s3 + $0x10] sm:$0xff] (!%p5658_p0)  ;;  %vm401_vm0 = vcmask (!%p5658_p0), 261120   ;;  %vm627_vm1 = vcmask (!%p5658_p0), 31744   ;;  %v7148_v26 = vmov (!%p5658_p0), -inf  }
  0x39   : > { %380 = sbr.rel (%p5658_p0) target bundleno = 296 (0x128), region = 82  ;;  %v6386_v7 = vpack.c.bf16 (!%p5658_p0), %v398_v5, %v397_v4  ;;  %v400_v8 = vld [vmem:[%s9833_s3 + $0x18] sm:$0xff] (!%p5658_p0)  ;;  %v381_v9 = vld [vmem:[%s7278_s16] sm:$0xff] (!%p5658_p0)  ;;  %v382_v12 = vld [vmem:[%s7278_s16 + $0x8] sm:$0xff] (!%p5658_p0)  ;;  %628 = vst.msk [vmem:[#allocation3] sm:$0xff] (!%p5658_p0), %vm627_vm1, %v7148_v26  ;;  %v7149_v27 = vmov (!%p5658_p0), 0.0  }
  0x3a   : > { %v389_v10 = vld [vmem:[%s7278_s16 + $0x40] sm:$0xff] (!%p5658_p0)  ;;  %v6390_v11 = vpack.c.bf16 (!%p5658_p0), %v400_v8, %v399_v6  ;;  %6002 = vmatprep.mubr.msk.f32.mxu0 (!%p5658_p0), %vm401_vm0, %v381_v9  ;;  %v390_v13 = vld [vmem:[%s7278_s16 + $0x48] sm:$0xff] (!%p5658_p0)  ;;  %v383_v14 = vld [vmem:[%s7278_s16 + $0x10] sm:$0xff] (!%p5658_p0)  ;;  %629 = vst.msk [vmem:[#allocation3 + $0x8] sm:$0xff] (!%p5658_p0), %vm627_vm1, %v7148_v26 }
  0x3b   : > { %6014 = vmatprep.mubr.msk.f32.mxu1 (!%p5658_p0), %vm401_vm0, %v389_v10  ;;  %6387 = vmatprep.subr.bf16.mxu0 (!%p5658_p0), %v6386_v7  ;;  %v391_v15 = vld [vmem:[%s7278_s16 + $0x50] sm:$0xff] (!%p5658_p0)  ;;  %v384_v16 = vld [vmem:[%s7278_s16 + $0x18] sm:$0xff] (!%p5658_p0)  ;;  %v385_v18 = vld [vmem:[%s7278_s16 + $0x20] sm:$0xff] (!%p5658_p0)  ;;  %630 = vst.msk [vmem:[#allocation3 + $0x10] sm:$0xff] (!%p5658_p0), %vm627_vm1, %v7148_v26 }
  0x3c   : > { %6530 = vmatprep.subr.bf16.mxu1 (!%p5658_p0), %v6386_v7  ;;  %6389 = vmatpush3.bf16.msra.mxu0 (!%p5658_p0), %v6386_v7  ;;  %v392_v17 = vld [vmem:[%s7278_s16 + $0x58] sm:$0xff] (!%p5658_p0)  ;;  %v393_v19 = vld [vmem:[%s7278_s16 + $0x60] sm:$0xff] (!%p5658_p0)  ;;  %v386_v20 = vld [vmem:[%s7278_s16 + $0x28] sm:$0xff] (!%p5658_p0)  ;;  %631 = vst.msk [vmem:[#allocation3 + $0x18] sm:$0xff] (!%p5658_p0), %vm627_vm1, %v7148_v26 }
  0x3d   : > { %6532 = vmatpush3.bf16.msra.mxu1 (!%p5658_p0), %v6386_v7  ;;  %6391 = vmatprep.subr.bf16.mxu0 (!%p5658_p0), %v6390_v11  ;;  %v394_v21 = vld [vmem:[%s7278_s16 + $0x68] sm:$0xff] (!%p5658_p0)  ;;  %v387_v22 = vld [vmem:[%s7278_s16 + $0x30] sm:$0xff] (!%p5658_p0)  ;;  %v388_v24 = vld [vmem:[%s7278_s16 + $0x38] sm:$0xff] (!%p5658_p0)  ;;  %632 = vst.msk [vmem:[#allocation3 + $0x20] sm:$0xff] (!%p5658_p0), %vm627_vm1, %v7148_v26 }
  0x3e   : > { %6531 = vmatprep.subr.bf16.mxu1 (!%p5658_p0), %v6390_v11  ;;  %v395_v23 = vld [vmem:[%s7278_s16 + $0x70] sm:$0xff] (!%p5658_p0)  ;;  %v396_v25 = vld [vmem:[%s7278_s16 + $0x78] sm:$0xff] (!%p5658_p0)  ;;  %633 = vst.msk [vmem:[#allocation3 + $0x28] sm:$0xff] (!%p5658_p0), %vm627_vm1, %v7148_v26  ;;  %634 = vst.msk [vmem:[#allocation3 + $0x30] sm:$0xff] (!%p5658_p0), %vm627_vm1, %v7148_v26 }
  0x3f   : > { %635 = vst.msk [vmem:[#allocation3 + $0x38] sm:$0xff] (!%p5658_p0), %vm627_vm1, %v7148_v26  ;;  %636 = vst.msk [vmem:[#allocation3 + $0x40] sm:$0xff] (!%p5658_p0), %vm627_vm1, %v7148_v26 }
  0x40   : > { %6393 = vmatpush3.bf16.msra.mxu0 %v6390_v11  ;;  %637 = vst.msk [vmem:[#allocation3 + $0x48] sm:$0xff] %vm627_vm1, %v7148_v26  ;;  %638 = vst.msk [vmem:[#allocation3 + $0x50] sm:$0xff] %vm627_vm1, %v7148_v26 }
  0x41   : > { %6533 = vmatpush3.bf16.msra.mxu1 %v6390_v11  ;;  %639 = vst.msk [vmem:[#allocation3 + $0x58] sm:$0xff] %vm627_vm1, %v7148_v26  ;;  %640 = vst.msk [vmem:[#allocation3 + $0x60] sm:$0xff] %vm627_vm1, %v7148_v26 }
  0x42   : > { %641 = vst.msk [vmem:[#allocation3 + $0x68] sm:$0xff] %vm627_vm1, %v7148_v26  ;;  %642 = vst.msk [vmem:[#allocation3 + $0x70] sm:$0xff] %vm627_vm1, %v7148_v26 }
  0x43   : > { %6003 = vmatmul.mubr.msk.f32.vlgmr.msra.gmra.mrb[0].mxu0 %vm401_vm0, %v382_v12  ;;  %643 = vst.msk [vmem:[#allocation3 + $0x78] sm:$0xff] %vm627_vm1, %v7148_v26  ;;  %644 = vst.msk [vmem:[#allocation4] sm:$0xff] %vm627_vm1, %v7149_v27 }
  0x44   : > { %6015 = vmatmul.mubr.msk.f32.vlgmr.msra.gmra.mrb[0].mxu1 %vm401_vm0, %v390_v13  ;;  %6005 = vmatprep.mubr.msk.f32.mxu0 %vm401_vm0, %v383_v14  ;;  %645 = vst.msk [vmem:[#allocation4 + $0x8] sm:$0xff] %vm627_vm1, %v7149_v27  ;;  %646 = vst.msk [vmem:[#allocation4 + $0x10] sm:$0xff] %vm627_vm1, %v7149_v27 }
  0x45   : > { %6017 = vmatprep.mubr.msk.f32.mxu1 %vm401_vm0, %v391_v15  ;;  %647 = vst.msk [vmem:[#allocation4 + $0x18] sm:$0xff] %vm627_vm1, %v7149_v27  ;;  %648 = vst.msk [vmem:[#allocation4 + $0x20] sm:$0xff] %vm627_vm1, %v7149_v27 }
  0x46   : > { %649 = vst.msk [vmem:[#allocation4 + $0x28] sm:$0xff] %vm627_vm1, %v7149_v27  ;;  %650 = vst.msk [vmem:[#allocation4 + $0x30] sm:$0xff] %vm627_vm1, %v7149_v27 }
  0x47   : > { %6006 = vmatmul.mubr.msk.f32.gmra.mrb[2].mxu0 %vm401_vm0, %v384_v16  ;;  %651 = vst.msk [vmem:[#allocation4 + $0x38] sm:$0xff] %vm627_vm1, %v7149_v27  ;;  %652 = vst.msk [vmem:[#allocation4 + $0x40] sm:$0xff] %vm627_vm1, %v7149_v27 }
  0x48   : > { %6018 = vmatmul.mubr.msk.f32.gmra.mrb[2].mxu1 %vm401_vm0, %v392_v17  ;;  %6008 = vmatprep.mubr.msk.f32.mxu0 %vm401_vm0, %v385_v18  ;;  %653 = vst.msk [vmem:[#allocation4 + $0x48] sm:$0xff] %vm627_vm1, %v7149_v27  ;;  %654 = vst.msk [vmem:[#allocation4 + $0x50] sm:$0xff] %vm627_vm1, %v7149_v27 }
  0x49   : > { %6020 = vmatprep.mubr.msk.f32.mxu1 %vm401_vm0, %v393_v19  ;;  %655 = vst.msk [vmem:[#allocation4 + $0x58] sm:$0xff] %vm627_vm1, %v7149_v27  ;;  %656 = vst.msk [vmem:[#allocation4 + $0x60] sm:$0xff] %vm627_vm1, %v7149_v27 }
  0x4a   : > { %657 = vst.msk [vmem:[#allocation4 + $0x68] sm:$0xff] %vm627_vm1, %v7149_v27  ;;  %658 = vst.msk [vmem:[#allocation4 + $0x70] sm:$0xff] %vm627_vm1, %v7149_v27 }
  0x4b   : > { %6009 = vmatmul.mubr.msk.f32.gmra.mrb[4].mxu0 %vm401_vm0, %v386_v20  ;;  %659 = vst.msk [vmem:[#allocation4 + $0x78] sm:$0xff] %vm627_vm1, %v7149_v27 }
  0x4c   : > { %6021 = vmatmul.mubr.msk.f32.gmra.mrb[4].mxu1 %vm401_vm0, %v394_v21  ;;  %6011 = vmatprep.mubr.msk.f32.mxu0 %vm401_vm0, %v387_v22  ;;  %660 = vst.msk [vmem:[#allocation5] sm:$0xff] %vm401_vm0, %v7149_v27  ;;  %661 = vst.msk [vmem:[#allocation5 + $0x8] sm:$0xff] %vm401_vm0, %v7149_v27 }
  0x4d   : > { %6023 = vmatprep.mubr.msk.f32.mxu1 %vm401_vm0, %v395_v23  ;;  %662 = vst.msk [vmem:[#allocation5 + $0x10] sm:$0xff] %vm401_vm0, %v7149_v27  ;;  %663 = vst.msk [vmem:[#allocation5 + $0x18] sm:$0xff] %vm401_vm0, %v7149_v27 }
  0x4e   : > { %664 = vst.msk [vmem:[#allocation5 + $0x20] sm:$0xff] %vm401_vm0, %v7149_v27  ;;  %665 = vst.msk [vmem:[#allocation5 + $0x28] sm:$0xff] %vm401_vm0, %v7149_v27 }
  0x4f   : > { %6012 = vmatmul.mubr.msk.f32.gmra.mrb[6].mxu0 %vm401_vm0, %v388_v24  ;;  %666 = vst.msk [vmem:[#allocation5 + $0x30] sm:$0xff] %vm401_vm0, %v7149_v27  ;;  %667 = vst.msk [vmem:[#allocation5 + $0x38] sm:$0xff] %vm401_vm0, %v7149_v27 }
  0x50   : > { %6024 = vmatmul.mubr.msk.f32.gmra.mrb[6].mxu1 %vm401_vm0, %v396_v25  ;;  %668 = vst.msk [vmem:[#allocation5 + $0x40] sm:$0xff] %vm401_vm0, %v7149_v27  ;;  %669 = vst.msk [vmem:[#allocation5 + $0x48] sm:$0xff] %vm401_vm0, %v7149_v27 }
  0x51   : > { %670 = vst.msk [vmem:[#allocation5 + $0x50] sm:$0xff] %vm401_vm0, %v7149_v27  ;;  %671 = vst.msk [vmem:[#allocation5 + $0x58] sm:$0xff] %vm401_vm0, %v7149_v27 }
  0x52   : > { %672 = vst.msk [vmem:[#allocation5 + $0x60] sm:$0xff] %vm401_vm0, %v7149_v27  ;;  %673 = vst.msk [vmem:[#allocation5 + $0x68] sm:$0xff] %vm401_vm0, %v7149_v27 }
  0x53   : > { %674 = vst.msk [vmem:[#allocation5 + $0x70] sm:$0xff] %vm401_vm0, %v7149_v27  ;;  %675 = vst.msk [vmem:[#allocation5 + $0x78] sm:$0xff] %vm401_vm0, %v7149_v27 }
 0x116   : > { %v6004_v28 = vpop.f32.mrb[0].mxu0 }
 0x117   : > { %v6016_v29 = vpop.f32.mrb[0].mxu1  ;;  %v596_v30 = vmul.f32 0.35355338, %v6004_v28  ;;  %v516_v32 = vpop.f32.mrb[1].mxu0 }
 0x118   : > { %v604_v31 = vmul.f32 0.35355338, %v6016_v29  ;;  %v556_v33 = vpop.f32.mrb[1].mxu1  ;;  %v595_v34 = vmul.f32 0.35355338, %v516_v32 }
 0x119   : > { %v603_v35 = vmul.f32 0.35355338, %v556_v33  ;;  %612 = vst.msk [vmem:[#allocation2 + $0x8] sm:$0xff] %vm401_vm0, %v596_v30 }
 0x11a   : > { %620 = vst.msk [vmem:[#allocation2 + $0x48] sm:$0xff] %vm401_vm0, %v604_v31  ;;  %611 = vst.msk [vmem:[#allocation2] sm:$0xff] %vm401_vm0, %v595_v34  ;;  %v6007_v36 = vpop.f32.mrb[2].mxu0 }
 0x11b   : > { %619 = vst.msk [vmem:[#allocation2 + $0x40] sm:$0xff] %vm401_vm0, %v603_v35  ;;  %v6019_v37 = vpop.f32.mrb[2].mxu1  ;;  %v598_v38 = vmul.f32 0.35355338, %v6007_v36  ;;  %v526_v40 = vpop.f32.mrb[3].mxu0 }
 0x11c   : > { %v606_v39 = vmul.f32 0.35355338, %v6019_v37  ;;  %v566_v41 = vpop.f32.mrb[3].mxu1  ;;  %v597_v42 = vmul.f32 0.35355338, %v526_v40 }
 0x11d   : > { %v605_v43 = vmul.f32 0.35355338, %v566_v41  ;;  %614 = vst.msk [vmem:[#allocation2 + $0x18] sm:$0xff] %vm401_vm0, %v598_v38 }
 0x11e   : > { %622 = vst.msk [vmem:[#allocation2 + $0x58] sm:$0xff] %vm401_vm0, %v606_v39  ;;  %613 = vst.msk [vmem:[#allocation2 + $0x10] sm:$0xff] %vm401_vm0, %v597_v42  ;;  %v6010_v44 = vpop.f32.mrb[4].mxu0 }
 0x11f   : > { %621 = vst.msk [vmem:[#allocation2 + $0x50] sm:$0xff] %vm401_vm0, %v605_v43  ;;  %v6022_v45 = vpop.f32.mrb[4].mxu1  ;;  %v600_v46 = vmul.f32 0.35355338, %v6010_v44  ;;  %v536_v48 = vpop.f32.mrb[5].mxu0 }
 0x120   : > { %v608_v47 = vmul.f32 0.35355338, %v6022_v45  ;;  %v576_v49 = vpop.f32.mrb[5].mxu1  ;;  %v599_v50 = vmul.f32 0.35355338, %v536_v48 }
 0x121   : > { %v607_v51 = vmul.f32 0.35355338, %v576_v49  ;;  %616 = vst.msk [vmem:[#allocation2 + $0x28] sm:$0xff] %vm401_vm0, %v600_v46 }
 0x122   : > { %624 = vst.msk [vmem:[#allocation2 + $0x68] sm:$0xff] %vm401_vm0, %v608_v47  ;;  %615 = vst.msk [vmem:[#allocation2 + $0x20] sm:$0xff] %vm401_vm0, %v599_v50  ;;  %v6013_v52 = vpop.f32.mrb[6].mxu0 }
 0x123   : > { %623 = vst.msk [vmem:[#allocation2 + $0x60] sm:$0xff] %vm401_vm0, %v607_v51  ;;  %v6025_v53 = vpop.f32.mrb[6].mxu1  ;;  %v602_v54 = vmul.f32 0.35355338, %v6013_v52  ;;  %v546_v56 = vpop.f32.mrb[7].mxu0 }
 0x124   : > { %v610_v55 = vmul.f32 0.35355338, %v6025_v53  ;;  %v586_v57 = vpop.f32.mrb[7].mxu1  ;;  %v601_v58 = vmul.f32 0.35355338, %v546_v56 }
 0x125   : > { %v609_v59 = vmul.f32 0.35355338, %v586_v57  ;;  %618 = vst.msk [vmem:[#allocation2 + $0x38] sm:$0xff] %vm401_vm0, %v602_v54 }
 0x126   : > { %626 = vst.msk [vmem:[#allocation2 + $0x78] sm:$0xff] %vm401_vm0, %v610_v55  ;;  %617 = vst.msk [vmem:[#allocation2 + $0x30] sm:$0xff] %vm401_vm0, %v601_v58 }
 0x127   : > { %625 = vst.msk [vmem:[#allocation2 + $0x70] sm:$0xff] %vm401_vm0, %v609_v59 }
 0x128 PF: > { %v7401_v60 = vld [vmem:[#allocation2] sm:$0xff]  ;;  %v7403_v61 = vld [vmem:[#allocation2 + $0x8] sm:$0xff]  ;;  %vm693_vm2 = vcmask 64512   ;;  %s7150_s8 = smov 120   ;;  %v7409_v62 = vld [vmem:[#allocation2 + $0x10] sm:$0xff]  ;;  %s7151_s16 = smov 112  }
 0x129   : > { %1578 = vrot.lane.b32.xlu1 %v7401_v60, %s7150_s8  ;;  %1580 = vrot.lane.b32.xlu0 %v7403_v61, %s7150_s8  ;;  %v7411_v63 = vld [vmem:[#allocation2 + $0x18] sm:$0xff]  ;;  %v692_v0 = vld [vmem:[%s7290_s7] sm:$0xff]  ;;  %v7422_v2 = vld [vmem:[#allocation2 + $0x28] sm:$0xff]  ;;  %s7152_s17 = smov 104   ;;  %vm1207_vm3 = vcmask 7168   ;;  %vm2107_vm4 = vcmask 15368  }
 0x12a   : > { %6028 = vmatprep.mubr.msk.f32.mxu0 %vm693_vm2, %v7401_v60  ;;  %6026 = vmatprep.subr.mxu0 %v692_v0  ;;  %v7420_v1 = vld [vmem:[#allocation2 + $0x20] sm:$0xff]  ;;  %v1561_v5 = vld [vmem:[%s7290_s7 + $0x8] sm:$0xff]  ;;  %v2126_v10 = vld [vmem:[%s7288_s22 + $0x10] sm:$0xff]  ;;  %vm3136_vm5 = vcmask 23568   ;;  %vm4165_vm6 = vcmask 31768   ;;  %s7157_s30 = smov 8  }
 0x12b   : > { %6027 = vmatpush3.msra.mxu0 %v692_v0  ;;  %v7445_v6 = vld [vmem:[#allocation2 + $0x40] sm:$0xff]  ;;  %v7447_v7 = vld [vmem:[#allocation2 + $0x48] sm:$0xff]  ;;  %v2127_v11 = vld [vmem:[%s7288_s22 + $0x18] sm:$0xff]  ;;  %vm2541_vm7 = vcmask 130112   ;;  %s7158_s21 = smov 16   ;;  %vm3570_vm8 = vcmask 195712  }
 0x12c   : > { %6029 = vmatmul.mubr.msk.f32.vlgmr.msra.gmra.mrb[0].mxu0 %vm693_vm2, %v7403_v61  ;;  %v7434_v4 = vld [vmem:[#allocation2 + $0x38] sm:$0xff]  ;;  %6108 = vmatprep.subr.mxu0 %v1561_v5  ;;  %v2124_v8 = vld [vmem:[%s7288_s22] sm:$0xff]  ;;  %v2125_v9 = vld [vmem:[%s7288_s22 + $0x8] sm:$0xff]  ;;  %v6398_v16 = vpack.c.bf16 %v2127_v11, %v2126_v10  ;;  %v6647_v28 = vpack.i.bf16 %v2127_v11, %v2126_v10  ;;  %s7159_s6 = smov 24   ;;  %vm4599_vm9 = vcmask 261312   ;;  %p5739_p1 = scmp.ne.s32.totalorder %s7122_s20, 1 }
 0x12d   : > { %1582 = vrot.lane.b32.xlu1 %v7409_v62, %s7150_s8  ;;  %1584 = vrot.lane.b32.xlu0 %v7411_v63, %s7150_s8  ;;  %v7432_v3 = vld [vmem:[#allocation2 + $0x30] sm:$0xff]  ;;  %v6394_v12 = vpack.c.bf16 %v2125_v9, %v2124_v8  ;;  %v7466_v15 = vld [vmem:[#allocation2 + $0x58] sm:$0xff]  ;;  %v2128_v17 = vld [vmem:[%s7288_s22 + $0x20] sm:$0xff]  ;;  %v6642_v27 = vpack.i.bf16 %v2125_v9, %v2124_v8  ;;  %vm5296_vm10 = vcmask (!%p5739_p1), 261120  }
 0x12e   : > { %6031 = vmatprep.mubr.msk.f32.mxu0 %vm693_vm2, %v7409_v62  ;;  %6109 = vmatpush3.msra.mxu0 %v1561_v5  ;;  %v7462_v13 = vld [vmem:[%s7290_s7 + $0x10] sm:$0xff]  ;;  %v2129_v18 = vld [vmem:[%s7288_s22 + $0x28] sm:$0xff]  ;;  %v7479_v19 = vld [vmem:[#allocation2 + $0x60] sm:$0xff] }
 0x12f   : > { %v7464_v14 = vld [vmem:[#allocation2 + $0x50] sm:$0xff]  ;;  %6190 = vmatprep.subr.mxu0 %v7462_v13  ;;  %6395 = vmatprep.subr.bf16.mxu1 %v6394_v12  ;;  %v7481_v20 = vld [vmem:[#allocation2 + $0x68] sm:$0xff]  ;;  %v6402_v21 = vpack.c.bf16 %v2129_v18, %v2128_v17  ;;  %v2131_v23 = vld [vmem:[%s7288_s22 + $0x38] sm:$0xff]  ;;  %v6652_v34 = vpack.i.bf16 %v2129_v18, %v2128_v17 }
 0x130   : > { %6032 = vmatmul.mubr.msk.f32.gmra.mrb[2].mxu0 %vm693_vm2, %v7411_v63  ;;  %6397 = vmatpush3.bf16.msra.mxu1 %v6394_v12  ;;  %v2130_v22 = vld [vmem:[%s7288_s22 + $0x30] sm:$0xff]  ;;  %v7495_v25 = vld [vmem:[#allocation2 + $0x78] sm:$0xff]  ;;  %v2132_v29 = vld [vmem:[%s7288_s22 + $0x40] sm:$0xff] }
 0x131   : > { %1586 = vrot.lane.b32.xlu1 %v7420_v1, %s7150_s8  ;;  %1588 = vrot.lane.b32.xlu0 %v7422_v2, %s7150_s8  ;;  %v7493_v24 = vld [vmem:[#allocation2 + $0x70] sm:$0xff]  ;;  %v6406_v26 = vpack.c.bf16 %v2131_v23, %v2130_v22  ;;  %v2133_v30 = vld [vmem:[%s7288_s22 + $0x48] sm:$0xff]  ;;  %v2135_v32 = vld [vmem:[%s7288_s22 + $0x58] sm:$0xff]  ;;  %v6657_v39 = vpack.i.bf16 %v2131_v23, %v2130_v22 }
 0x132   : > { %6034 = vmatprep.mubr.msk.f32.mxu0 %vm693_vm2, %v7420_v1  ;;  %6399 = vmatprep.subr.bf16.mxu1 %v6398_v16  ;;  %v2134_v31 = vld [vmem:[%s7288_s22 + $0x50] sm:$0xff]  ;;  %v6410_v33 = vpack.c.bf16 %v2133_v30, %v2132_v29  ;;  %v2139_v37 = vld [vmem:[%s7288_s22 + $0x78] sm:$0xff]  ;;  %v2136_v40 = vld [vmem:[%s7288_s22 + $0x60] sm:$0xff]  ;;  %v6662_v44 = vpack.i.bf16 %v2133_v30, %v2132_v29 }
 0x133   : > { %v6667_v35 = vpack.i.bf16 %v2135_v32, %v2134_v31  ;;  %v2138_v36 = vld [vmem:[%s7288_s22 + $0x70] sm:$0xff]  ;;  %v6414_v38 = vpack.c.bf16 %v2135_v32, %v2134_v31  ;;  %v2137_v41 = vld [vmem:[%s7288_s22 + $0x68] sm:$0xff]  ;;  %v3619_v49 = vld [vmem:[%s7290_s7 + $0x18] sm:$0xff] }
 0x134   : > { %6035 = vmatmul.mubr.msk.f32.gmra.mrb[4].mxu0 %vm693_vm2, %v7422_v2  ;;  %6401 = vmatpush3.bf16.msra.mxu1 %v6398_v16  ;;  %v6677_v42 = vpack.i.bf16 %v2139_v37, %v2138_v36  ;;  %v6418_v43 = vpack.c.bf16 %v2137_v41, %v2136_v40  ;;  %v6422_v45 = vpack.c.bf16 %v2139_v37, %v2138_v36 }
 0x135   : > { %1590 = vrot.lane.b32.xlu1 %v7432_v3, %s7150_s8  ;;  %1592 = vrot.lane.b32.xlu0 %v7434_v4, %s7150_s8  ;;  %v6672_v46 = vpack.i.bf16 %v2137_v41, %v2136_v40 }
 0x136   : > { %6037 = vmatprep.mubr.msk.f32.mxu0 %vm693_vm2, %v7432_v3  ;;  %6403 = vmatprep.subr.bf16.mxu1 %v6402_v21 }
 0x138   : > { %6038 = vmatmul.mubr.msk.f32.gmra.mrb[6].mxu0 %vm693_vm2, %v7434_v4  ;;  %6405 = vmatpush3.bf16.msra.mxu1 %v6402_v21 }
 0x139   : > { %1594 = vrot.lane.b32.xlu1 %v7445_v6, %s7150_s8  ;;  %1596 = vrot.lane.b32.xlu0 %v7447_v7, %s7150_s8 }
 0x13a   : > { %6040 = vmatprep.mubr.msk.f32.mxu0 %vm693_vm2, %v7445_v6  ;;  %6407 = vmatprep.subr.bf16.mxu1 %v6406_v26 }
 0x13c   : > { %6041 = vmatmul.mubr.msk.f32.gmra.mrb[8].mxu0 %vm693_vm2, %v7447_v7  ;;  %6409 = vmatpush3.bf16.msra.mxu1 %v6406_v26 }
 0x13d   : > { %1598 = vrot.lane.b32.xlu1 %v7464_v14, %s7150_s8  ;;  %1600 = vrot.lane.b32.xlu0 %v7466_v15, %s7150_s8 }
 0x13e   : > { %6043 = vmatprep.mubr.msk.f32.mxu0 %vm693_vm2, %v7464_v14  ;;  %6411 = vmatprep.subr.bf16.mxu1 %v6410_v33 }
 0x140   : > { %6044 = vmatmul.mubr.msk.f32.gmra.mrb[10].mxu0 %vm693_vm2, %v7466_v15  ;;  %6413 = vmatpush3.bf16.msra.mxu1 %v6410_v33 }
 0x141   : > { %1602 = vrot.lane.b32.xlu1 %v7479_v19, %s7150_s8  ;;  %1604 = vrot.lane.b32.xlu0 %v7481_v20, %s7150_s8 }
 0x142   : > { %6046 = vmatprep.mubr.msk.f32.mxu0 %vm693_vm2, %v7479_v19  ;;  %6415 = vmatprep.subr.bf16.mxu1 %v6414_v38 }
 0x144   : > { %6047 = vmatmul.mubr.msk.f32.gmra.mrb[12].mxu0 %vm693_vm2, %v7481_v20  ;;  %6417 = vmatpush3.bf16.msra.mxu1 %v6414_v38 }
 0x145   : > { %1606 = vrot.lane.b32.xlu1 %v7493_v24, %s7150_s8  ;;  %1608 = vrot.lane.b32.xlu0 %v7495_v25, %s7150_s8 }
 0x146   : > { %6049 = vmatprep.mubr.msk.f32.mxu0 %vm693_vm2, %v7493_v24  ;;  %6419 = vmatprep.subr.bf16.mxu1 %v6418_v43 }
 0x148   : > { %6050 = vmatmul.mubr.msk.f32.gmra.mrb[14].mxu0 %vm693_vm2, %v7495_v25  ;;  %6421 = vmatpush3.bf16.msra.mxu1 %v6418_v43 }
 0x149   : > { %6643 = vrot.lane.b32.xlu1 %v6642_v27, %s7150_s8  ;;  %6648 = vrot.lane.b32.xlu0 %v6647_v28, %s7150_s8 }
 0x14a   : > { %6423 = vmatprep.subr.bf16.mxu1 %v6422_v45 }
 0x14c   : > { %6425 = vmatpush3.bf16.msra.mxu1 %v6422_v45 }
 0x14d   : > { %6653 = vrot.lane.b32.xlu1 %v6652_v34, %s7150_s8  ;;  %6668 = vrot.lane.b32.xlu0 %v6667_v35, %s7150_s8 }
 0x151   : > { %6658 = vrot.lane.b32.xlu1 %v6657_v39, %s7150_s8  ;;  %6678 = vrot.lane.b32.xlu0 %v6677_v42, %s7150_s8 }
 0x155   : > { %6663 = vrot.lane.b32.xlu1 %v6662_v44, %s7150_s8  ;;  %2609 = vrot.lane.b32.xlu0 %v7403_v61, %s7151_s16 }
 0x159   : > { %6673 = vrot.lane.b32.xlu1 %v6672_v46, %s7150_s8  ;;  %2613 = vrot.lane.b32.xlu0 %v7411_v63, %s7151_s16 }
 0x15d   : > { %2607 = vrot.lane.b32.xlu1 %v7401_v60, %s7151_s16  ;;  %2617 = vrot.lane.b32.xlu0 %v7422_v2, %s7151_s16 }
 0x161   : > { %2611 = vrot.lane.b32.xlu1 %v7409_v62, %s7151_s16  ;;  %2621 = vrot.lane.b32.xlu0 %v7434_v4, %s7151_s16 }
 0x165   : > { %2615 = vrot.lane.b32.xlu1 %v7420_v1, %s7151_s16  ;;  %2625 = vrot.lane.b32.xlu0 %v7447_v7, %s7151_s16 }
 0x169   : > { %2619 = vrot.lane.b32.xlu1 %v7432_v3, %s7151_s16  ;;  %2629 = vrot.lane.b32.xlu0 %v7466_v15, %s7151_s16 }
 0x16d   : > { %2623 = vrot.lane.b32.xlu1 %v7445_v6, %s7151_s16  ;;  %2633 = vrot.lane.b32.xlu0 %v7481_v20, %s7151_s16 }
 0x171   : > { %2627 = vrot.lane.b32.xlu1 %v7464_v14, %s7151_s16  ;;  %2637 = vrot.lane.b32.xlu0 %v7495_v25, %s7151_s16 }
 0x175   : > { %2631 = vrot.lane.b32.xlu1 %v7479_v19, %s7151_s16  ;;  %3638 = vrot.lane.b32.xlu0 %v7403_v61, %s7152_s17 }
 0x179   : > { %2635 = vrot.lane.b32.xlu1 %v7493_v24, %s7151_s16  ;;  %3642 = vrot.lane.b32.xlu0 %v7411_v63, %s7152_s17 }
 0x17d   : > { %3636 = vrot.lane.b32.xlu1 %v7401_v60, %s7152_s17  ;;  %3646 = vrot.lane.b32.xlu0 %v7422_v2, %s7152_s17 }
 0x181   : > { %3640 = vrot.lane.b32.xlu1 %v7409_v62, %s7152_s17  ;;  %3650 = vrot.lane.b32.xlu0 %v7434_v4, %s7152_s17 }
 0x185   : > { %3644 = vrot.lane.b32.xlu1 %v7420_v1, %s7152_s17  ;;  %3654 = vrot.lane.b32.xlu0 %v7447_v7, %s7152_s17 }
 0x189   : > { %3648 = vrot.lane.b32.xlu1 %v7432_v3, %s7152_s17  ;;  %3658 = vrot.lane.b32.xlu0 %v7466_v15, %s7152_s17 }
 0x18d   : > { %3652 = vrot.lane.b32.xlu1 %v7445_v6, %s7152_s17  ;;  %3662 = vrot.lane.b32.xlu0 %v7481_v20, %s7152_s17 }
 0x191   : > { %3656 = vrot.lane.b32.xlu1 %v7464_v14, %s7152_s17  ;;  %3666 = vrot.lane.b32.xlu0 %v7495_v25, %s7152_s17 }
 0x195   : > { %3660 = vrot.lane.b32.xlu1 %v7479_v19, %s7152_s17 }
 0x199   : > { %3664 = vrot.lane.b32.xlu1 %v7493_v24, %s7152_s17 }
 0x19b   : > { %v1579_v47 = vpop.permute.xlu1 %1578  ;;  %v1581_v48 = vpop.permute.xlu0 %1580 }
 0x19c   : > { %6110 = vmatprep.mubr.msk.f32.mxu0 %vm693_vm2, %v1579_v47 }
 0x19d   : > { %6111 = vmatmul.mubr.msk.f32.vlgmr.msra.gmra.mrb[16].mxu0 %vm693_vm2, %v1581_v48 }
 0x19e   : > { %6191 = vmatpush3.msra.mxu0 %v7462_v13 }
 0x19f   : > { %v1583_v50 = vpop.permute.xlu1 %1582  ;;  %v1585_v51 = vpop.permute.xlu0 %1584  ;;  %6272 = vmatprep.subr.mxu0 %v3619_v49 }
 0x1a0   : > { %6113 = vmatprep.mubr.msk.f32.mxu0 %vm693_vm2, %v1583_v50 }
 0x1a1   : > { %6114 = vmatmul.mubr.msk.f32.gmra.mrb[18].mxu0 %vm693_vm2, %v1585_v51 }
 0x1a3   : > { %v1587_v52 = vpop.permute.xlu1 %1586  ;;  %v1589_v53 = vpop.permute.xlu0 %1588 }
 0x1a4   : > { %6116 = vmatprep.mubr.msk.f32.mxu0 %vm693_vm2, %v1587_v52 }
 0x1a5   : > { %6117 = vmatmul.mubr.msk.f32.gmra.mrb[20].mxu0 %vm693_vm2, %v1589_v53 }
 0x1a7   : > { %v1591_v54 = vpop.permute.xlu1 %1590  ;;  %v1593_v55 = vpop.permute.xlu0 %1592 }
 0x1a8   : > { %6119 = vmatprep.mubr.msk.f32.mxu0 %vm693_vm2, %v1591_v54 }
 0x1a9   : > { %6120 = vmatmul.mubr.msk.f32.gmra.mrb[22].mxu0 %vm693_vm2, %v1593_v55 }
 0x1ab   : > { %v1595_v56 = vpop.permute.xlu1 %1594  ;;  %v1597_v57 = vpop.permute.xlu0 %1596 }
 0x1ac   : > { %6122 = vmatprep.mubr.msk.f32.mxu0 %vm693_vm2, %v1595_v56 }
 0x1ad   : > { %6123 = vmatmul.mubr.msk.f32.gmra.mrb[24].mxu0 %vm693_vm2, %v1597_v57  ;;  %v7153_v57 = vmov 0  }
 0x1ae   : > { %6682 = vset.pattern.permute.xlu1 %v7153_v57  ;;  %6683 = vset.pattern.permute.xlu0 %v7153_v57 }
 0x1af   : > { %v1599_v58 = vpop.permute.xlu1 %1598  ;;  %v1601_v59 = vpop.permute.xlu0 %1600 }
 0x1b0   : > { %6125 = vmatprep.mubr.msk.f32.mxu0 %vm693_vm2, %v1599_v58 }
 0x1b1   : > { %6126 = vmatmul.mubr.msk.f32.gmra.mrb[26].mxu0 %vm693_vm2, %v1601_v59 }
 0x1b3   : > { %v1603_v60 = vpop.permute.xlu1 %1602  ;;  %v1605_v61 = vpop.permute.xlu0 %1604 }
 0x1b4   : > { %6128 = vmatprep.mubr.msk.f32.mxu0 %vm693_vm2, %v1603_v60 }
 0x1b5   : > { %6129 = vmatmul.mubr.msk.f32.gmra.mrb[28].mxu0 %vm693_vm2, %v1605_v61 }
 0x1b7   : > { %v1607_v62 = vpop.permute.xlu1 %1606  ;;  %v1609_v63 = vpop.permute.xlu0 %1608 }
 0x1b8   : > { %6131 = vmatprep.mubr.msk.f32.mxu0 %vm693_vm2, %v1607_v62 }
 0x1b9   : > { %6132 = vmatmul.mubr.msk.f32.gmra.mrb[30].mxu0 %vm693_vm2, %v1609_v63 }
 0x1bb   : > { %v6644_v0 = vpop.permute.xlu1 %6643  ;;  %v7609_v1 = vpop.permute.xlu0 %6648 }
 0x1bc   : > { %v6646_v2 = vunpack.i.h.bf16 %v6644_v0  ;;  %v6645_v3 = vunpack.i.l.bf16 %v6644_v0 }
 0x1be   : > { %v7611_v4 = vpack.c.bf16 %v6646_v2, %v6645_v3 }
 0x1bf   : > { %v7613_v5 = vpop.permute.xlu1 %6653  ;;  %v7615_v6 = vpop.permute.xlu0 %6668 }
 0x1c0   : > { %6427 = vmatprep.subr.bf16.mxu1 %v7611_v4 }
 0x1c3   : > { %v7618_v7 = vpop.permute.xlu1 %6658  ;;  %v7620_v8 = vpop.permute.xlu0 %6678 }
 0x1c7   : > { %v7622_v9 = vpop.permute.xlu1 %6663  ;;  %v2610_v10 = vpop.permute.xlu0 %2609 }
 0x1cb   : > { %v7624_v11 = vpop.permute.xlu1 %6673  ;;  %v2614_v12 = vpop.permute.xlu0 %2613 }
 0x1cf   : > { %v2608_v13 = vpop.permute.xlu1 %2607  ;;  %v2618_v14 = vpop.permute.xlu0 %2617 }
 0x1d0   : > { %6192 = vmatprep.mubr.msk.f32.mxu0 %vm693_vm2, %v2608_v13 }
 0x1d1   : > { %6193 = vmatmul.mubr.msk.f32.vlgmr.msra.gmra.mrb[32].mxu0 %vm693_vm2, %v2610_v10 }
 0x1d2   : > { %6273 = vmatpush3.msra.mxu0 %v3619_v49 }
 0x1d3   : > { %v2612_v15 = vpop.permute.xlu1 %2611  ;;  %v2622_v16 = vpop.permute.xlu0 %2621 }
 0x1d4   : > { %6195 = vmatprep.mubr.msk.f32.mxu0 %vm693_vm2, %v2612_v15 }
 0x1d5   : > { %6196 = vmatmul.mubr.msk.f32.gmra.mrb[34].mxu0 %vm693_vm2, %v2614_v12 }
 0x1d7   : > { %v2616_v17 = vpop.permute.xlu1 %2615  ;;  %v2626_v18 = vpop.permute.xlu0 %2625 }
 0x1d8   : > { %6198 = vmatprep.mubr.msk.f32.mxu0 %vm693_vm2, %v2616_v17 }
 0x1d9   : > { %6199 = vmatmul.mubr.msk.f32.gmra.mrb[36].mxu0 %vm693_vm2, %v2618_v14 }
 0x1db   : > { %v2620_v19 = vpop.permute.xlu1 %2619  ;;  %v2630_v20 = vpop.permute.xlu0 %2629 }
 0x1dc   : > { %6201 = vmatprep.mubr.msk.f32.mxu0 %vm693_vm2, %v2620_v19 }
 0x1dd   : > { %6202 = vmatmul.mubr.msk.f32.gmra.mrb[38].mxu0 %vm693_vm2, %v2622_v16 }
 0x1df   : > { %v2624_v21 = vpop.permute.xlu1 %2623  ;;  %v2634_v22 = vpop.permute.xlu0 %2633 }
 0x1e0   : > { %6204 = vmatprep.mubr.msk.f32.mxu0 %vm693_vm2, %v2624_v21 }
 0x1e1   : > { %6205 = vmatmul.mubr.msk.f32.gmra.mrb[40].mxu0 %vm693_vm2, %v2626_v18 }
 0x1e3   : > { %v2628_v23 = vpop.permute.xlu1 %2627  ;;  %v2638_v24 = vpop.permute.xlu0 %2637 }
 0x1e4   : > { %6207 = vmatprep.mubr.msk.f32.mxu0 %vm693_vm2, %v2628_v23  ;;  %v7759_v23 = vld [vmem:[#allocation3] sm:$0xff] }
 0x1e5   : > { %6208 = vmatmul.mubr.msk.f32.gmra.mrb[42].mxu0 %vm693_vm2, %v2630_v20  ;;  %v7752_v20 = vld [vmem:[#allocation3 + $0x8] sm:$0xff] }
 0x1e7   : > { %v2632_v25 = vpop.permute.xlu1 %2631  ;;  %v3639_v26 = vpop.permute.xlu0 %3638 }
 0x1e8   : > { %6210 = vmatprep.mubr.msk.f32.mxu0 %vm693_vm2, %v2632_v25 }
 0x1e9   : > { %6211 = vmatmul.mubr.msk.f32.gmra.mrb[44].mxu0 %vm693_vm2, %v2634_v22 }
 0x1eb   : > { %v2636_v27 = vpop.permute.xlu1 %2635  ;;  %v3643_v28 = vpop.permute.xlu0 %3642 }
 0x1ec   : > { %6213 = vmatprep.mubr.msk.f32.mxu0 %vm693_vm2, %v2636_v27 }
 0x1ed   : > { %6214 = vmatmul.mubr.msk.f32.gmra.mrb[46].mxu0 %vm693_vm2, %v2638_v24  ;;  %v7761_v24 = vld [vmem:[#allocation3 + $0x18] sm:$0xff] }
 0x1ef   : > { %v3637_v29 = vpop.permute.xlu1 %3636  ;;  %v3647_v30 = vpop.permute.xlu0 %3646 }
 0x1f0   : > { %6274 = vmatprep.mubr.msk.f32.mxu0 %vm693_vm2, %v3637_v29 }
 0x1f1   : > { %6275 = vmatmul.mubr.msk.f32.vlgmr.msra.gmra.mrb[48].mxu0 %vm693_vm2, %v3639_v26 }
 0x1f3   : > { %v3641_v31 = vpop.permute.xlu1 %3640  ;;  %v3651_v32 = vpop.permute.xlu0 %3650 }
 0x1f4   : > { %6277 = vmatprep.mubr.msk.f32.mxu0 %vm693_vm2, %v3641_v31 }
 0x1f5   : > { %6278 = vmatmul.mubr.msk.f32.gmra.mrb[50].mxu0 %vm693_vm2, %v3643_v28 }
 0x1f7   : > { %v3645_v33 = vpop.permute.xlu1 %3644  ;;  %v3655_v34 = vpop.permute.xlu0 %3654 }
 0x1f8   : > { %6280 = vmatprep.mubr.msk.f32.mxu0 %vm693_vm2, %v3645_v33  ;;  %v7783_v33 = vld [vmem:[#allocation3 + $0x20] sm:$0xff] }
 0x1f9   : > { %6281 = vmatmul.mubr.msk.f32.gmra.mrb[52].mxu0 %vm693_vm2, %v3647_v30  ;;  %v7773_v30 = vld [vmem:[#allocation3 + $0x10] sm:$0xff] }
 0x1fb   : > { %v3649_v35 = vpop.permute.xlu1 %3648  ;;  %v3659_v36 = vpop.permute.xlu0 %3658 }
 0x1fc   : > { %6283 = vmatprep.mubr.msk.f32.mxu0 %vm693_vm2, %v3649_v35 }
 0x1fd   : > { %6284 = vmatmul.mubr.msk.f32.gmra.mrb[54].mxu0 %vm693_vm2, %v3651_v32 }
 0x1ff   : > { %v3653_v37 = vpop.permute.xlu1 %3652  ;;  %v7651_v38 = vpop.f32.mrb[0].mxu0 }
 0x200   : > { %6286 = vmatprep.mubr.msk.f32.mxu0 %vm693_vm2, %v3653_v37  ;;  %905 = vmax.xlane.f32.xlu0 %v7651_v38  ;;  %v7655_v39 = vpop.f32.mrb[1].mxu0  ;;  %v3663_v41 = vpop.permute.xlu0 %3662  ;;  %v7788_v37 = vld [vmem:[#allocation3 + $0x28] sm:$0xff] }
 0x201   : > { %6287 = vmatmul.mubr.msk.f32.gmra.mrb[56].mxu0 %vm693_vm2, %v3655_v34 }
 0x203   : > { %v3657_v40 = vpop.permute.xlu1 %3656  ;;  %v7658_v42 = vpop.f32.mrb[2].mxu0 }
 0x204   : > { %6289 = vmatprep.mubr.msk.f32.mxu0 %vm693_vm2, %v3657_v40  ;;  %903 = vmax.xlane.f32.xlu0 %v7655_v39  ;;  %v7663_v43 = vpop.f32.mrb[3].mxu0  ;;  %v3667_v47 = vpop.permute.xlu0 %3666 }
 0x205   : > { %6290 = vmatmul.mubr.msk.f32.gmra.mrb[58].mxu0 %vm693_vm2, %v3659_v36  ;;  %909 = vmax.xlane.f32.xlu1 %v7658_v42 }
 0x207   : > { %v3661_v44 = vpop.permute.xlu1 %3660  ;;  %v7666_v45 = vpop.f32.mrb[4].mxu0 }
 0x208   : > { %6292 = vmatprep.mubr.msk.f32.mxu0 %vm693_vm2, %v3661_v44  ;;  %v7670_v46 = vpop.f32.mrb[5].mxu0  ;;  %v7797_v44 = vld [vmem:[#allocation3 + $0x30] sm:$0xff] }
 0x209   : > { %6293 = vmatmul.mubr.msk.f32.gmra.mrb[60].mxu0 %vm693_vm2, %v3663_v41  ;;  %907 = vmax.xlane.f32.xlu1 %v7663_v43 }
 0x20a   : > { %911 = vmax.xlane.f32.xlu0 %v7670_v46 }
 0x20b   : > { %v3665_v48 = vpop.permute.xlu1 %3664  ;;  %v7674_v49 = vpop.f32.mrb[6].mxu0 }
 0x20c   : > { %6295 = vmatprep.mubr.msk.f32.mxu0 %vm693_vm2, %v3665_v48  ;;  %v7678_v50 = vpop.f32.mrb[7].mxu0 }
 0x20d   : > { %6296 = vmatmul.mubr.msk.f32.gmra.mrb[62].mxu0 %vm693_vm2, %v3667_v47  ;;  %913 = vmax.xlane.f32.xlu1 %v7666_v45 }
 0x20e   : > { %915 = vmax.xlane.f32.xlu0 %v7678_v50 }
 0x20f   : > { %v7681_v51 = vpop.f32.mrb[8].mxu0 }
 0x210   : > { %9998 = vst [vmem:[#allocation8_spill] sm:$0xff] %v7681_v51  ;;  %v7684_v52 = vpop.f32.mrb[9].mxu0 }
 0x211   : > { %917 = vmax.xlane.f32.xlu1 %v7674_v49  ;;  %9999 = vst [vmem:[#allocation9_spill] sm:$0xff] %v7684_v52 }
 0x212   : > { %919 = vmax.xlane.f32.xlu0 %v7684_v52 }
 0x213   : > { %v7687_v53 = vpop.f32.mrb[10].mxu0 }
 0x214   : > { %10000 = vst [vmem:[#allocation10_spill] sm:$0xff] %v7687_v53  ;;  %v7690_v54 = vpop.f32.mrb[11].mxu0 }
 0x215   : > { %921 = vmax.xlane.f32.xlu1 %v7681_v51  ;;  %10001 = vst [vmem:[#allocation11_spill] sm:$0xff] %v7690_v54 }
 0x216   : > { %923 = vmax.xlane.f32.xlu0 %v7690_v54 }
 0x217   : > { %v7693_v55 = vpop.f32.mrb[12].mxu0 }
 0x218   : > { %10002 = vst [vmem:[#allocation12_spill] sm:$0xff] %v7693_v55  ;;  %v7696_v56 = vpop.f32.mrb[13].mxu0 }
 0x219   : > { %925 = vmax.xlane.f32.xlu1 %v7687_v53  ;;  %10003 = vst [vmem:[#allocation13_spill] sm:$0xff] %v7696_v56 }
 0x21a   : > { %927 = vmax.xlane.f32.xlu0 %v7696_v56 }
 0x21b   : > { %v7699_v58 = vpop.f32.mrb[14].mxu0 }
 0x21c   : > { %10004 = vst [vmem:[#allocation14_spill] sm:$0xff] %v7699_v58  ;;  %v7702_v59 = vpop.f32.mrb[15].mxu0 }
 0x21d   : > { %929 = vmax.xlane.f32.xlu1 %v7693_v55  ;;  %10005 = vst [vmem:[#allocation15_spill] sm:$0xff] %v7702_v59 }
 0x21e   : > { %931 = vmax.xlane.f32.xlu0 %v7702_v59 }
 0x221   : > { %933 = vmax.xlane.f32.xlu1 %v7699_v58 }
 0x270   : > { %v7706_v60 = vpop.f32.mrb[16].mxu0 }
 0x271   : > { %10006 = vst [vmem:[#allocation16_spill] sm:$0xff] %v7706_v60  ;;  %1805 = vmax.xlane.f32.xlu0 %v7706_v60  ;;  %v7709_v61 = vpop.f32.mrb[17].mxu0  ;;  %v7876_v60 = vld [vmem:[#allocation3 + $0x78] sm:$0xff] }
 0x272   : > { %10007 = vst [vmem:[#allocation17_spill] sm:$0xff] %v7709_v61  ;;  %1803 = vmax.xlane.f32.xlu1 %v7709_v61 }
 0x274   : > { %v7712_v62 = vpop.f32.mrb[18].mxu0 }
 0x275   : > { %10008 = vst [vmem:[#allocation18_spill] sm:$0xff] %v7712_v62  ;;  %v7714_v63 = vpop.f32.mrb[19].mxu0 }
 0x276   : > { %10009 = vst [vmem:[#allocation19_spill] sm:$0xff] %v7714_v63  ;;  %1809 = vmax.xlane.f32.xlu1 %v7712_v62  ;;  %1807 = vmax.xlane.f32.xlu0 %v7714_v63 }
 0x278   : > { %v7718_v0 = vpop.f32.mrb[20].mxu0 }
 0x279   : > { %10010 = vst [vmem:[#allocation20_spill] sm:$0xff] %v7718_v0  ;;  %v7720_v2 = vpop.f32.mrb[21].mxu0 }
 0x27a   : > { %10011 = vst [vmem:[#allocation21_spill] sm:$0xff] %v7720_v2  ;;  %1813 = vmax.xlane.f32.xlu1 %v7718_v0  ;;  %1811 = vmax.xlane.f32.xlu0 %v7720_v2 }
 0x27c   : > { %v7724_v3 = vpop.f32.mrb[22].mxu0 }
 0x27d   : > { %10012 = vst [vmem:[#allocation22_spill] sm:$0xff] %v7724_v3  ;;  %v7726_v10 = vpop.f32.mrb[23].mxu0 }
 0x27e   : > { %10013 = vst [vmem:[#allocation23_spill] sm:$0xff] %v7726_v10  ;;  %1817 = vmax.xlane.f32.xlu1 %v7724_v3  ;;  %1815 = vmax.xlane.f32.xlu0 %v7726_v10  ;;  %v7858_v10 = vld [vmem:[#allocation3 + $0x68] sm:$0xff]  ;;  %v7865_v3 = vld [vmem:[#allocation3 + $0x70] sm:$0xff] }
 0x27f   : > { %10030 = vst [vmem:[#allocation40_spill] sm:$0xff] %v7865_v3 }
 0x280   : > { %v7730_v12 = vpop.f32.mrb[24].mxu0 }
 0x281   : > { %10014 = vst [vmem:[#allocation24_spill] sm:$0xff] %v7730_v12  ;;  %v7732_v13 = vpop.f32.mrb[25].mxu0 }
 0x282   : > { %10015 = vst [vmem:[#allocation25_spill] sm:$0xff] %v7732_v13  ;;  %1821 = vmax.xlane.f32.xlu1 %v7730_v12  ;;  %1819 = vmax.xlane.f32.xlu0 %v7732_v13 }
 0x284   : > { %v7736_v14 = vpop.f32.mrb[26].mxu0 }
 0x285   : > { %10016 = vst [vmem:[#allocation26_spill] sm:$0xff] %v7736_v14  ;;  %v7738_v15 = vpop.f32.mrb[27].mxu0 }
 0x286   : > { %10017 = vst [vmem:[#allocation27_spill] sm:$0xff] %v7738_v15  ;;  %1825 = vmax.xlane.f32.xlu1 %v7736_v14  ;;  %1823 = vmax.xlane.f32.xlu0 %v7738_v15 }
 0x288   : > { %v7742_v16 = vpop.f32.mrb[28].mxu0 }
 0x289   : > { %10018 = vst [vmem:[#allocation28_spill] sm:$0xff] %v7742_v16  ;;  %v7744_v17 = vpop.f32.mrb[29].mxu0 }
 0x28a   : > { %10019 = vst [vmem:[#allocation29_spill] sm:$0xff] %v7744_v17  ;;  %1829 = vmax.xlane.f32.xlu1 %v7742_v16  ;;  %1827 = vmax.xlane.f32.xlu0 %v7744_v17  ;;  %v7847_v16 = vld [vmem:[#allocation3 + $0x60] sm:$0xff] }
 0x28b   : > { %10026 = vst [vmem:[#allocation36_spill] sm:$0xff] %v7847_v16 }
 0x28c   : > { %v7748_v18 = vpop.f32.mrb[30].mxu0 }
 0x28d   : > { %10020 = vst [vmem:[#allocation30_spill] sm:$0xff] %v7748_v18  ;;  %v7750_v19 = vpop.f32.mrb[31].mxu0  ;;  %v906_v21 = vpop.xlane.xlu0 %905 }
 0x28e   : > { %10021 = vst [vmem:[#allocation31_spill] sm:$0xff] %v7750_v19  ;;  %1833 = vmax.xlane.f32.xlu1 %v7748_v18  ;;  %1831 = vmax.xlane.f32.xlu0 %v7750_v19  ;;  %v7757_v22 = vmax.f32 %v7752_v20, %v906_v21  ;;  %v7804_v21 = vld [vmem:[#allocation3 + $0x38] sm:$0xff] }
 0x290   : > { %1530 = vst.msk [vmem:[#allocation3 + $0x8] sm:$0xff] %vm1207_vm3, %v7757_v22 }
 0x291   : > { %v904_v26 = vpop.xlane.xlu0 %903 }
 0x292   : > { %v910_v27 = vpop.xlane.xlu1 %909  ;;  %v7768_v28 = vmax.f32 %v7759_v23, %v904_v26 }
 0x293   : > { %v7771_v29 = vmax.f32 %v7761_v24, %v910_v27  ;;  %v7828_v27 = vld [vmem:[#allocation3 + $0x50] sm:$0xff] }
 0x294   : > { %1529 = vst.msk [vmem:[#allocation3] sm:$0xff] %vm1207_vm3, %v7768_v28  ;;  %10023 = vst [vmem:[#allocation33_spill] sm:$0xff] %v7828_v27 }
 0x295   : > { %1532 = vst.msk [vmem:[#allocation3 + $0x18] sm:$0xff] %vm1207_vm3, %v7771_v29 }
 0x296   : > { %v908_v34 = vpop.xlane.xlu1 %907 }
 0x297   : > { %v7786_v35 = vmax.f32 %v7773_v30, %v908_v34  ;;  %v912_v36 = vpop.xlane.xlu0 %911  ;;  %v7813_v34 = vld [vmem:[#allocation3 + $0x40] sm:$0xff] }
 0x298   : > { %v7791_v40 = vmax.f32 %v7783_v33, %v912_v36  ;;  %10022 = vst [vmem:[#allocation32_spill] sm:$0xff] %v7813_v34 }
 0x299   : > { %1531 = vst.msk [vmem:[#allocation3 + $0x10] sm:$0xff] %vm1207_vm3, %v7786_v35 }
 0x29a   : > { %v914_v47 = vpop.xlane.xlu1 %913  ;;  %1533 = vst.msk [vmem:[#allocation3 + $0x20] sm:$0xff] %vm1207_vm3, %v7791_v40 }
 0x29b   : > { %v7802_v48 = vmax.f32 %v7788_v37, %v914_v47  ;;  %v916_v57 = vpop.xlane.xlu0 %915 }
 0x29c   : > { %v7807_v26 = vmax.f32 %v7797_v44, %v916_v57  ;;  %v7821_v57 = vld [vmem:[#allocation3 + $0x48] sm:$0xff] }
 0x29d   : > { %1534 = vst.msk [vmem:[#allocation3 + $0x28] sm:$0xff] %vm1207_vm3, %v7802_v48 }
 0x29e   : > { %v918_v36 = vpop.xlane.xlu1 %917  ;;  %1535 = vst.msk [vmem:[#allocation3 + $0x30] sm:$0xff] %vm1207_vm3, %v7807_v26 }
 0x29f   : > { %1006 = vperm.xlu1 %6682, %v7757_v22   ;;  %v7819_v47 = vmax.f32 %v7804_v21, %v918_v36  ;;  %v920_v41 = vpop.xlane.xlu0 %919 }
 0x2a0   : > { %v7824_v32 = vmax.f32 %v7813_v34, %v920_v41  ;;  %v7840_v41 = vld [vmem:[#allocation3 + $0x58] sm:$0xff] }
 0x2a1   : > { %1536 = vst.msk [vmem:[#allocation3 + $0x38] sm:$0xff] %vm1207_vm3, %v7819_v47 }
 0x2a2   : > { %v922_v25 = vpop.xlane.xlu1 %921  ;;  %1537 = vst.msk [vmem:[#allocation3 + $0x40] sm:$0xff] %vm1207_vm3, %v7824_v32 }
 0x2a3   : > { %v7836_v36 = vmax.f32 %v7821_v57, %v922_v25  ;;  %v924_v19 = vpop.xlane.xlu0 %923 }
 0x2a4   : > { %1001 = vperm.xlu0 %6683, %v7768_v28   ;;  %v7833_v31 = vpop.f32.mrb[32].mxu0  ;;  %v7843_v17 = vmax.f32 %v7828_v27, %v924_v19 }
 0x2a5   : > { %10024 = vst [vmem:[#allocation34_spill] sm:$0xff] %v7833_v31  ;;  %v7838_v18 = vpop.f32.mrb[33].mxu0  ;;  %1538 = vst.msk [vmem:[#allocation3 + $0x48] sm:$0xff] %vm1207_vm3, %v7836_v36 }
 0x2a6   : > { %10025 = vst [vmem:[#allocation35_spill] sm:$0xff] %v7838_v18  ;;  %v926_v15 = vpop.xlane.xlu1 %925  ;;  %1539 = vst.msk [vmem:[#allocation3 + $0x50] sm:$0xff] %vm1207_vm3, %v7843_v17 }
 0x2a7   : > { %v7854_v25 = vmax.f32 %v7840_v41, %v926_v15  ;;  %v928_v13 = vpop.xlane.xlu0 %927 }
 0x2a8   : > { %v7851_v14 = vpop.f32.mrb[34].mxu0  ;;  %v7861_v19 = vmax.f32 %v7847_v16, %v928_v13 }
 0x2a9   : > { %10027 = vst [vmem:[#allocation37_spill] sm:$0xff] %v7851_v14  ;;  %v7856_v12 = vpop.f32.mrb[35].mxu0  ;;  %1540 = vst.msk [vmem:[#allocation3 + $0x58] sm:$0xff] %vm1207_vm3, %v7854_v25 }
 0x2aa   : > { %10028 = vst [vmem:[#allocation38_spill] sm:$0xff] %v7856_v12  ;;  %10029 = vst [vmem:[#allocation39_spill] sm:$0xff] %v7861_v19  ;;  %v930_v2 = vpop.xlane.xlu1 %929 }
 0x2ab   : > { %1541 = vst.msk [vmem:[#allocation3 + $0x60] sm:$0xff] %vm1207_vm3, %v7861_v19  ;;  %v7872_v15 = vmax.f32 %v7858_v10, %v930_v2  ;;  %v932_v63 = vpop.xlane.xlu0 %931 }
 0x2ac   : > { %v7869_v0 = vpop.f32.mrb[36].mxu0  ;;  %v7879_v13 = vmax.f32 %v7865_v3, %v932_v63 }
 0x2ad   : > { %10031 = vst [vmem:[#allocation41_spill] sm:$0xff] %v7869_v0  ;;  %v7874_v62 = vpop.f32.mrb[37].mxu0  ;;  %1542 = vst.msk [vmem:[#allocation3 + $0x68] sm:$0xff] %vm1207_vm3, %v7872_v15 }
 0x2ae   : > { %10032 = vst [vmem:[#allocation42_spill] sm:$0xff] %v7874_v62  ;;  %10033 = vst [vmem:[#allocation43_spill] sm:$0xff] %v7879_v13  ;;  %v934_v59 = vpop.xlane.xlu1 %933 }
 0x2af   : > { %1543 = vst.msk [vmem:[#allocation3 + $0x70] sm:$0xff] %vm1207_vm3, %v7879_v13  ;;  %v7888_v2 = vmax.f32 %v7876_v60, %v934_v59 }
 0x2b0   : > { %v7885_v61 = vpop.f32.mrb[38].mxu0 }
 0x2b1   : > { %10034 = vst [vmem:[#allocation44_spill] sm:$0xff] %v7885_v61  ;;  %v7890_v58 = vpop.f32.mrb[39].mxu0  ;;  %1544 = vst.msk [vmem:[#allocation3 + $0x78] sm:$0xff] %vm1207_vm3, %v7888_v2 }
 0x2b2   : > { %10035 = vst [vmem:[#allocation45_spill] sm:$0xff] %v7890_v58 }
 0x2b4   : > { %v7894_v56 = vpop.f32.mrb[40].mxu0 }
 0x2b5   : > { %10036 = vst [vmem:[#allocation46_spill] sm:$0xff] %v7894_v56  ;;  %v7896_v63 = vpop.f32.mrb[41].mxu0 }
 0x2b6   : > { %10037 = vst [vmem:[#allocation47_spill] sm:$0xff] %v7896_v63 }
 0x2b8   : > { %v7898_v55 = vpop.f32.mrb[42].mxu0 }
 0x2b9   : > { %10038 = vst [vmem:[#allocation48_spill] sm:$0xff] %v7898_v55  ;;  %v7900_v54 = vpop.f32.mrb[43].mxu0 }
 0x2ba   : > { %10039 = vst [vmem:[#allocation49_spill] sm:$0xff] %v7900_v54 }
 0x2bc   : > { %v7902_v53 = vpop.f32.mrb[44].mxu0 }
 0x2bd   : > { %10040 = vst [vmem:[#allocation50_spill] sm:$0xff] %v7902_v53  ;;  %v7904_v52 = vpop.f32.mrb[45].mxu0  ;;  %v8004_v53 = vld [vmem:[#allocation3 + $0x30] sm:$0xff] }
 0x2be   : > { %10041 = vst [vmem:[#allocation51_spill] sm:$0xff] %v7904_v52  ;;  %10067 = vst [vmem:[#allocation76_spill] sm:$0xff] %v8004_v53 }
 0x2c0   : > { %v7906_v51 = vpop.f32.mrb[46].mxu0 }
 0x2c1   : > { %10042 = vst [vmem:[#allocation52_spill] sm:$0xff] %v7906_v51  ;;  %v7908_v59 = vpop.f32.mrb[47].mxu0 }
 0x2c2   : > { %10043 = vst [vmem:[#allocation53_spill] sm:$0xff] %v7908_v59 }
 0x2c3   : > { %2834 = vmax.xlane.f32.xlu0 %v7833_v31  ;;  %2832 = vmax.xlane.f32.xlu1 %v7838_v18 }
 0x2c4   : > { %v7912_v3 = vpop.f32.mrb[48].mxu0 }
 0x2c5   : > { %10044 = vst [vmem:[#allocation54_spill] sm:$0xff] %v7912_v3  ;;  %v7914_v13 = vpop.f32.mrb[49].mxu0 }
 0x2c6   : > { %10045 = vst [vmem:[#allocation55_spill] sm:$0xff] %v7914_v13 }
 0x2c7   : > { %2838 = vmax.xlane.f32.xlu0 %v7851_v14 }
 0x2c8   : > { %v7917_v16 = vpop.f32.mrb[50].mxu0 }
 0x2c9   : > { %10046 = vst [vmem:[#allocation56_spill] sm:$0xff] %v7917_v16  ;;  %v7919_v19 = vpop.f32.mrb[51].mxu0 }
 0x2ca   : > { %10047 = vst [vmem:[#allocation57_spill] sm:$0xff] %v7919_v19 }
 0x2cb   : > { %2836 = vmax.xlane.f32.xlu0 %v7856_v12  ;;  %v7990_v12 = vld [vmem:[#allocation3 + $0x20] sm:$0xff] }
 0x2cc   : > { %v7922_v52 = vpop.f32.mrb[52].mxu0  ;;  %10065 = vst [vmem:[#allocation74_spill] sm:$0xff] %v7990_v12 }
 0x2cd   : > { %10048 = vst [vmem:[#allocation58_spill] sm:$0xff] %v7922_v52  ;;  %v7924_v51 = vpop.f32.mrb[53].mxu0 }
 0x2ce   : > { %10049 = vst [vmem:[#allocation59_spill] sm:$0xff] %v7924_v51 }
 0x2cf   : > { %2842 = vmax.xlane.f32.xlu0 %v7869_v0 }
 0x2d0   : > { %v7927_v31 = vpop.f32.mrb[54].mxu0 }
 0x2d1   : > { %10050 = vst [vmem:[#allocation60_spill] sm:$0xff] %v7927_v31  ;;  %v7929_v18 = vpop.f32.mrb[55].mxu0  ;;  %v10058_v31 = vsub.f32 %v7759_v23, %v7768_v28  ;;  %v7964_v28 = vld [vmem:[#allocation3] sm:$0xff] }
 0x2d2   : > { %10051 = vst [vmem:[#allocation61_spill] sm:$0xff] %v7929_v18  ;;  %10062 = vst [vmem:[#allocation71_spill] sm:$0xff] %v7964_v28 }
 0x2d3   : > { %2846 = vmax.xlane.f32.xlu0 %v7885_v61  ;;  %v967_v18 = vmul.f32 1.442695, %v10058_v31 }
 0x2d4   : > { %1016 = vperm.xlu1 %6682, %v7771_v29   ;;  %v7933_v3 = vpop.f32.mrb[56].mxu0 }
 0x2d5   : > { %10052 = vst [vmem:[#allocation62_spill] sm:$0xff] %v7933_v3  ;;  %v7935_v16 = vpop.f32.mrb[57].mxu0  ;;  %6774 = vpow2.f32 %v967_v18  ;;  %v7973_v18 = vld [vmem:[#allocation3 + $0x18] sm:$0xff] }
 0x2d6   : > { %10053 = vst [vmem:[#allocation63_spill] sm:$0xff] %v7935_v16 }
 0x2d8   : > { %1011 = vperm.xlu1 %6682, %v7786_v35   ;;  %v7938_v19 = vpop.f32.mrb[58].mxu0 }
 0x2d9   : > { %10054 = vst [vmem:[#allocation64_spill] sm:$0xff] %v7938_v19  ;;  %v7940_v52 = vpop.f32.mrb[59].mxu0 }
 0x2da   : > { %10055 = vst [vmem:[#allocation65_spill] sm:$0xff] %v7940_v52  ;;  %v7975_v52 = vld [vmem:[#allocation3 + $0x10] sm:$0xff] }
 0x2db   : > { %10063 = vst [vmem:[#allocation72_spill] sm:$0xff] %v7975_v52 }
 0x2dc   : > { %1026 = vperm.xlu1 %6682, %v7802_v48   ;;  %v7943_v51 = vpop.f32.mrb[60].mxu0 }
 0x2dd   : > { %10056 = vst [vmem:[#allocation66_spill] sm:$0xff] %v7943_v51  ;;  %v7945_v13 = vpop.f32.mrb[61].mxu0  ;;  %v7959_v51 = vld [vmem:[#allocation3 + $0x8] sm:$0xff] }
 0x2de   : > { %10057 = vst [vmem:[#allocation67_spill] sm:$0xff] %v7945_v13 }
 0x2df   : > { %v7956_v19 = vpop.eup %6774 }
 0x2e0   : > { %1021 = vperm.xlu1 %6682, %v7791_v40   ;;  %v7951_v3 = vpop.f32.mrb[62].mxu0  ;;  %10061 = vst [vmem:[#allocation70_spill] sm:$0xff] %v7956_v19 }
 0x2e1   : > { %10059 = vst [vmem:[#allocation68_spill] sm:$0xff] %v7951_v3  ;;  %v7953_v16 = vpop.f32.mrb[63].mxu0 }
 0x2e2   : > { %10060 = vst [vmem:[#allocation69_spill] sm:$0xff] %v7953_v16 }
 0x2e9   : > { %1046 = vperm.xlu0 %6683, %v7836_v36  }
 0x2ed   : > { %1403 = vperm.xlu0 %6683, %v7956_v19  }
 0x2fe   : > { %v1806_v13 = vpop.xlane.xlu0 %1805 }
 0x2ff   : > { %v7962_v23 = vmax.f32 %v7959_v51, %v1806_v13  ;;  %v1804_v31 = vpop.xlane.xlu1 %1803 }
 0x300   : > { %v7967_v3 = vmax.f32 %v7964_v28, %v1804_v31  ;;  %v7988_v31 = vld [vmem:[#allocation3 + $0x28] sm:$0xff] }
 0x301   : > { %2559 = vst.msk [vmem:[#allocation3 + $0x8] sm:$0xff] %vm2107_vm4, %v7962_v23 }
 0x302   : > { %2558 = vst.msk [vmem:[#allocation3] sm:$0xff] %vm2107_vm4, %v7967_v3 }
 0x303   : > { %v1810_v16 = vpop.xlane.xlu1 %1809  ;;  %v1808_v61 = vpop.xlane.xlu0 %1807 }
 0x304   : > { %v7978_v13 = vmax.f32 %v7973_v18, %v1810_v16  ;;  %v7981_v0 = vmax.f32 %v7975_v52, %v1808_v61  ;;  %2840 = vmax.xlane.f32.xlu1 %v7874_v62  ;;  %v8002_v62 = vld [vmem:[#allocation3 + $0x38] sm:$0xff] }
 0x306   : > { %10064 = vst [vmem:[#allocation73_spill] sm:$0xff] %v7981_v0  ;;  %2561 = vst.msk [vmem:[#allocation3 + $0x18] sm:$0xff] %vm2107_vm4, %v7978_v13 }
 0x307   : > { %2560 = vst.msk [vmem:[#allocation3 + $0x10] sm:$0xff] %vm2107_vm4, %v7981_v0  ;;  %v1814_v14 = vpop.xlane.xlu1 %1813  ;;  %v1812_v59 = vpop.xlane.xlu0 %1811 }
 0x308   : > { %v7993_v16 = vmax.f32 %v7988_v31, %v1814_v14  ;;  %v7996_v61 = vmax.f32 %v7990_v12, %v1812_v59  ;;  %v10069_v59 = vsub.f32 %v7752_v20, %v7757_v22  ;;  %v10073_v20 = vsub.f32 %v7761_v24, %v7771_v29  ;;  %v8052_v24 = vld [vmem:[#allocation3 + $0x68] sm:$0xff] }
 0x309   : > { %10077 = vst [vmem:[#allocation84_spill] sm:$0xff] %v8052_v24 }
 0x30a   : > { %10066 = vst [vmem:[#allocation75_spill] sm:$0xff] %v7996_v61  ;;  %2563 = vst.msk [vmem:[#allocation3 + $0x28] sm:$0xff] %vm2107_vm4, %v7993_v16  ;;  %v969_v12 = vmul.f32 1.442695, %v10069_v59  ;;  %v973_v22 = vmul.f32 1.442695, %v10073_v20 }
 0x30b   : > { %2562 = vst.msk [vmem:[#allocation3 + $0x20] sm:$0xff] %vm2107_vm4, %v7996_v61  ;;  %v1818_v19 = vpop.xlane.xlu1 %1817  ;;  %v1816_v52 = vpop.xlane.xlu0 %1815  ;;  %v8020_v61 = vld [vmem:[#allocation3 + $0x48] sm:$0xff]  ;;  %v8037_v59 = vld [vmem:[#allocation3 + $0x58] sm:$0xff]  ;;  %v8054_v20 = vld [vmem:[#allocation3 + $0x60] sm:$0xff] }
 0x30c   : > { %v8007_v28 = vmax.f32 %v8002_v62, %v1818_v19  ;;  %v8010_v14 = vmax.f32 %v8004_v53, %v1816_v52  ;;  %2850 = vmax.xlane.f32.xlu0 %v7894_v56  ;;  %10070 = vst [vmem:[#allocation78_spill] sm:$0xff] %v8020_v61  ;;  %v8022_v19 = vld [vmem:[#allocation3 + $0x40] sm:$0xff]  ;;  %6776 = vpow2.f32 %v969_v12  ;;  %10074 = vst [vmem:[#allocation81_spill] sm:$0xff] %v8037_v59 }
 0x30d   : > { %10071 = vst [vmem:[#allocation79_spill] sm:$0xff] %v8022_v19  ;;  %6778 = vpow2.f32 %v973_v22  ;;  %10078 = vst [vmem:[#allocation85_spill] sm:$0xff] %v8054_v20  ;;  %v8067_v22 = vld [vmem:[#allocation3 + $0x78] sm:$0xff] }
 0x30e   : > { %10068 = vst [vmem:[#allocation77_spill] sm:$0xff] %v8010_v14  ;;  %2565 = vst.msk [vmem:[#allocation3 + $0x38] sm:$0xff] %vm2107_vm4, %v8007_v28 }
 0x30f   : > { %2564 = vst.msk [vmem:[#allocation3 + $0x30] sm:$0xff] %vm2107_vm4, %v8010_v14  ;;  %v1822_v0 = vpop.xlane.xlu1 %1821  ;;  %v1820_v27 = vpop.xlane.xlu0 %1819  ;;  %v8039_v14 = vld [vmem:[#allocation3 + $0x50] sm:$0xff]  ;;  %10080 = vst [vmem:[#allocation87_spill] sm:$0xff] %v8067_v22 }
 0x310   : > { %v8025_v52 = vmax.f32 %v8020_v61, %v1822_v0  ;;  %v8028_v56 = vmax.f32 %v8022_v19, %v1820_v27  ;;  %10075 = vst [vmem:[#allocation82_spill] sm:$0xff] %v8039_v14 }
 0x312   : > { %10072 = vst [vmem:[#allocation80_spill] sm:$0xff] %v8028_v56  ;;  %2567 = vst.msk [vmem:[#allocation3 + $0x48] sm:$0xff] %vm2107_vm4, %v8025_v52 }
 0x313   : > { %2566 = vst.msk [vmem:[#allocation3 + $0x40] sm:$0xff] %vm2107_vm4, %v8028_v56  ;;  %v1826_v53 = vpop.xlane.xlu1 %1825  ;;  %v1824_v0 = vpop.xlane.xlu0 %1823 }
 0x314   : > { %v8042_v27 = vmax.f32 %v8037_v59, %v1826_v53  ;;  %v8045_v12 = vmax.f32 %v8039_v14, %v1824_v0 }
 0x315   : > { %1036 = vperm.xlu1 %6682, %v7819_v47  }
 0x316   : > { %10076 = vst [vmem:[#allocation83_spill] sm:$0xff] %v8045_v12  ;;  %2569 = vst.msk [vmem:[#allocation3 + $0x58] sm:$0xff] %vm2107_vm4, %v8042_v27  ;;  %v8071_v59 = vpop.eup %6776 }
 0x317   : > { %2568 = vst.msk [vmem:[#allocation3 + $0x50] sm:$0xff] %vm2107_vm4, %v8045_v12  ;;  %v1830_v29 = vpop.xlane.xlu1 %1829  ;;  %v1828_v19 = vpop.xlane.xlu0 %1827  ;;  %v8069_v12 = vld [vmem:[#allocation3 + $0x70] sm:$0xff]  ;;  %10082 = vst [vmem:[#allocation89_spill] sm:$0xff] %v8071_v59 }
 0x318   : > { %v8057_v53 = vmax.f32 %v8052_v24, %v1830_v29  ;;  %v8060_v0 = vmax.f32 %v8054_v20, %v1828_v19  ;;  %10081 = vst [vmem:[#allocation88_spill] sm:$0xff] %v8069_v12  ;;  %v8084_v24 = vpop.eup %6778 }
 0x319   : > { %1031 = vperm.xlu1 %6682, %v7807_v26  }
 0x31a   : > { %10079 = vst [vmem:[#allocation86_spill] sm:$0xff] %v8060_v0  ;;  %2571 = vst.msk [vmem:[#allocation3 + $0x68] sm:$0xff] %vm2107_vm4, %v8057_v53 }
 0x31b   : > { %2570 = vst.msk [vmem:[#allocation3 + $0x60] sm:$0xff] %vm2107_vm4, %v8060_v0  ;;  %v1834_v14 = vpop.xlane.xlu1 %1833  ;;  %v1832_v56 = vpop.xlane.xlu0 %1831 }
 0x31c   : > { %v8074_v29 = vmax.f32 %v8067_v22, %v1834_v14  ;;  %v8077_v19 = vmax.f32 %v8069_v12, %v1832_v56 }
 0x31d   : > { %1408 = vperm.xlu1 %6682, %v8071_v59   ;;  %v6651_v59 = vunpack.i.h.bf16 %v7609_v1 }
 0x31e   : > { %10083 = vst [vmem:[#allocation90_spill] sm:$0xff] %v8077_v19  ;;  %2573 = vst.msk [vmem:[#allocation3 + $0x78] sm:$0xff] %vm2107_vm4, %v8074_v29 }
 0x31f   : > { %2572 = vst.msk [vmem:[#allocation3 + $0x70] sm:$0xff] %vm2107_vm4, %v8077_v19  ;;  %v1007_v20 = vpop.permute.xlu1 %1006  ;;  %v6650_v19 = vunpack.i.l.bf16 %v7609_v1  ;;  %v6660_v1 = vunpack.i.l.bf16 %v7618_v7 }
 0x320   : > { %v1080_v0 = vsub.f32 %v7651_v38, %v1007_v20  ;;  %v6656_v38 = vunpack.i.h.bf16 %v7613_v5 }
 0x321   : > { %v6430_v20 = vpack.c.bf16 %v6651_v59, %v6650_v19  ;;  %v6670_v59 = vunpack.i.l.bf16 %v7615_v6  ;;  %v6675_v19 = vunpack.i.l.bf16 %v7624_v11 }
 0x322   : > { %1418 = vperm.xlu0 %6683, %v8084_v24   ;;  %v1097_v56 = vmul.f32 1.442695, %v1080_v0 }
 0x323   : > { %v1002_v14 = vpop.permute.xlu0 %1001 }
 0x324   : > { %v1079_v22 = vsub.f32 %v7655_v39, %v1002_v14  ;;  %v6655_v39 = vunpack.i.l.bf16 %v7613_v5  ;;  %v6665_v14 = vunpack.i.l.bf16 %v7622_v9  ;;  %v6671_v5 = vunpack.i.h.bf16 %v7615_v6 }
 0x325   : > { %v10084_v6 = vsub.f32 %v7788_v37, %v7802_v48 }
 0x326   : > { %v1095_v12 = vmul.f32 1.442695, %v1079_v22  ;;  %1056 = vperm.xlu0 %6683, %v7854_v25   ;;  %v6434_v0 = vpack.c.bf16 %v6656_v38, %v6655_v39  ;;  %v6666_v22 = vunpack.i.h.bf16 %v7622_v9  ;;  %v6446_v38 = vpack.c.bf16 %v6671_v5, %v6670_v59 }
 0x327   : > { %v6681_v9 = vunpack.i.h.bf16 %v7620_v8  ;;  %v6680_v39 = vunpack.i.l.bf16 %v7620_v8 }
 0x328   : > { %6780 = vpow2.f32 %v1095_v12  ;;  %v6661_v12 = vunpack.i.h.bf16 %v7618_v7  ;;  %v6676_v7 = vunpack.i.h.bf16 %v7624_v11  ;;  %v958_v11 = vsub.f32 %v7804_v21, %v7819_v47  ;;  %v8133_v47 = vld [vmem:[#allocation3 + $0x18] sm:$0xff] }
 0x329   : > { %6782 = vpow2.f32 %v1097_v56  ;;  %10087 = vst [vmem:[#allocation93_spill] sm:$0xff] %v8133_v47 }
 0x32a   : > { %v6438_v56 = vpack.c.bf16 %v6661_v12, %v6660_v1  ;;  %v977_v12 = vmul.f32 1.442695, %v10084_v6  ;;  %v6454_v1 = vpack.c.bf16 %v6681_v9, %v6680_v39  ;;  %v981_v48 = vmul.f32 1.442695, %v958_v11  ;;  %v8156_v11 = vld [vmem:[#allocation3 + $0x28] sm:$0xff] }
 0x32b   : > { %10089 = vst [vmem:[#allocation95_spill] sm:$0xff] %v8156_v11 }
 0x32c   : > { %6784 = vpow2.f32 %v977_v12 }
 0x32d   : > { %6786 = vpow2.f32 %v981_v48 }
 0x332   : > { %v8092_v61 = vpop.eup %6780 }
 0x333   : > { %v8094_v34 = vpop.eup %6782  ;;  %6084 = vmatprep.mubr.f32.mxu1 %v8092_v61 }
 0x334   : > { %6085 = vmatmul.mubr.f32.vlgmr.msra.gmra.mrb[0].mxu1 %v8094_v34 }
 0x335   : > { %6429 = vmatpush3.bf16.msra.mxu1 %v7611_v4  ;;  %v6442_v4 = vpack.c.bf16 %v6666_v22, %v6665_v14  ;;  %v8120_v14 = vld [vmem:[#allocation3] sm:$0xff] }
 0x336   : > { %6431 = vmatprep.subr.bf16.mxu1 %v6430_v20  ;;  %10086 = vst [vmem:[#allocation92_spill] sm:$0xff] %v8120_v14  ;;  %v8149_v6 = vpop.eup %6784 }
 0x339   : > { %6433 = vmatpush3.bf16.msra.mxu1 %v6430_v20  ;;  %v6450_v20 = vpack.c.bf16 %v6676_v7, %v6675_v19  ;;  %v960_v7 = vsub.f32 %v7821_v57, %v7836_v36  ;;  %v962_v57 = vsub.f32 %v7840_v41, %v7854_v25  ;;  %v964_v41 = vsub.f32 %v7858_v10, %v7872_v15 }
 0x33a   : > { %6435 = vmatprep.subr.bf16.mxu1 %v6434_v0 }
 0x33b   : > { %v989_v48 = vmul.f32 1.442695, %v962_v57  ;;  %v993_v10 = vmul.f32 1.442695, %v964_v41 }
 0x33d   : > { %6437 = vmatpush3.bf16.msra.mxu1 %v6434_v0  ;;  %v8118_v0 = vld [vmem:[#allocation3 + $0x8] sm:$0xff] }
 0x33e   : > { %6439 = vmatprep.subr.bf16.mxu1 %v6438_v56  ;;  %10085 = vst [vmem:[#allocation91_spill] sm:$0xff] %v8118_v0 }
 0x341   : > { %6441 = vmatpush3.bf16.msra.mxu1 %v6438_v56  ;;  %2844 = vmax.xlane.f32.xlu1 %v7890_v58 }
 0x342   : > { %6443 = vmatprep.subr.bf16.mxu1 %v6442_v4 }
 0x345   : > { %6445 = vmatpush3.bf16.msra.mxu1 %v6442_v4  ;;  %2854 = vmax.xlane.f32.xlu0 %v7898_v55  ;;  %v10123_v55 = vld [vmem:[#allocation81_spill] sm:$0xff] }
 0x346   : > { %6447 = vmatprep.subr.bf16.mxu1 %v6446_v38 }
 0x349   : > { %6449 = vmatpush3.bf16.msra.mxu1 %v6446_v38  ;;  %v8143_v38 = vld [vmem:[#allocation3 + $0x10] sm:$0xff] }
 0x34a   : > { %6451 = vmatprep.subr.bf16.mxu1 %v6450_v20  ;;  %10088 = vst [vmem:[#allocation94_spill] sm:$0xff] %v8143_v38 }
 0x34d   : > { %6453 = vmatpush3.bf16.msra.mxu1 %v6450_v20 }
 0x34e   : > { %6455 = vmatprep.subr.bf16.mxu1 %v6454_v1 }
 0x350   : > { %v2835_v22 = vpop.xlane.xlu0 %2834  ;;  %v2833_v8 = vpop.xlane.xlu1 %2832 }
 0x351   : > { %6457 = vmatpush3.bf16.msra.mxu1 %v6454_v1  ;;  %v8123_v56 = vmax.f32 %v8118_v0, %v2835_v22  ;;  %v8126_v37 = vmax.f32 %v8120_v14, %v2833_v8  ;;  %v985_v1 = vmul.f32 1.442695, %v960_v7 }
 0x352   : > { %1041 = vperm.xlu1 %6682, %v7824_v32  }
 0x353   : > { %3588 = vst.msk [vmem:[#allocation3 + $0x8] sm:$0xff] %vm3136_vm5, %v8123_v56  ;;  %3587 = vst.msk [vmem:[#allocation3] sm:$0xff] %vm3136_vm5, %v8126_v37 }
 0x354   : > { %v1017_v21 = vpop.permute.xlu1 %1016  ;;  %v2839_v5 = vpop.xlane.xlu0 %2838 }
 0x355   : > { %v8136_v59 = vmax.f32 %v8133_v47, %v2839_v5  ;;  %v1082_v4 = vsub.f32 %v7658_v42, %v1017_v21  ;;  %v8167_v21 = vld [vmem:[#allocation3 + $0x38] sm:$0xff]  ;;  %v10122_v47 = vld [vmem:[#allocation72_spill] sm:$0xff] }
 0x356   : > { %10090 = vst [vmem:[#allocation96_spill] sm:$0xff] %v8167_v21 }
 0x357   : > { %3590 = vst.msk [vmem:[#allocation3 + $0x18] sm:$0xff] %vm3136_vm5, %v8136_v59  ;;  %v1101_v12 = vmul.f32 1.442695, %v1082_v4 }
 0x358   : > { %v1012_v19 = vpop.permute.xlu1 %1011  ;;  %v2837_v9 = vpop.xlane.xlu0 %2836 }
 0x359   : > { %v1081_v39 = vsub.f32 %v7663_v43, %v1012_v19  ;;  %v8147_v20 = vmax.f32 %v8143_v38, %v2837_v9  ;;  %v1862_v38 = vsub.f32 %v10123_v55, %v8042_v27 }
 0x35b   : > { %v1099_v42 = vmul.f32 1.442695, %v1081_v39  ;;  %3589 = vst.msk [vmem:[#allocation3 + $0x10] sm:$0xff] %vm3136_vm5, %v8147_v20  ;;  %1428 = vperm.xlu0 %6683, %v8149_v6  }
 0x35c   : > { %v1027_v36 = vpop.permute.xlu1 %1026  ;;  %v2843_v43 = vpop.xlane.xlu0 %2842 }
 0x35d   : > { %6788 = vpow2.f32 %v1099_v42  ;;  %v8159_v22 = vmax.f32 %v8156_v11, %v2843_v43  ;;  %v1084_v8 = vsub.f32 %v7666_v45, %v1027_v36  ;;  %v8173_v45 = vpop.eup %6786  ;;  %v10121_v11 = vld [vmem:[#allocation75_spill] sm:$0xff] }
 0x35e   : > { %6790 = vpow2.f32 %v1101_v12  ;;  %10092 = vst [vmem:[#allocation98_spill] sm:$0xff] %v8173_v45 }
 0x35f   : > { %3592 = vst.msk [vmem:[#allocation3 + $0x28] sm:$0xff] %vm3136_vm5, %v8159_v22  ;;  %1066 = vperm.xlu0 %6683, %v7872_v15   ;;  %6792 = vpow2.f32 %v985_v1  ;;  %v1105_v19 = vmul.f32 1.442695, %v1084_v8  ;;  %v966_v15 = vsub.f32 %v7876_v60, %v7888_v2  ;;  %v1852_v60 = vsub.f32 %v7959_v51, %v7962_v23 }
 0x360   : > { %v1022_v25 = vpop.permute.xlu1 %1021  ;;  %v2847_v5 = vpop.xlane.xlu0 %2846  ;;  %6794 = vpow2.f32 %v989_v48  ;;  %v1854_v51 = vsub.f32 %v7973_v18, %v7978_v13  ;;  %v10097_v48 = vsub.f32 %v7773_v30, %v7786_v35  ;;  %v1856_v18 = vsub.f32 %v7988_v31, %v7993_v16 }
 0x361   : > { %v1083_v4 = vsub.f32 %v7670_v46, %v1022_v25  ;;  %v8171_v7 = vmax.f32 %v8167_v21, %v2847_v5  ;;  %v997_v12 = vmul.f32 1.442695, %v966_v15  ;;  %v1869_v36 = vmul.f32 1.442695, %v1852_v60 }
 0x362   : > { %v971_v41 = vmul.f32 1.442695, %v10097_v48  ;;  %v1873_v25 = vmul.f32 1.442695, %v1854_v51  ;;  %v9925_v5 = vmov 1   ;;  %v1858_v30 = vsub.f32 %v8002_v62, %v8007_v28  ;;  %v8236_v62 = vld [vmem:[#allocation3 + $0x20] sm:$0xff] }
 0x363   : > { %10091 = vst [vmem:[#allocation97_spill] sm:$0xff] %v8171_v7  ;;  %v1103_v9 = vmul.f32 1.442695, %v1083_v4  ;;  %3594 = vst.msk [vmem:[#allocation3 + $0x38] sm:$0xff] %vm3136_vm5, %v8171_v7  ;;  %1438 = vperm.xlu0 %6683, %v8173_v45   ;;  %v10150_v45 = vld [vmem:[#allocation89_spill] sm:$0xff] }
 0x364   : > { %v1881_v31 = vmul.f32 1.442695, %v1858_v30  ;;  %10101 = vst [vmem:[#allocation106_spill] sm:$0xff] %v8236_v62 }
 0x365   : > { %6796 = vpow2.f32 %v1103_v9 }
 0x366   : > { %6798 = vpow2.f32 %v1105_v19  ;;  %v1877_v19 = vmul.f32 1.442695, %v1856_v18  ;;  %v8250_v18 = vld [vmem:[#allocation3 + $0x48] sm:$0xff] }
 0x367   : > { %v8180_v46 = vpop.eup %6788  ;;  %1076 = vperm.xlu0 %6683, %v7888_v2   ;;  %6800 = vpow2.f32 %v993_v10  ;;  %10103 = vst [vmem:[#allocation108_spill] sm:$0xff] %v8250_v18 }
 0x368   : > { %v8183_v39 = vpop.eup %6790  ;;  %6087 = vmatprep.mubr.f32.mxu1 %v8180_v46  ;;  %6802 = vpow2.f32 %v997_v12  ;;  %v8233_v15 = vpop.permute.xlu0 %1046 }
 0x369   : > { %6088 = vmatmul.mubr.f32.gmra.mrb[2].mxu1 %v8183_v39  ;;  %v8187_v42 = vpop.eup %6792  ;;  %6804 = vpow2.f32 %v1869_v36 }
 0x36a   : > { %10093 = vst [vmem:[#allocation99_spill] sm:$0xff] %v8187_v42  ;;  %v8192_v1 = vpop.eup %6794  ;;  %6806 = vpow2.f32 %v971_v41 }
 0x36b   : > { %1448 = vperm.xlu0 %6683, %v8187_v42   ;;  %10094 = vst [vmem:[#allocation100_spill] sm:$0xff] %v8192_v1  ;;  %6808 = vpow2.f32 %v1873_v25  ;;  %v10145_v42 = vld [vmem:[#allocation79_spill] sm:$0xff] }
 0x36c   : > { %6810 = vpow2.f32 %v1877_v19  ;;  %v8244_v36 = vpop.permute.xlu0 %1403 }
 0x36d   : > { %6812 = vpow2.f32 %v1881_v31 }
 0x36f   : > { %v8194_v57 = vpop.eup %6796  ;;  %1458 = vperm.xlu0 %6683, %v8192_v1  }
 0x370   : > { %v8197_v2 = vpop.eup %6798  ;;  %6090 = vmatprep.mubr.f32.mxu1 %v8194_v57 }
 0x371   : > { %6091 = vmatmul.mubr.f32.gmra.mrb[4].mxu1 %v8197_v2  ;;  %v8201_v43 = vpop.eup %6800 }
 0x372   : > { %10095 = vst [vmem:[#allocation101_spill] sm:$0xff] %v8201_v43  ;;  %v8206_v8 = vpop.eup %6802 }
 0x373   : > { %1468 = vperm.xlu0 %6683, %v8201_v43   ;;  %10096 = vst [vmem:[#allocation102_spill] sm:$0xff] %v8206_v8  ;;  %v8217_v4 = vpop.eup %6804 }
 0x374   : > { %10098 = vst [vmem:[#allocation103_spill] sm:$0xff] %v8217_v4  ;;  %v8223_v35 = vpop.eup %6806 }
 0x375   : > { %v8225_v9 = vpop.eup %6808 }
 0x376   : > { %2848 = vmax.xlane.f32.xlu1 %v7896_v63  ;;  %10099 = vst [vmem:[#allocation104_spill] sm:$0xff] %v8225_v9  ;;  %v8231_v10 = vpop.eup %6810 }
 0x377   : > { %1478 = vperm.xlu0 %6683, %v8206_v8   ;;  %10100 = vst [vmem:[#allocation105_spill] sm:$0xff] %v8231_v10  ;;  %v8246_v48 = vpop.eup %6812 }
 0x378   : > { %10102 = vst [vmem:[#allocation107_spill] sm:$0xff] %v8246_v48 }
 0x37b   : > { %6685 = vset.pattern.permute.xlu0 %v9925_v5 }
 0x37c   : > { %1901 = vperm.xlu0 %6685, %v7967_v3  }
 0x380   : > { %2372 = vperm.xlu0 %6685, %v8217_v4  }
 0x384   : > { %1946 = vperm.xlu0 %6685, %v8025_v52  }
 0x387   : > { %1413 = vperm.xlu1 %6682, %v8223_v35  }
 0x388   : > { %2382 = vperm.xlu0 %6685, %v8225_v9  }
 0x38b   : > { %1051 = vperm.xlu1 %6682, %v7843_v17  }
 0x38c   : > { %1956 = vperm.xlu0 %6685, %v8042_v27  }
 0x390   : > { %2392 = vperm.xlu0 %6685, %v8231_v10  }
 0x391   : > { %v2841_v12 = vpop.xlane.xlu1 %2840 }
 0x392   : > { %v8239_v60 = vmax.f32 %v8236_v62, %v2841_v12 }
 0x394   : > { %3591 = vst.msk [vmem:[#allocation3 + $0x20] sm:$0xff] %vm3136_vm5, %v8239_v60  ;;  %1966 = vperm.xlu0 %6685, %v8057_v53  }
 0x395   : > { %v1037_v51 = vpop.permute.xlu1 %1036 }
 0x396   : > { %v1086_v41 = vsub.f32 %v7674_v49, %v1037_v51 }
 0x398   : > { %2402 = vperm.xlu0 %6685, %v8246_v48   ;;  %v1109_v12 = vmul.f32 1.442695, %v1086_v41 }
 0x399   : > { %v1032_v25 = vpop.permute.xlu1 %1031  ;;  %v2851_v19 = vpop.xlane.xlu0 %2850 }
 0x39a   : > { %v1085_v30 = vsub.f32 %v7678_v50, %v1032_v25  ;;  %v8254_v31 = vmax.f32 %v8250_v18, %v2851_v19  ;;  %v955_v50 = vsub.f32 %v7783_v33, %v7791_v40  ;;  %v957_v25 = vsub.f32 %v7797_v44, %v7807_v26  ;;  %v10105_v19 = vld [vmem:[#allocation32_spill] sm:$0xff]  ;;  %v10107_v40 = vld [vmem:[#allocation33_spill] sm:$0xff]  ;;  %v10108_v44 = vld [vmem:[#allocation39_spill] sm:$0xff] }
 0x39c   : > { %10104 = vst [vmem:[#allocation109_spill] sm:$0xff] %v8254_v31  ;;  %v1107_v5 = vmul.f32 1.442695, %v1085_v30  ;;  %3596 = vst.msk [vmem:[#allocation3 + $0x48] sm:$0xff] %vm3136_vm5, %v8254_v31  ;;  %1976 = vperm.xlu0 %6685, %v8074_v29   ;;  %v975_v41 = vmul.f32 1.442695, %v955_v50  ;;  %v959_v30 = vsub.f32 %v10105_v19, %v7824_v32  ;;  %v961_v50 = vsub.f32 %v10107_v40, %v7843_v17 }
 0x39d   : > { %v10110_v19 = vld [vmem:[#allocation43_spill] sm:$0xff]  ;;  %v8295_v40 = vld [vmem:[#allocation3 + $0x30] sm:$0xff] }
 0x39e   : > { %6814 = vpow2.f32 %v1107_v5  ;;  %v979_v5 = vmul.f32 1.442695, %v957_v25  ;;  %v983_v33 = vmul.f32 1.442695, %v959_v30  ;;  %v987_v26 = vmul.f32 1.442695, %v961_v50 }
 0x39f   : > { %6816 = vpow2.f32 %v1109_v12  ;;  %v10106_v12 = vld [vmem:[#allocation78_spill] sm:$0xff]  ;;  %v10111_v30 = vld [vmem:[#allocation40_spill] sm:$0xff]  ;;  %10112 = vst [vmem:[#allocation32_spill] sm:$0xff] %v8295_v40 }
 0x3a0   : > { %6818 = vpow2.f32 %v975_v41  ;;  %v1860_v18 = vsub.f32 %v10106_v12, %v8025_v52  ;;  %v965_v17 = vsub.f32 %v10111_v30, %v10110_v19  ;;  %v8430_v31 = vld [vmem:[#allocation3 + $0x50] sm:$0xff] }
 0x3a1   : > { %6820 = vpow2.f32 %v979_v5  ;;  %v8285_v52 = vpop.permute.xlu0 %1418 }
 0x3a2   : > { %v1885_v41 = vmul.f32 1.442695, %v1860_v18  ;;  %6822 = vpow2.f32 %v983_v33  ;;  %v8290_v18 = vpop.permute.xlu1 %1408  ;;  %v995_v12 = vmul.f32 1.442695, %v965_v17 }
 0x3a4   : > { %6824 = vpow2.f32 %v1885_v41 }
 0x3a5   : > { %6826 = vpow2.f32 %v987_v26  ;;  %v8293_v33 = vpop.permute.xlu0 %1056 }
 0x3a8   : > { %v8259_v49 = vpop.eup %6814 }
 0x3a9   : > { %v8261_v51 = vpop.eup %6816  ;;  %6093 = vmatprep.mubr.f32.mxu1 %v8259_v49 }
 0x3aa   : > { %6094 = vmatmul.mubr.f32.gmra.mrb[6].mxu1 %v8261_v51  ;;  %v8275_v62 = vpop.eup %6818 }
 0x3ab   : > { %v8283_v32 = vpop.eup %6820 }
 0x3ac   : > { %v8297_v41 = vpop.eup %6822 }
 0x3ae   : > { %v8302_v26 = vpop.eup %6824 }
 0x3af   : > { %2852 = vmax.xlane.f32.xlu1 %v7900_v54  ;;  %10113 = vst [vmem:[#allocation78_spill] sm:$0xff] %v8302_v26  ;;  %v8312_v17 = vpop.eup %6826 }
 0x3bb   : > { %1161 = vadd.xlane.f32.xlu0 %v8094_v34  ;;  %v10109_v34 = vld [vmem:[#allocation36_spill] sm:$0xff] }
 0x3bc   : > { %v963_v25 = vsub.f32 %v10109_v34, %v10108_v44  ;;  %v10114_v34 = vld [vmem:[#allocation8_spill] sm:$0xff] }
 0x3be   : > { %v991_v5 = vmul.f32 1.442695, %v963_v25  ;;  %v1088_v25 = vsub.f32 %v10114_v34, %v8233_v15 }
 0x3c0   : > { %1423 = vperm.xlu1 %6682, %v8275_v62   ;;  %6828 = vpow2.f32 %v991_v5  ;;  %v1113_v15 = vmul.f32 1.442695, %v1088_v25 }
 0x3c1   : > { %6830 = vpow2.f32 %v995_v12 }
 0x3c4   : > { %1061 = vperm.xlu1 %6682, %v10108_v44  }
 0x3c8   : > { %1433 = vperm.xlu1 %6682, %v8283_v32  }
 0x3ca   : > { %v8321_v34 = vpop.eup %6828 }
 0x3cb   : > { %v8324_v21 = vpop.eup %6830 }
 0x3cc   : > { %1071 = vperm.xlu1 %6682, %v10110_v19   ;;  %v8310_v19 = vld [vmem:[#allocation3 + $0x58] sm:$0xff] }
 0x3cd   : > { %10115 = vst [vmem:[#allocation33_spill] sm:$0xff] %v8310_v19 }
 0x3ce   : > { %v2845_v50 = vpop.xlane.xlu1 %2844 }
 0x3cf   : > { %v8300_v44 = vmax.f32 %v8295_v40, %v2845_v50  ;;  %v10116_v50 = vld [vmem:[#allocation9_spill] sm:$0xff] }
 0x3d0   : > { %1443 = vperm.xlu1 %6682, %v8297_v41  }
 0x3d1   : > { %3593 = vst.msk [vmem:[#allocation3 + $0x30] sm:$0xff] %vm3136_vm5, %v8300_v44  ;;  %2412 = vperm.xlu0 %6685, %v8302_v26  }
 0x3d2   : > { %v1042_v5 = vpop.permute.xlu1 %1041  ;;  %v2855_v30 = vpop.xlane.xlu0 %2854 }
 0x3d3   : > { %v1087_v40 = vsub.f32 %v10116_v50, %v1042_v5  ;;  %v8316_v0 = vmax.f32 %v8310_v19, %v2855_v30  ;;  %v10118_v5 = vmov 1  }
 0x3d4   : > { %1453 = vperm.xlu1 %6682, %v8312_v17  }
 0x3d5   : > { %10117 = vst [vmem:[#allocation39_spill] sm:$0xff] %v8316_v0  ;;  %v1111_v12 = vmul.f32 1.442695, %v1087_v40  ;;  %3598 = vst.msk [vmem:[#allocation3 + $0x58] sm:$0xff] %vm3136_vm5, %v8316_v0  ;;  %v10133_v0 = vld [vmem:[#allocation10_spill] sm:$0xff] }
 0x3d6   : > { %v1090_v8 = vsub.f32 %v10133_v0, %v8293_v33  ;;  %v10137_v0 = vld [vmem:[#allocation86_spill] sm:$0xff] }
 0x3d7   : > { %6832 = vpow2.f32 %v1111_v12  ;;  %v10120_v12 = vld [vmem:[#allocation71_spill] sm:$0xff] }
 0x3d8   : > { %6834 = vpow2.f32 %v1113_v15  ;;  %1463 = vperm.xlu1 %6682, %v8321_v34   ;;  %v10119_v15 = vld [vmem:[#allocation73_spill] sm:$0xff] }
 0x3da   : > { %v8333_v25 = vpop.permute.xlu0 %1428 }
 0x3dc   : > { %1473 = vperm.xlu1 %6682, %v8324_v21  }
 0x3de   : > { %v8338_v50 = vpop.permute.xlu0 %1066 }
 0x3e0   : > { %6684 = vset.pattern.permute.xlu1 %v10118_v5  ;;  %v1851_v5 = vsub.f32 %v10120_v12, %v7967_v3  ;;  %v10124_v12 = vld [vmem:[#allocation77_spill] sm:$0xff] }
 0x3e1   : > { %v8328_v30 = vpop.eup %6832  ;;  %1906 = vperm.xlu1 %6684, %v7962_v23  }
 0x3e2   : > { %v8331_v40 = vpop.eup %6834  ;;  %6096 = vmatprep.mubr.f32.mxu1 %v8328_v30  ;;  %v1867_v23 = vmul.f32 1.442695, %v1851_v5  ;;  %v8344_v19 = vpop.permute.xlu0 %1438 }
 0x3e3   : > { %6097 = vmatmul.mubr.f32.gmra.mrb[8].mxu1 %v8331_v40 }
 0x3e4   : > { %6836 = vpow2.f32 %v1867_v23 }
 0x3e5   : > { %1916 = vperm.xlu1 %6684, %v7978_v13   ;;  %v1853_v13 = vsub.f32 %v10122_v47, %v10119_v15  ;;  %v10127_v47 = vld [vmem:[#allocation80_spill] sm:$0xff] }
 0x3e6   : > { %v8352_v14 = vpop.permute.xlu0 %1076 }
 0x3e7   : > { %v1871_v3 = vmul.f32 1.442695, %v1853_v13  ;;  %v8368_v13 = vld [vmem:[#allocation3 + $0x40] sm:$0xff] }
 0x3e8   : > { %10129 = vst [vmem:[#allocation43_spill] sm:$0xff] %v8368_v13 }
 0x3e9   : > { %1911 = vperm.xlu1 %6684, %v10119_v15   ;;  %6838 = vpow2.f32 %v1871_v3  ;;  %v1386_v15 = vld [vmem:[#allocation5 + $0x8] sm:$0xff] }
 0x3ea   : > { %v8358_v54 = vpop.permute.xlu0 %1448 }
 0x3ed   : > { %1926 = vperm.xlu1 %6684, %v7993_v16   ;;  %v1889_v16 = vmul.f32 1.442695, %v1862_v38 }
 0x3ee   : > { %v8360_v23 = vpop.eup %6836  ;;  %v8363_v27 = vpop.permute.xlu0 %1458 }
 0x3ef   : > { %6840 = vpow2.f32 %v1889_v16  ;;  %10126 = vst [vmem:[#allocation36_spill] sm:$0xff] %v8360_v23  ;;  %v1385_v16 = vld [vmem:[#allocation5] sm:$0xff] }
 0x3f0   : > { %1163 = vadd.xlane.f32.xlu0 %v8180_v46  ;;  %v10125_v46 = vld [vmem:[#allocation74_spill] sm:$0xff] }
 0x3f1   : > { %1921 = vperm.xlu1 %6684, %v10121_v11   ;;  %v1855_v5 = vsub.f32 %v10125_v46, %v10121_v11  ;;  %10146 = vst [vmem:[#allocation74_spill] sm:$0xff] %v8430_v31 }
 0x3f2   : > { %v8379_v63 = vpop.permute.xlu0 %1468 }
 0x3f3   : > { %v1875_v55 = vmul.f32 1.442695, %v1855_v5  ;;  %v8370_v3 = vpop.eup %6838 }
 0x3f4   : > { %10130 = vst [vmem:[#allocation40_spill] sm:$0xff] %v8370_v3 }
 0x3f5   : > { %1936 = vperm.xlu1 %6684, %v8007_v28   ;;  %6842 = vpow2.f32 %v1875_v55  ;;  %v10128_v28 = vld [vmem:[#allocation76_spill] sm:$0xff]  ;;  %v1482_v55 = vmul.f32 %v8290_v18, %v1386_v15 }
 0x3f6   : > { %v1857_v38 = vsub.f32 %v10128_v28, %v10124_v12  ;;  %v8393_v43 = vpop.permute.xlu0 %1478 }
 0x3f8   : > { %v1879_v5 = vmul.f32 1.442695, %v1857_v38  ;;  %v10134_v38 = vld [vmem:[#allocation83_spill] sm:$0xff] }
 0x3f9   : > { %1931 = vperm.xlu1 %6684, %v10124_v12   ;;  %v1481_v12 = vmul.f32 %v8244_v36, %v1385_v16  ;;  %v1117_v16 = vmul.f32 1.442695, %v1090_v8 }
 0x3fa   : > { %6844 = vpow2.f32 %v1879_v5  ;;  %v10140_v5 = vld [vmem:[#allocation90_spill] sm:$0xff] }
 0x3fb   : > { %v8397_v33 = vpop.permute.xlu0 %1901 }
 0x3fd   : > { %2367 = vperm.xlu1 %6684, %v8360_v23   ;;  %v8375_v23 = vpop.eup %6840 }
 0x3fe   : > { %10132 = vst [vmem:[#allocation9_spill] sm:$0xff] %v8375_v23 }
 0x3ff   : > { %v8390_v15 = vpop.eup %6842 }
 0x400   : > { %10135 = vst [vmem:[#allocation73_spill] sm:$0xff] %v8390_v15 }
 0x401   : > { %1941 = vperm.xlu1 %6684, %v10127_v47  }
 0x403   : > { %v2849_v11 = vpop.xlane.xlu1 %2848 }
 0x404   : > { %v8373_v46 = vmax.f32 %v8368_v13, %v2849_v11 }
 0x405   : > { %2377 = vperm.xlu1 %6684, %v8370_v3  }
 0x406   : > { %10131 = vst [vmem:[#allocation8_spill] sm:$0xff] %v8373_v46  ;;  %3595 = vst.msk [vmem:[#allocation3 + $0x40] sm:$0xff] %vm3136_vm5, %v8373_v46  ;;  %2422 = vperm.xlu0 %6685, %v8375_v23   ;;  %v10136_v23 = vld [vmem:[#allocation11_spill] sm:$0xff] }
 0x407   : > { %v6086_v28 = vpop.f32.mrb[0].mxu1  ;;  %v1414_v58 = vpop.permute.xlu1 %1413 }
 0x408   : > { %v1498_v11 = vadd.f32 %v6086_v28, %v1482_v55  ;;  %v1306_v13 = vpop.f32.mrb[1].mxu1 }
 0x409   : > { %v1497_v26 = vadd.f32 %v1481_v12, %v1306_v13  ;;  %1951 = vperm.xlu1 %6684, %v10134_v38   ;;  %v8399_v13 = vpop.eup %6844 }
 0x40a   : > { %1514 = vst.msk [vmem:[#allocation5 + $0x8] sm:$0xff] %vm693_vm2, %v1498_v11  ;;  %10138 = vst [vmem:[#allocation71_spill] sm:$0xff] %v8399_v13  ;;  %v10142_v11 = vld [vmem:[#allocation84_spill] sm:$0xff] }
 0x40b   : > { %1513 = vst.msk [vmem:[#allocation5] sm:$0xff] %vm693_vm2, %v1497_v26  ;;  %v1052_v18 = vpop.permute.xlu1 %1051  ;;  %v8402_v26 = vpop.permute.xlu0 %2372 }
 0x40c   : > { %v1089_v36 = vsub.f32 %v10136_v23, %v1052_v18  ;;  %10139 = vst [vmem:[#allocation75_spill] sm:$0xff] %v8402_v26  ;;  %v1864_v18 = vsub.f32 %v10142_v11, %v8057_v53 }
 0x40d   : > { %2387 = vperm.xlu1 %6684, %v8390_v15   ;;  %v1387_v15 = vld [vmem:[#allocation5 + $0x10] sm:$0xff] }
 0x40e   : > { %v1115_v55 = vmul.f32 1.442695, %v1089_v36  ;;  %v1483_v53 = vmul.f32 %v1414_v58, %v1387_v15  ;;  %v1390_v58 = vld [vmem:[#allocation5 + $0x28] sm:$0xff]  ;;  %v10148_v15 = vld [vmem:[#allocation12_spill] sm:$0xff] }
 0x40f   : > { %v8411_v12 = vpop.permute.xlu0 %1946 }
 0x410   : > { %6846 = vpow2.f32 %v1115_v55 }
 0x411   : > { %6848 = vpow2.f32 %v1117_v16  ;;  %1961 = vperm.xlu1 %6684, %v10137_v0   ;;  %v1893_v16 = vmul.f32 1.442695, %v1864_v18 }
 0x413   : > { %v8413_v28 = vpop.permute.xlu0 %2382  ;;  %6850 = vpow2.f32 %v1893_v16 }
 0x414   : > { %10141 = vst [vmem:[#allocation72_spill] sm:$0xff] %v8413_v28  ;;  %v1859_v28 = vsub.f32 %v10145_v42, %v10127_v47  ;;  %v1389_v47 = vld [vmem:[#allocation5 + $0x20] sm:$0xff] }
 0x415   : > { %2397 = vperm.xlu1 %6684, %v8399_v13   ;;  %v1388_v13 = vld [vmem:[#allocation5 + $0x18] sm:$0xff] }
 0x416   : > { %v1883_v42 = vmul.f32 1.442695, %v1859_v28 }
 0x417   : > { %v8418_v36 = vpop.permute.xlu0 %1956 }
 0x418   : > { %6852 = vpow2.f32 %v1883_v42 }
 0x419   : > { %1971 = vperm.xlu1 %6684, %v10140_v5  }
 0x41a   : > { %v8405_v8 = vpop.eup %6846 }
 0x41b   : > { %v8407_v23 = vpop.eup %6848  ;;  %6099 = vmatprep.mubr.f32.mxu1 %v8405_v8  ;;  %v8420_v55 = vpop.permute.xlu0 %2392 }
 0x41c   : > { %6100 = vmatmul.mubr.f32.gmra.mrb[10].mxu1 %v8407_v23  ;;  %10143 = vst [vmem:[#allocation81_spill] sm:$0xff] %v8420_v55 }
 0x41d   : > { %v8424_v1 = vpop.eup %6850 }
 0x41e   : > { %10144 = vst [vmem:[#allocation77_spill] sm:$0xff] %v8424_v1 }
 0x41f   : > { %v8422_v26 = vpop.permute.xlu0 %1966 }
 0x423   : > { %v8432_v16 = vpop.permute.xlu0 %2402 }
 0x424   : > { %10147 = vst [vmem:[#allocation80_spill] sm:$0xff] %v8432_v16 }
 0x425   : > { %1167 = vadd.xlane.f32.xlu0 %v8194_v57  ;;  %v1484_v57 = vmul.f32 %v8285_v52, %v1388_v13  ;;  %v1092_v13 = vsub.f32 %v10148_v15, %v8338_v50  ;;  %v10152_v15 = vld [vmem:[#allocation17_spill] sm:$0xff] }
 0x43b   : > { %2432 = vperm.xlu0 %6685, %v8424_v1   ;;  %v1121_v1 = vmul.f32 1.442695, %v1092_v13  ;;  %v1979_v13 = vsub.f32 %v10152_v15, %v8397_v33 }
 0x43c   : > { %v6089_v11 = vpop.f32.mrb[2].mxu1  ;;  %v2853_v18 = vpop.xlane.xlu1 %2852 }
 0x43d   : > { %v1500_v55 = vadd.f32 %v6089_v11, %v1484_v57  ;;  %v8435_v48 = vmax.f32 %v8430_v31, %v2853_v18  ;;  %v1316_v10 = vpop.f32.mrb[3].mxu1  ;;  %1159 = vadd.xlane.f32.xlu1 %v8092_v61  ;;  %v1486_v57 = vmul.f32 %v8333_v25, %v1390_v58  ;;  %v8445_v11 = vpop.permute.xlu0 %1976  ;;  %v10149_v18 = vld [vmem:[#allocation13_spill] sm:$0xff] }
 0x43e   : > { %v1499_v3 = vadd.f32 %v1483_v53, %v1316_v10 }
 0x43f   : > { %1516 = vst.msk [vmem:[#allocation5 + $0x18] sm:$0xff] %vm693_vm2, %v1500_v55  ;;  %v1128_v55 = vld [vmem:[#allocation4 + $0x8] sm:$0xff] }
 0x440   : > { %3597 = vst.msk [vmem:[#allocation3 + $0x50] sm:$0xff] %vm3136_vm5, %v8435_v48  ;;  %v1424_v52 = vpop.permute.xlu1 %1423  ;;  %v1144_v50 = vmul.f32 %v10150_v45, %v1128_v55  ;;  %v10154_v45 = vld [vmem:[#allocation15_spill] sm:$0xff] }
 0x441   : > { %1515 = vst.msk [vmem:[#allocation5 + $0x10] sm:$0xff] %vm693_vm2, %v1499_v3  ;;  %v1485_v61 = vmul.f32 %v1424_v52, %v1389_v47  ;;  %v10151_v52 = vld [vmem:[#allocation14_spill] sm:$0xff] }
 0x442   : > { %v1094_v47 = vsub.f32 %v10151_v52, %v8352_v14 }
 0x444   : > { %v6092_v10 = vpop.f32.mrb[4].mxu1  ;;  %v1062_v28 = vpop.permute.xlu1 %1061 }
 0x445   : > { %v1502_v53 = vadd.f32 %v6092_v10, %v1486_v57  ;;  %v1091_v16 = vsub.f32 %v10149_v18, %v1062_v28  ;;  %v1326_v31 = vpop.f32.mrb[5].mxu1  ;;  %v1995_v10 = vmul.f32 1.442695, %v1979_v13 }
 0x446   : > { %v1501_v3 = vadd.f32 %v1485_v61, %v1326_v31  ;;  %v1125_v61 = vmul.f32 1.442695, %v1094_v47 }
 0x447   : > { %1518 = vst.msk [vmem:[#allocation5 + $0x28] sm:$0xff] %vm693_vm2, %v1502_v53  ;;  %v1119_v9 = vmul.f32 1.442695, %v1091_v16  ;;  %v8458_v16 = vpop.eup %6852 }
 0x448   : > { %1517 = vst.msk [vmem:[#allocation5 + $0x20] sm:$0xff] %vm693_vm2, %v1501_v3  ;;  %v1162_v25 = vpop.xlane.xlu0 %1161  ;;  %v8451_v42 = vpop.permute.xlu1 %1433  ;;  %10153 = vst [vmem:[#allocation76_spill] sm:$0xff] %v8458_v16  ;;  %v10155_v3 = vld [vmem:[#allocation87_spill] sm:$0xff] }
 0x449   : > { %6854 = vpow2.f32 %v1119_v9  ;;  %v1192_v58 = vadd.f32 %v1162_v25, %v1144_v50  ;;  %v1866_v50 = vsub.f32 %v10155_v3, %v8074_v29 }
 0x44a   : > { %6856 = vpow2.f32 %v1121_v1 }
 0x44b   : > { %1209 = vst.msk [vmem:[#allocation4 + $0x8] sm:$0xff] %vm1207_vm3, %v1192_v58  ;;  %v1897_v52 = vmul.f32 1.442695, %v1866_v50  ;;  %v10161_v50 = vld [vmem:[#allocation20_spill] sm:$0xff] }
 0x44c   : > { %v1072_v31 = vpop.permute.xlu1 %1071 }
 0x44d   : > { %v1093_v57 = vsub.f32 %v10154_v45, %v1072_v31  ;;  %v10158_v45 = vld [vmem:[#allocation18_spill] sm:$0xff] }
 0x44e   : > { %2407 = vperm.xlu1 %6684, %v8458_v16  }
 0x44f   : > { %v1123_v9 = vmul.f32 1.442695, %v1093_v57 }
 0x450   : > { %v8462_v28 = vpop.permute.xlu1 %1443 }
 0x451   : > { %6858 = vpow2.f32 %v1123_v9 }
 0x452   : > { %6860 = vpow2.f32 %v1125_v61  ;;  %v10159_v61 = vld [vmem:[#allocation19_spill] sm:$0xff] }
 0x453   : > { %v8464_v14 = vpop.eup %6854  ;;  %6862 = vpow2.f32 %v1995_v10 }
 0x454   : > { %v8466_v1 = vpop.eup %6856  ;;  %6102 = vmatprep.mubr.f32.mxu1 %v8464_v14  ;;  %v8469_v33 = vpop.permute.xlu1 %1453  ;;  %6864 = vpow2.f32 %v1897_v52  ;;  %v10162_v52 = vld [vmem:[#allocation82_spill] sm:$0xff] }
 0x455   : > { %6103 = vmatmul.mubr.f32.gmra.mrb[12].mxu1 %v8466_v1 }
 0x458   : > { %v8472_v55 = vpop.permute.xlu1 %1463 }
 0x45a   : > { %1171 = vadd.xlane.f32.xlu0 %v8259_v49  ;;  %v10157_v49 = vld [vmem:[#allocation16_spill] sm:$0xff] }
 0x45b   : > { %v8475_v53 = vpop.eup %6858 }
 0x45c   : > { %v8477_v18 = vpop.eup %6860  ;;  %6105 = vmatprep.mubr.f32.mxu1 %v8475_v53  ;;  %v8482_v25 = vpop.permute.xlu1 %1473 }
 0x45d   : > { %v8484_v58 = vpop.eup %6862  ;;  %6106 = vmatmul.mubr.f32.gmra.mrb[14].mxu1 %v8477_v18 }
 0x45e   : > { %10156 = vst [vmem:[#allocation10_spill] sm:$0xff] %v8484_v58  ;;  %6166 = vmatprep.mubr.f32.mxu1 %v8484_v58  ;;  %v8491_v4 = vpop.eup %6864 }
 0x45f   : > { %10160 = vst [vmem:[#allocation83_spill] sm:$0xff] %v8491_v4 }
 0x460   : > { %v1907_v47 = vpop.permute.xlu1 %1906 }
 0x461   : > { %v1980_v15 = vsub.f32 %v10157_v49, %v1907_v47  ;;  %v1861_v47 = vsub.f32 %v10162_v52, %v10134_v38 }
 0x463   : > { %v1997_v13 = vmul.f32 1.442695, %v1980_v15  ;;  %v10163_v15 = vld [vmem:[#allocation21_spill] sm:$0xff] }
 0x464   : > { %v1917_v31 = vpop.permute.xlu1 %1916 }
 0x465   : > { %6866 = vpow2.f32 %v1997_v13  ;;  %v1982_v29 = vsub.f32 %v10158_v45, %v1917_v31 }
 0x467   : > { %v2001_v9 = vmul.f32 1.442695, %v1982_v29  ;;  %v1887_v29 = vmul.f32 1.442695, %v1861_v47  ;;  %v1129_v47 = vld [vmem:[#allocation4 + $0x10] sm:$0xff] }
 0x468   : > { %v1912_v57 = vpop.permute.xlu1 %1911 }
 0x469   : > { %v1981_v10 = vsub.f32 %v10159_v61, %v1912_v57  ;;  %v9966_v61 = vmov 2  }
 0x46b   : > { %v1999_v3 = vmul.f32 1.442695, %v1981_v10 }
 0x46c   : > { %v1927_v16 = vpop.permute.xlu1 %1926 }
 0x46d   : > { %6868 = vpow2.f32 %v1999_v3  ;;  %v1984_v58 = vsub.f32 %v10161_v50, %v1927_v16  ;;  %v10164_v16 = vld [vmem:[#allocation22_spill] sm:$0xff]  ;;  %v1392_v3 = vld [vmem:[#allocation5 + $0x38] sm:$0xff] }
 0x46e   : > { %6870 = vpow2.f32 %v2001_v9  ;;  %v10166_v50 = vld [vmem:[#allocation23_spill] sm:$0xff] }
 0x46f   : > { %v8494_v46 = vpop.eup %6866  ;;  %v2005_v31 = vmul.f32 1.442695, %v1984_v58 }
 0x470   : > { %2442 = vperm.xlu0 %6685, %v8491_v4   ;;  %6167 = vmatmul.mubr.f32.vlgmr.msra.gmra.mrb[16].mxu1 %v8494_v46  ;;  %v1922_v49 = vpop.permute.xlu1 %1921 }
 0x471   : > { %v1983_v13 = vsub.f32 %v10163_v15, %v1922_v49  ;;  %v1391_v49 = vld [vmem:[#allocation5 + $0x30] sm:$0xff] }
 0x472   : > { %1165 = vadd.xlane.f32.xlu1 %v8183_v39  ;;  %v8509_v39 = vpop.permute.xlu0 %2412 }
 0x473   : > { %v2003_v45 = vmul.f32 1.442695, %v1983_v13  ;;  %10165 = vst [vmem:[#allocation11_spill] sm:$0xff] %v8509_v39  ;;  %v10168_v39 = vld [vmem:[#allocation24_spill] sm:$0xff] }
 0x474   : > { %v1937_v57 = vpop.permute.xlu1 %1936  ;;  %6687 = vset.pattern.permute.xlu0 %v9966_v61 }
 0x475   : > { %6872 = vpow2.f32 %v2003_v45  ;;  %v1986_v38 = vsub.f32 %v10164_v16, %v1937_v57  ;;  %v1487_v57 = vmul.f32 %v8451_v42, %v1391_v49  ;;  %v10169_v42 = vld [vmem:[#allocation25_spill] sm:$0xff] }
 0x476   : > { %6874 = vpow2.f32 %v2005_v31  ;;  %v1488_v31 = vmul.f32 %v8344_v19, %v1392_v3 }
 0x477   : > { %v8504_v10 = vpop.eup %6868  ;;  %6876 = vpow2.f32 %v1887_v29  ;;  %v2009_v15 = vmul.f32 1.442695, %v1986_v38  ;;  %v1145_v29 = vmul.f32 %v8223_v35, %v1129_v47 }
 0x478   : > { %v8506_v9 = vpop.eup %6870  ;;  %6169 = vmatprep.mubr.f32.mxu1 %v8504_v10  ;;  %v1932_v58 = vpop.permute.xlu1 %1931 }
 0x479   : > { %v1985_v52 = vsub.f32 %v10166_v50, %v1932_v58  ;;  %6170 = vmatmul.mubr.f32.gmra.mrb[18].mxu1 %v8506_v9  ;;  %v1988_v58 = vsub.f32 %v10168_v39, %v8411_v12 }
 0x47b   : > { %v2007_v13 = vmul.f32 1.442695, %v1985_v52  ;;  %v2013_v3 = vmul.f32 1.442695, %v1988_v58 }
 0x47c   : > { %v8514_v45 = vpop.permute.xlu1 %2367 }
 0x47d   : > { %10167 = vst [vmem:[#allocation86_spill] sm:$0xff] %v8514_v45  ;;  %6878 = vpow2.f32 %v2007_v13  ;;  %v6095_v16 = vpop.f32.mrb[6].mxu1  ;;  %v1164_v61 = vpop.xlane.xlu0 %1163 }
 0x47e   : > { %6880 = vpow2.f32 %v2009_v15  ;;  %v1504_v50 = vadd.f32 %v6095_v16, %v1488_v31  ;;  %v1193_v4 = vadd.f32 %v1164_v61, %v1145_v29  ;;  %v1336_v7 = vpop.f32.mrb[7].mxu1  ;;  %v10172_v31 = vld [vmem:[#allocation27_spill] sm:$0xff] }
 0x47f   : > { %v8520_v38 = vpop.eup %6872  ;;  %v1503_v52 = vadd.f32 %v1487_v57, %v1336_v7 }
 0x480   : > { %v8522_v19 = vpop.eup %6874  ;;  %1520 = vst.msk [vmem:[#allocation5 + $0x38] sm:$0xff] %vm693_vm2, %v1504_v50  ;;  %6172 = vmatprep.mubr.f32.mxu1 %v8520_v38  ;;  %v1942_v35 = vpop.permute.xlu1 %1941  ;;  %v10174_v50 = vld [vmem:[#allocation28_spill] sm:$0xff] }
 0x481   : > { %1210 = vst.msk [vmem:[#allocation4 + $0x10] sm:$0xff] %vm1207_vm3, %v1193_v4  ;;  %v1987_v12 = vsub.f32 %v10169_v42, %v1942_v35  ;;  %6173 = vmatmul.mubr.f32.gmra.mrb[20].mxu1 %v8522_v19  ;;  %v8530_v61 = vpop.eup %6876  ;;  %v10171_v4 = vld [vmem:[#allocation26_spill] sm:$0xff] }
 0x482   : > { %1519 = vst.msk [vmem:[#allocation5 + $0x30] sm:$0xff] %vm693_vm2, %v1503_v52  ;;  %v1990_v47 = vsub.f32 %v10171_v4, %v8418_v36  ;;  %v1992_v36 = vsub.f32 %v10174_v50, %v8422_v26  ;;  %v10177_v26 = vld [vmem:[#allocation30_spill] sm:$0xff] }
 0x483   : > { %v2011_v39 = vmul.f32 1.442695, %v1987_v12  ;;  %2417 = vperm.xlu1 %6684, %v8530_v61   ;;  %v10175_v12 = vld [vmem:[#allocation29_spill] sm:$0xff] }
 0x484   : > { %v8533_v7 = vpop.permute.xlu1 %2377  ;;  %v2017_v57 = vmul.f32 1.442695, %v1990_v47 }
 0x485   : > { %10170 = vst [vmem:[#allocation90_spill] sm:$0xff] %v8533_v7  ;;  %6882 = vpow2.f32 %v2011_v39  ;;  %v2021_v39 = vmul.f32 1.442695, %v1992_v36  ;;  %v10179_v36 = vld [vmem:[#allocation50_spill] sm:$0xff] }
 0x486   : > { %6884 = vpow2.f32 %v2013_v3 }
 0x487   : > { %v8537_v49 = vpop.eup %6878 }
 0x488   : > { %v8539_v15 = vpop.eup %6880  ;;  %6175 = vmatprep.mubr.f32.mxu1 %v8537_v49  ;;  %v1952_v13 = vpop.permute.xlu1 %1951 }
 0x489   : > { %v1989_v29 = vsub.f32 %v10172_v31, %v1952_v13  ;;  %6176 = vmatmul.mubr.f32.gmra.mrb[22].mxu1 %v8539_v15 }
 0x48b   : > { %v2015_v16 = vmul.f32 1.442695, %v1989_v29 }
 0x48c   : > { %v8544_v58 = vpop.permute.xlu1 %2387 }
 0x48d   : > { %10173 = vst [vmem:[#allocation84_spill] sm:$0xff] %v8544_v58  ;;  %6886 = vpow2.f32 %v2015_v16 }
 0x48e   : > { %6888 = vpow2.f32 %v2017_v57  ;;  %v10178_v57 = vld [vmem:[#allocation31_spill] sm:$0xff] }
 0x48f   : > { %v8548_v52 = vpop.eup %6882  ;;  %1175 = vadd.xlane.f32.xlu0 %v8328_v30  ;;  %v1994_v30 = vsub.f32 %v10177_v26, %v8445_v11  ;;  %v8584_v26 = vpop.permute.xlu0 %2422 }
 0x490   : > { %v8551_v35 = vpop.eup %6884  ;;  %6178 = vmatprep.mubr.f32.mxu1 %v8548_v52  ;;  %v1962_v42 = vpop.permute.xlu1 %1961  ;;  %10182 = vst [vmem:[#allocation12_spill] sm:$0xff] %v8584_v26 }
 0x491   : > { %v1991_v3 = vsub.f32 %v10175_v12, %v1962_v42  ;;  %6179 = vmatmul.mubr.f32.gmra.mrb[24].mxu1 %v8551_v35  ;;  %v10180_v42 = vld [vmem:[#allocation52_spill] sm:$0xff]  ;;  %v10181_v12 = vld [vmem:[#allocation85_spill] sm:$0xff] }
 0x493   : > { %v2019_v4 = vmul.f32 1.442695, %v1991_v3  ;;  %1179 = vadd.xlane.f32.xlu0 %v8405_v8  ;;  %v2025_v8 = vmul.f32 1.442695, %v1994_v30  ;;  %v1863_v3 = vsub.f32 %v10181_v12, %v10137_v0  ;;  %v1131_v30 = vld [vmem:[#allocation4 + $0x20] sm:$0xff] }
 0x494   : > { %v8557_v47 = vpop.permute.xlu1 %2397 }
 0x495   : > { %10176 = vst [vmem:[#allocation79_spill] sm:$0xff] %v8557_v47  ;;  %6890 = vpow2.f32 %v2019_v4  ;;  %v1891_v4 = vmul.f32 1.442695, %v1863_v3 }
 0x496   : > { %6892 = vpow2.f32 %v2021_v39 }
 0x497   : > { %v8561_v13 = vpop.eup %6886  ;;  %1183 = vadd.xlane.f32.xlu0 %v8464_v14 }
 0x498   : > { %v8564_v31 = vpop.eup %6888  ;;  %6181 = vmatprep.mubr.f32.mxu1 %v8561_v13  ;;  %v1972_v29 = vpop.permute.xlu1 %1971 }
 0x499   : > { %v1993_v16 = vsub.f32 %v10178_v57, %v1972_v29  ;;  %6182 = vmatmul.mubr.f32.gmra.mrb[26].mxu1 %v8564_v31  ;;  %v1147_v29 = vmul.f32 %v8275_v62, %v1131_v30  ;;  %v1394_v57 = vld [vmem:[#allocation5 + $0x48] sm:$0xff]  ;;  %v1127_v62 = vld [vmem:[#allocation4] sm:$0xff] }
 0x49a   : > { %v1490_v0 = vmul.f32 %v8358_v54, %v1394_v57  ;;  %v10183_v54 = vld [vmem:[#allocation70_spill] sm:$0xff] }
 0x49b   : > { %v2023_v50 = vmul.f32 1.442695, %v1993_v16  ;;  %1187 = vadd.xlane.f32.xlu0 %v8475_v53  ;;  %v1143_v30 = vmul.f32 %v10183_v54, %v1127_v62 }
 0x49d   : > { %6894 = vpow2.f32 %v2023_v50 }
 0x49e   : > { %6896 = vpow2.f32 %v2025_v8  ;;  %v1393_v8 = vld [vmem:[#allocation5 + $0x40] sm:$0xff] }
 0x49f   : > { %v8570_v11 = vpop.eup %6890  ;;  %2858 = vmax.xlane.f32.xlu0 %v10179_v36  ;;  %6898 = vpow2.f32 %v1891_v4 }
 0x4a0   : > { %v8573_v14 = vpop.eup %6892  ;;  %6184 = vmatprep.mubr.f32.mxu1 %v8570_v11 }
 0x4a1   : > { %6185 = vmatmul.mubr.f32.gmra.mrb[28].mxu1 %v8573_v14 }
 0x4a3   : > { %2862 = vmax.xlane.f32.xlu0 %v10180_v42 }
 0x4a7   : > { %v8580_v39 = vpop.eup %6894  ;;  %1169 = vadd.xlane.f32.xlu1 %v8197_v2  ;;  %v1489_v2 = vmul.f32 %v8462_v28, %v1393_v8  ;;  %v10184_v28 = vld [vmem:[#allocation88_spill] sm:$0xff] }
 0x4a8   : > { %v6897_v53 = vpop.eup %6896  ;;  %6187 = vmatprep.mubr.f32.mxu1 %v8580_v39 }
 0x4a9   : > { %6188 = vmatmul.mubr.f32.gmra.mrb[30].mxu1 %v6897_v53  ;;  %v8590_v47 = vpop.eup %6898 }
 0x4b2   : > { %v1168_v16 = vpop.xlane.xlu0 %1167 }
 0x4b3   : > { %v1195_v50 = vadd.f32 %v1168_v16, %v1147_v29  ;;  %v1865_v16 = vsub.f32 %v10184_v28, %v10140_v5 }
 0x4b5   : > { %1212 = vst.msk [vmem:[#allocation4 + $0x20] sm:$0xff] %vm1207_vm3, %v1195_v50  ;;  %v1895_v8 = vmul.f32 1.442695, %v1865_v16  ;;  %v1133_v50 = vld [vmem:[#allocation4 + $0x30] sm:$0xff] }
 0x4b6   : > { %v6098_v12 = vpop.f32.mrb[8].mxu1 }
 0x4b7   : > { %v1506_v3 = vadd.f32 %v6098_v12, %v1490_v0  ;;  %v1346_v4 = vpop.f32.mrb[9].mxu1  ;;  %6900 = vpow2.f32 %v1895_v8  ;;  %v1149_v0 = vmul.f32 %v8283_v32, %v1133_v50  ;;  %v1398_v8 = vld [vmem:[#allocation5 + $0x68] sm:$0xff]  ;;  %v1141_v50 = vld [vmem:[#allocation4 + $0x70] sm:$0xff] }
 0x4b8   : > { %v1505_v58 = vadd.f32 %v1489_v2, %v1346_v4  ;;  %2427 = vperm.xlu1 %6684, %v8590_v47   ;;  %v10186_v4 = vmov 2  }
 0x4b9   : > { %1522 = vst.msk [vmem:[#allocation5 + $0x48] sm:$0xff] %vm693_vm2, %v1506_v3  ;;  %2935 = vperm.xlu0 %6687, %v8123_v56  }
 0x4ba   : > { %1521 = vst.msk [vmem:[#allocation5 + $0x40] sm:$0xff] %vm693_vm2, %v1505_v58  ;;  %v8604_v58 = vpop.permute.xlu0 %2432 }
 0x4bb   : > { %10185 = vst [vmem:[#allocation13_spill] sm:$0xff] %v8604_v58 }
 0x4c1   : > { %v8610_v5 = vpop.eup %6900 }
 0x4ca   : > { %v1160_v29 = vpop.xlane.xlu1 %1159 }
 0x4cb   : > { %v1191_v57 = vadd.f32 %v1160_v29, %v1143_v30  ;;  %v1135_v30 = vld [vmem:[#allocation4 + $0x40] sm:$0xff]  ;;  %v1137_v29 = vld [vmem:[#allocation4 + $0x50] sm:$0xff] }
 0x4cd   : > { %1208 = vst.msk [vmem:[#allocation4] sm:$0xff] %vm1207_vm3, %v1191_v57  ;;  %v1153_v57 = vmul.f32 %v8312_v17, %v1137_v29  ;;  %v1157_v17 = vmul.f32 %v8324_v21, %v1141_v50  ;;  %v10193_v50 = vld [vmem:[#allocation8_spill] sm:$0xff] }
 0x4d8   : > { %2061 = vadd.xlane.f32.xlu0 %v8494_v46 }
 0x4dc   : > { %1173 = vadd.xlane.f32.xlu1 %v8261_v51  ;;  %2065 = vadd.xlane.f32.xlu0 %v8506_v9  ;;  %v1396_v51 = vld [vmem:[#allocation5 + $0x58] sm:$0xff]  ;;  %v1395_v9 = vld [vmem:[#allocation5 + $0x50] sm:$0xff] }
 0x4e0   : > { %2063 = vadd.xlane.f32.xlu0 %v8504_v10  ;;  %v1492_v10 = vmul.f32 %v8363_v27, %v1396_v51  ;;  %v1130_v27 = vld [vmem:[#allocation4 + $0x18] sm:$0xff] }
 0x4e4   : > { %2069 = vadd.xlane.f32.xlu0 %v8522_v19  ;;  %v1491_v19 = vmul.f32 %v8469_v33, %v1395_v9  ;;  %v1146_v33 = vmul.f32 %v8084_v24, %v1130_v27  ;;  %v1399_v27 = vld [vmem:[#allocation5 + $0x70] sm:$0xff] }
 0x4e7   : > { %v1172_v2 = vpop.xlane.xlu0 %1171 }
 0x4e8   : > { %v1197_v46 = vadd.f32 %v1172_v2, %v1149_v0  ;;  %2073 = vadd.xlane.f32.xlu0 %v8539_v15  ;;  %v1397_v0 = vld [vmem:[#allocation5 + $0x60] sm:$0xff] }
 0x4e9   : > { %v1493_v51 = vmul.f32 %v8472_v55, %v1397_v0 }
 0x4ea   : > { %1214 = vst.msk [vmem:[#allocation4 + $0x30] sm:$0xff] %vm1207_vm3, %v1197_v46  ;;  %v10190_v46 = vld [vmem:[#allocation53_spill] sm:$0xff] }
 0x4ec   : > { %2077 = vadd.xlane.f32.xlu0 %v8551_v35  ;;  %v8621_v35 = vpop.permute.xlu1 %2407 }
 0x4ed   : > { %2437 = vperm.xlu1 %6684, %v8610_v5   ;;  %10187 = vst [vmem:[#allocation89_spill] sm:$0xff] %v8621_v35 }
 0x4ef   : > { %v6101_v12 = vpop.f32.mrb[10].mxu1 }
 0x4f0   : > { %v1508_v32 = vadd.f32 %v6101_v12, %v1492_v10  ;;  %v1356_v3 = vpop.f32.mrb[11].mxu1  ;;  %2081 = vadd.xlane.f32.xlu0 %v8564_v31  ;;  %v8628_v31 = vpop.permute.xlu0 %2442 }
 0x4f1   : > { %v1507_v15 = vadd.f32 %v1491_v19, %v1356_v3  ;;  %6686 = vset.pattern.permute.xlu1 %v10186_v4  ;;  %10188 = vst [vmem:[#allocation14_spill] sm:$0xff] %v8628_v31  ;;  %v1400_v3 = vld [vmem:[#allocation5 + $0x78] sm:$0xff] }
 0x4f2   : > { %1524 = vst.msk [vmem:[#allocation5 + $0x58] sm:$0xff] %vm693_vm2, %v1508_v32  ;;  %v1496_v55 = vmul.f32 %v8393_v43, %v1400_v3 }
 0x4f3   : > { %1523 = vst.msk [vmem:[#allocation5 + $0x50] sm:$0xff] %vm693_vm2, %v1507_v15 }
 0x4f4   : > { %2085 = vadd.xlane.f32.xlu0 %v8573_v14  ;;  %v1151_v14 = vmul.f32 %v8297_v41, %v1135_v30  ;;  %v8657_v30 = vld [vmem:[#allocation3 + $0x78] sm:$0xff] }
 0x4f8   : > { %2089 = vadd.xlane.f32.xlu0 %v6897_v53 }
 0x4ff   : > { %v1166_v62 = vpop.xlane.xlu1 %1165 }
 0x500   : > { %v1194_v54 = vadd.f32 %v1166_v62, %v1146_v33  ;;  %v1495_v62 = vmul.f32 %v8482_v25, %v1399_v27 }
 0x502   : > { %1211 = vst.msk [vmem:[#allocation4 + $0x18] sm:$0xff] %vm1207_vm3, %v1194_v54 }
 0x503   : > { %v8652_v33 = vpop.permute.xlu1 %2417 }
 0x504   : > { %10191 = vst [vmem:[#allocation17_spill] sm:$0xff] %v8652_v33  ;;  %v10206_v33 = vld [vmem:[#allocation101_spill] sm:$0xff] }
 0x509   : > { %v2030_v27 = vld [vmem:[#allocation4 + $0x18] sm:$0xff] }
 0x50e   : > { %2980 = vperm.xlu0 %6687, %v8435_v48  }
 0x511   : > { %1177 = vadd.xlane.f32.xlu1 %v8331_v40  ;;  %v1139_v40 = vld [vmem:[#allocation4 + $0x60] sm:$0xff] }
 0x515   : > { %1181 = vadd.xlane.f32.xlu1 %v8407_v23  ;;  %v10189_v23 = vld [vmem:[#allocation51_spill] sm:$0xff] }
 0x519   : > { %1185 = vadd.xlane.f32.xlu1 %v8466_v1  ;;  %v1155_v1 = vmul.f32 %v8321_v34, %v1139_v40 }
 0x51c   : > { %v1176_v53 = vpop.xlane.xlu0 %1175 }
 0x51d   : > { %v1199_v24 = vadd.f32 %v1176_v53, %v1151_v14  ;;  %1189 = vadd.xlane.f32.xlu1 %v8477_v18  ;;  %v1494_v18 = vmul.f32 %v8379_v63, %v1398_v8  ;;  %v8646_v63 = vld [vmem:[#allocation3 + $0x68] sm:$0xff] }
 0x51e   : > { %v1132_v53 = vld [vmem:[#allocation4 + $0x28] sm:$0xff] }
 0x51f   : > { %1216 = vst.msk [vmem:[#allocation4 + $0x40] sm:$0xff] %vm1207_vm3, %v1199_v24  ;;  %v1148_v43 = vmul.f32 %v8149_v6, %v1132_v53 }
 0x520   : > { %v1180_v28 = vpop.xlane.xlu0 %1179 }
 0x521   : > { %v1201_v16 = vadd.f32 %v1180_v28, %v1153_v57  ;;  %2856 = vmax.xlane.f32.xlu1 %v10189_v23 }
 0x523   : > { %1218 = vst.msk [vmem:[#allocation4 + $0x50] sm:$0xff] %vm1207_vm3, %v1201_v16 }
 0x524   : > { %v1184_v41 = vpop.xlane.xlu0 %1183 }
 0x525   : > { %v1203_v2 = vadd.f32 %v1184_v41, %v1155_v1  ;;  %2860 = vmax.xlane.f32.xlu1 %v10190_v46  ;;  %v10192_v41 = vld [vmem:[#allocation97_spill] sm:$0xff] }
 0x527   : > { %1220 = vst.msk [vmem:[#allocation4 + $0x60] sm:$0xff] %vm1207_vm3, %v1203_v2 }
 0x528   : > { %v6104_v9 = vpop.f32.mrb[12].mxu1  ;;  %v1188_v10 = vpop.xlane.xlu0 %1187 }
 0x529   : > { %v1510_v19 = vadd.f32 %v6104_v9, %v1494_v18  ;;  %v1205_v12 = vadd.f32 %v1188_v10, %v1157_v17  ;;  %v1366_v34 = vpop.f32.mrb[13].mxu1  ;;  %v2028_v9 = vld [vmem:[#allocation4 + $0x8] sm:$0xff] }
 0x52a   : > { %v1509_v32 = vadd.f32 %v1493_v51, %v1366_v34 }
 0x52b   : > { %1526 = vst.msk [vmem:[#allocation5 + $0x68] sm:$0xff] %vm693_vm2, %v1510_v19 }
 0x52c   : > { %1222 = vst.msk [vmem:[#allocation4 + $0x70] sm:$0xff] %vm1207_vm3, %v1205_v12  ;;  %v2859_v15 = vpop.xlane.xlu0 %2858  ;;  %v10195_v12 = vld [vmem:[#allocation103_spill] sm:$0xff] }
 0x52d   : > { %1525 = vst.msk [vmem:[#allocation5 + $0x60] sm:$0xff] %vm693_vm2, %v1509_v32  ;;  %v8649_v21 = vmax.f32 %v8646_v63, %v2859_v15  ;;  %v2044_v34 = vmul.f32 %v10195_v12, %v2028_v9  ;;  %v1134_v15 = vld [vmem:[#allocation4 + $0x38] sm:$0xff]  ;;  %v10198_v12 = vld [vmem:[#allocation40_spill] sm:$0xff] }
 0x52f   : > { %3600 = vst.msk [vmem:[#allocation3 + $0x68] sm:$0xff] %vm3136_vm5, %v8649_v21 }
 0x530   : > { %v6107_v54 = vpop.f32.mrb[14].mxu1  ;;  %v2863_v14 = vpop.xlane.xlu0 %2862 }
 0x531   : > { %v1512_v29 = vadd.f32 %v6107_v54, %v1496_v55  ;;  %v8660_v24 = vmax.f32 %v8657_v30, %v2863_v14  ;;  %v1376_v57 = vpop.f32.mrb[15].mxu1  ;;  %v10197_v14 = vld [vmem:[#allocation104_spill] sm:$0xff] }
 0x532   : > { %v1511_v28 = vadd.f32 %v1495_v62, %v1376_v57  ;;  %v10196_v62 = vld [vmem:[#allocation98_spill] sm:$0xff]  ;;  %v2046_v53 = vmul.f32 %v10197_v14, %v2030_v27  ;;  %v10199_v27 = vld [vmem:[#allocation105_spill] sm:$0xff] }
 0x533   : > { %1528 = vst.msk [vmem:[#allocation5 + $0x78] sm:$0xff] %vm693_vm2, %v1512_v29  ;;  %v1150_v54 = vmul.f32 %v10196_v62, %v1134_v15 }
 0x534   : > { %3602 = vst.msk [vmem:[#allocation3 + $0x78] sm:$0xff] %vm3136_vm5, %v8660_v24  ;;  %v1170_v25 = vpop.xlane.xlu1 %1169 }
 0x535   : > { %1527 = vst.msk [vmem:[#allocation5 + $0x70] sm:$0xff] %vm693_vm2, %v1511_v28  ;;  %v1196_v40 = vadd.f32 %v1170_v25, %v1148_v43  ;;  %v2029_v25 = vld [vmem:[#allocation4 + $0x10] sm:$0xff] }
 0x536   : > { %2930 = vperm.xlu1 %6686, %v8126_v37  }
 0x537   : > { %1213 = vst.msk [vmem:[#allocation4 + $0x28] sm:$0xff] %vm1207_vm3, %v1196_v40 }
 0x538   : > { %v8692_v51 = vpop.permute.xlu0 %2935  ;;  %v8694_v10 = vpop.permute.xlu1 %2427 }
 0x539   : > { %10194 = vst [vmem:[#allocation15_spill] sm:$0xff] %v8694_v10 }
 0x53a   : > { %2940 = vperm.xlu1 %6686, %v8147_v20  }
 0x53e   : > { %2945 = vperm.xlu1 %6686, %v8136_v59  }
 0x542   : > { %2950 = vperm.xlu1 %6686, %v8239_v60  }
 0x543   : > { %v8672_v16 = vpop.f32.mrb[16].mxu1 }
 0x544   : > { %v8674_v1 = vpop.f32.mrb[17].mxu1 }
 0x546   : > { %2955 = vperm.xlu1 %6686, %v8159_v22  }
 0x54a   : > { %2960 = vperm.xlu1 %6686, %v8300_v44  }
 0x54c   : > { %v8678_v6 = vpop.f32.mrb[18].mxu1 }
 0x54d   : > { %v8680_v8 = vpop.f32.mrb[19].mxu1 }
 0x54e   : > { %2965 = vperm.xlu1 %6686, %v10192_v41  }
 0x552   : > { %2970 = vperm.xlu1 %6686, %v10193_v50  }
 0x554   : > { %v8684_v0 = vpop.f32.mrb[20].mxu1 }
 0x555   : > { %v8686_v2 = vpop.f32.mrb[21].mxu1 }
 0x55c   : > { %v8688_v18 = vpop.f32.mrb[22].mxu1 }
 0x55d   : > { %v8690_v17 = vpop.f32.mrb[23].mxu1 }
 0x564   : > { %v8696_v19 = vpop.f32.mrb[24].mxu1 }
 0x565   : > { %v8699_v32 = vpop.f32.mrb[25].mxu1  ;;  %v2062_v3 = vpop.xlane.xlu0 %2061 }
 0x566   : > { %v2092_v55 = vadd.f32 %v2062_v3, %v2044_v34  ;;  %v2045_v34 = vmul.f32 %v10198_v12, %v2029_v25  ;;  %v10201_v25 = vld [vmem:[#allocation10_spill] sm:$0xff] }
 0x568   : > { %2109 = vst.msk [vmem:[#allocation4 + $0x8] sm:$0xff] %vm2107_vm4, %v2092_v55  ;;  %v2032_v55 = vld [vmem:[#allocation4 + $0x28] sm:$0xff] }
 0x569   : > { %v1174_v29 = vpop.xlane.xlu1 %1173  ;;  %v2066_v57 = vpop.xlane.xlu0 %2065  ;;  %v2048_v62 = vmul.f32 %v10199_v27, %v2032_v55  ;;  %v10202_v55 = vld [vmem:[#allocation109_spill] sm:$0xff] }
 0x56a   : > { %v1198_v28 = vadd.f32 %v1174_v29, %v1150_v54  ;;  %v2094_v43 = vadd.f32 %v2066_v57, %v2046_v53  ;;  %v10200_v57 = vld [vmem:[#allocation107_spill] sm:$0xff]  ;;  %v1136_v27 = vld [vmem:[#allocation4 + $0x48] sm:$0xff] }
 0x56c   : > { %1215 = vst.msk [vmem:[#allocation4 + $0x38] sm:$0xff] %vm1207_vm3, %v1198_v28  ;;  %v8706_v40 = vpop.f32.mrb[26].mxu1 }
 0x56d   : > { %2111 = vst.msk [vmem:[#allocation4 + $0x18] sm:$0xff] %vm2107_vm4, %v2094_v43  ;;  %v8708_v9 = vpop.f32.mrb[27].mxu1  ;;  %v2064_v3 = vpop.xlane.xlu0 %2063 }
 0x56e   : > { %v2093_v15 = vadd.f32 %v2064_v3, %v2045_v34 }
 0x570   : > { %2110 = vst.msk [vmem:[#allocation4 + $0x10] sm:$0xff] %vm2107_vm4, %v2093_v15  ;;  %v8726_v15 = vpop.permute.xlu1 %2437 }
 0x571   : > { %v2070_v54 = vpop.xlane.xlu0 %2069  ;;  %10203 = vst [vmem:[#allocation87_spill] sm:$0xff] %v8726_v15  ;;  %v1142_v15 = vld [vmem:[#allocation4 + $0x78] sm:$0xff] }
 0x572   : > { %v2096_v14 = vadd.f32 %v2070_v54, %v2048_v62  ;;  %v10204_v62 = vld [vmem:[#allocation99_spill] sm:$0xff] }
 0x573   : > { %v2034_v53 = vld [vmem:[#allocation4 + $0x38] sm:$0xff]  ;;  %v1152_v54 = vmul.f32 %v10204_v62, %v1136_v27  ;;  %v10207_v27 = vld [vmem:[#allocation78_spill] sm:$0xff] }
 0x574   : > { %v8713_v29 = vpop.f32.mrb[28].mxu1  ;;  %v2050_v28 = vmul.f32 %v10200_v57, %v2034_v53  ;;  %2113 = vst.msk [vmem:[#allocation4 + $0x28] sm:$0xff] %vm2107_vm4, %v2096_v14  ;;  %v1138_v53 = vld [vmem:[#allocation4 + $0x58] sm:$0xff] }
 0x575   : > { %v8717_v43 = vpop.f32.mrb[29].mxu1  ;;  %v2074_v31 = vpop.xlane.xlu0 %2073 }
 0x576   : > { %2059 = vadd.xlane.f32.xlu1 %v10201_v25  ;;  %v2098_v12 = vadd.f32 %v2074_v31, %v2050_v28  ;;  %v10205_v25 = vld [vmem:[#allocation100_spill] sm:$0xff] }
 0x577   : > { %v1154_v31 = vmul.f32 %v10205_v25, %v1138_v53 }
 0x578   : > { %2115 = vst.msk [vmem:[#allocation4 + $0x38] sm:$0xff] %vm2107_vm4, %v2098_v12  ;;  %v1140_v12 = vld [vmem:[#allocation4 + $0x68] sm:$0xff] }
 0x579   : > { %v2078_v58 = vpop.xlane.xlu0 %2077  ;;  %v1156_v26 = vmul.f32 %v10206_v33, %v1140_v12  ;;  %v10209_v33 = vld [vmem:[#allocation9_spill] sm:$0xff] }
 0x57a   : > { %v10225_v12 = vld [vmem:[#allocation49_spill] sm:$0xff] }
 0x57c   : > { %v8721_v34 = vpop.f32.mrb[30].mxu1 }
 0x57d   : > { %v8723_v3 = vpop.f32.mrb[31].mxu1 }
 0x587   : > { %2975 = vperm.xlu1 %6686, %v10202_v55  }
 0x59e   : > { %v1178_v14 = vpop.xlane.xlu1 %1177 }
 0x59f   : > { %v1200_v57 = vadd.f32 %v1178_v14, %v1152_v54  ;;  %v10208_v54 = vld [vmem:[#allocation102_spill] sm:$0xff] }
 0x5a0   : > { %v1158_v14 = vmul.f32 %v10208_v54, %v1142_v15 }
 0x5a1   : > { %1217 = vst.msk [vmem:[#allocation4 + $0x48] sm:$0xff] %vm1207_vm3, %v1200_v57  ;;  %v2082_v57 = vpop.xlane.xlu0 %2081 }
 0x5a2   : > { %v1182_v28 = vpop.xlane.xlu1 %1181 }
 0x5a3   : > { %v1202_v10 = vadd.f32 %v1182_v28, %v1154_v31 }
 0x5a5   : > { %1219 = vst.msk [vmem:[#allocation4 + $0x58] sm:$0xff] %vm1207_vm3, %v1202_v10 }
 0x5a6   : > { %v1186_v35 = vpop.xlane.xlu1 %1185 }
 0x5a7   : > { %v1204_v7 = vadd.f32 %v1186_v35, %v1156_v26  ;;  %v8740_v26 = vld [vmem:[#allocation3 + $0x60] sm:$0xff] }
 0x5a8   : > { %v2036_v45 = vld [vmem:[#allocation4 + $0x48] sm:$0xff] }
 0x5a9   : > { %v2052_v62 = vmul.f32 %v10207_v27, %v2036_v45  ;;  %1221 = vst.msk [vmem:[#allocation4 + $0x68] sm:$0xff] %vm1207_vm3, %v1204_v7 }
 0x5aa   : > { %v1190_v53 = vpop.xlane.xlu1 %1189 }
 0x5ab   : > { %v2100_v25 = vadd.f32 %v2078_v58, %v2052_v62  ;;  %v1206_v4 = vadd.f32 %v1190_v53, %v1158_v14  ;;  %2067 = vadd.xlane.f32.xlu1 %v8520_v38  ;;  %v2086_v58 = vpop.xlane.xlu0 %2085  ;;  %v10210_v38 = vld [vmem:[#allocation77_spill] sm:$0xff]  ;;  %v10211_v14 = vld [vmem:[#allocation83_spill] sm:$0xff] }
 0x5ac   : > { %v2038_v31 = vld [vmem:[#allocation4 + $0x58] sm:$0xff] }
 0x5ad   : > { %2117 = vst.msk [vmem:[#allocation4 + $0x48] sm:$0xff] %vm2107_vm4, %v2100_v25  ;;  %v2054_v10 = vmul.f32 %v10209_v33, %v2038_v31 }
 0x5ae   : > { %1223 = vst.msk [vmem:[#allocation4 + $0x78] sm:$0xff] %vm1207_vm3, %v1206_v4  ;;  %v2857_v45 = vpop.xlane.xlu1 %2856  ;;  %v8753_v4 = vld [vmem:[#allocation3 + $0x70] sm:$0xff] }
 0x5af   : > { %v2102_v35 = vadd.f32 %v2082_v57, %v2054_v10  ;;  %v8743_v7 = vmax.f32 %v8740_v26, %v2857_v45  ;;  %2071 = vadd.xlane.f32.xlu1 %v8537_v49  ;;  %v2090_v25 = vpop.xlane.xlu0 %2089  ;;  %v10212_v10 = vld [vmem:[#allocation35_spill] sm:$0xff] }
 0x5b0   : > { %v2040_v15 = vld [vmem:[#allocation4 + $0x68] sm:$0xff] }
 0x5b1   : > { %2119 = vst.msk [vmem:[#allocation4 + $0x58] sm:$0xff] %vm2107_vm4, %v2102_v35  ;;  %v2056_v28 = vmul.f32 %v10210_v38, %v2040_v15  ;;  %2990 = vperm.xlu0 %6687, %v8743_v7  }
 0x5b2   : > { %3599 = vst.msk [vmem:[#allocation3 + $0x60] sm:$0xff] %vm3136_vm5, %v8743_v7  ;;  %v2861_v27 = vpop.xlane.xlu1 %2860 }
 0x5b3   : > { %v2104_v62 = vadd.f32 %v2086_v58, %v2056_v28  ;;  %v8756_v49 = vmax.f32 %v8753_v4, %v2861_v27  ;;  %2075 = vadd.xlane.f32.xlu1 %v8548_v52  ;;  %v10213_v28 = vld [vmem:[#allocation38_spill] sm:$0xff]  ;;  %v2981_v53 = vpop.permute.xlu0 %2980 }
 0x5b5   : > { %v2042_v54 = vld [vmem:[#allocation4 + $0x78] sm:$0xff]  ;;  %2121 = vst.msk [vmem:[#allocation4 + $0x68] sm:$0xff] %vm2107_vm4, %v2104_v62  ;;  %3000 = vperm.xlu0 %6687, %v8756_v49  }
 0x5b6   : > { %v2058_v57 = vmul.f32 %v10211_v14, %v2042_v54  ;;  %3601 = vst.msk [vmem:[#allocation3 + $0x70] sm:$0xff] %vm3136_vm5, %v8756_v49  ;;  %v2931_v31 = vpop.permute.xlu1 %2930  ;;  %v10214_v14 = vld [vmem:[#allocation37_spill] sm:$0xff] }
 0x5b7   : > { %v3008_v45 = vsub.f32 %v10212_v10, %v2931_v31  ;;  %2079 = vadd.xlane.f32.xlu1 %v8561_v13  ;;  %v10215_v31 = vld [vmem:[#allocation41_spill] sm:$0xff] }
 0x5b8   : > { %v2106_v33 = vadd.f32 %v2090_v25, %v2058_v57 }
 0x5b9   : > { %v3024_v52 = vmul.f32 1.442695, %v3008_v45  ;;  %v10216_v45 = vld [vmem:[#allocation39_spill] sm:$0xff] }
 0x5ba   : > { %2123 = vst.msk [vmem:[#allocation4 + $0x78] sm:$0xff] %vm2107_vm4, %v2106_v33  ;;  %v2941_v35 = vpop.permute.xlu1 %2940 }
 0x5bb   : > { %6902 = vpow2.f32 %v3024_v52  ;;  %2083 = vadd.xlane.f32.xlu1 %v8570_v11  ;;  %v3010_v27 = vsub.f32 %v10213_v28, %v2941_v35 }
 0x5bd   : > { %v3028_v54 = vmul.f32 1.442695, %v3010_v27 }
 0x5be   : > { %v2946_v58 = vpop.permute.xlu1 %2945 }
 0x5bf   : > { %2087 = vadd.xlane.f32.xlu1 %v8580_v39  ;;  %v3011_v57 = vsub.f32 %v10214_v14, %v2946_v58  ;;  %6904 = vpow2.f32 %v3028_v54  ;;  %v10217_v39 = vld [vmem:[#allocation44_spill] sm:$0xff] }
 0x5c1   : > { %v3030_v25 = vmul.f32 1.442695, %v3011_v57  ;;  %v10222_v57 = vld [vmem:[#allocation42_spill] sm:$0xff] }
 0x5c2   : > { %v2951_v15 = vpop.permute.xlu1 %2950 }
 0x5c3   : > { %6906 = vpow2.f32 %v3030_v25  ;;  %v3012_v25 = vsub.f32 %v10222_v57, %v2951_v15 }
 0x5c5   : > { %v6903_v38 = vpop.eup %6902 }
 0x5c6   : > { %6248 = vmatprep.mubr.f32.mxu1 %v6903_v38  ;;  %v2956_v62 = vpop.permute.xlu1 %2955 }
 0x5c7   : > { %v3013_v33 = vsub.f32 %v10215_v31, %v2956_v62  ;;  %v3032_v31 = vmul.f32 1.442695, %v3012_v25 }
 0x5c9   : > { %v3034_v11 = vmul.f32 1.442695, %v3013_v33  ;;  %v8777_v28 = vpop.eup %6904  ;;  %v10223_v33 = vld [vmem:[#allocation45_spill] sm:$0xff] }
 0x5ca   : > { %v2961_v13 = vpop.permute.xlu1 %2960 }
 0x5cb   : > { %6908 = vpow2.f32 %v3034_v11 }
 0x5cd   : > { %v8781_v58 = vpop.eup %6906 }
 0x5ce   : > { %v2966_v10 = vpop.permute.xlu1 %2965  ;;  %10218 = vst [vmem:[#allocation16_spill] sm:$0xff] %v8781_v58 }
 0x5cf   : > { %v3015_v52 = vsub.f32 %v10217_v39, %v2966_v10  ;;  %v3014_v10 = vsub.f32 %v10223_v33, %v2961_v13  ;;  %v10226_v13 = vld [vmem:[#allocation36_spill] sm:$0xff] }
 0x5d0   : > { %2985 = vperm.xlu1 %6686, %v10216_v45  }
 0x5d1   : > { %v3038_v35 = vmul.f32 1.442695, %v3015_v52  ;;  %v3036_v39 = vmul.f32 1.442695, %v3014_v10  ;;  %v10224_v52 = vld [vmem:[#allocation47_spill] sm:$0xff] }
 0x5d2   : > { %v2971_v11 = vpop.permute.xlu1 %2970 }
 0x5d3   : > { %6910 = vpow2.f32 %v3038_v35  ;;  %v3016_v35 = vsub.f32 %v10224_v52, %v2971_v11 }
 0x5d4   : > { %2995 = vperm.xlu1 %6686, %v8649_v21   ;;  %3088 = vadd.xlane.f32.xlu0 %v6903_v38  ;;  %v10221_v38 = vld [vmem:[#allocation34_spill] sm:$0xff] }
 0x5d5   : > { %v8784_v27 = vpop.eup %6908  ;;  %v3009_v54 = vsub.f32 %v10221_v38, %v8692_v51  ;;  %v2027_v38 = vld [vmem:[#allocation4] sm:$0xff] }
 0x5d6   : > { %10219 = vst [vmem:[#allocation18_spill] sm:$0xff] %v8784_v27 }
 0x5d7   : > { %v3026_v14 = vmul.f32 1.442695, %v3009_v54  ;;  %v2043_v54 = vmul.f32 %v10226_v13, %v2027_v38 }
 0x5d8   : > { %3005 = vperm.xlu1 %6686, %v8660_v24   ;;  %3092 = vadd.xlane.f32.xlu0 %v8777_v28 }
 0x5d9   : > { %6912 = vpow2.f32 %v3026_v14 }
 0x5da   : > { %6914 = vpow2.f32 %v3032_v31 }
 0x5db   : > { %6916 = vpow2.f32 %v3036_v39 }
 0x5dc   : > { %3094 = vadd.xlane.f32.xlu0 %v8781_v58 }
 0x5dd   : > { %v8787_v62 = vpop.eup %6910 }
 0x5de   : > { %10220 = vst [vmem:[#allocation19_spill] sm:$0xff] %v8787_v62 }
 0x5e0   : > { %3098 = vadd.xlane.f32.xlu0 %v8784_v27  ;;  %v3018_v27 = vsub.f32 %v10225_v12, %v2981_v53 }
 0x5e2   : > { %v3044_v51 = vmul.f32 1.442695, %v3018_v27 }
 0x5e3   : > { %v8796_v58 = vpop.eup %6912 }
 0x5e4   : > { %3102 = vadd.xlane.f32.xlu0 %v8787_v62  ;;  %v3040_v62 = vmul.f32 1.442695, %v3016_v35  ;;  %v8799_v15 = vpop.eup %6914 }
 0x5e5   : > { %v8803_v14 = vpop.eup %6916 }
 0x5e6   : > { %6918 = vpow2.f32 %v3040_v62  ;;  %v10227_v62 = vld [vmem:[#allocation46_spill] sm:$0xff] }
 0x5e7   : > { %6920 = vpow2.f32 %v3044_v51  ;;  %v2031_v51 = vld [vmem:[#allocation4 + $0x20] sm:$0xff] }
 0x5f0   : > { %v8807_v53 = vpop.eup %6918 }
 0x5f1   : > { %v8811_v33 = vpop.eup %6920 }
 0x5f2   : > { %10228 = vst [vmem:[#allocation20_spill] sm:$0xff] %v8811_v33 }
 0x5fc   : > { %3090 = vadd.xlane.f32.xlu1 %v8796_v58 }
 0x600   : > { %3096 = vadd.xlane.f32.xlu1 %v8799_v15 }
 0x603   : > { %v2060_v57 = vpop.xlane.xlu1 %2059 }
 0x604   : > { %v2091_v12 = vadd.f32 %v2060_v57, %v2043_v54  ;;  %3100 = vadd.xlane.f32.xlu1 %v8803_v14  ;;  %v10230_v54 = vld [vmem:[#allocation73_spill] sm:$0xff] }
 0x605   : > { %v2047_v57 = vmul.f32 %v10230_v54, %v2031_v51  ;;  %v2039_v54 = vld [vmem:[#allocation4 + $0x60] sm:$0xff] }
 0x606   : > { %2108 = vst.msk [vmem:[#allocation4] sm:$0xff] %vm2107_vm4, %v2091_v12 }
 0x607   : > { %v2976_v27 = vpop.permute.xlu1 %2975 }
 0x608   : > { %v3017_v25 = vsub.f32 %v10227_v62, %v2976_v27  ;;  %3104 = vadd.xlane.f32.xlu1 %v8807_v53  ;;  %v2033_v27 = vld [vmem:[#allocation4 + $0x30] sm:$0xff] }
 0x60a   : > { %v3042_v31 = vmul.f32 1.442695, %v3017_v25  ;;  %v10231_v25 = vld [vmem:[#allocation71_spill] sm:$0xff] }
 0x60c   : > { %6922 = vpow2.f32 %v3042_v31  ;;  %3108 = vadd.xlane.f32.xlu1 %v8811_v33  ;;  %v2049_v31 = vmul.f32 %v10231_v25, %v2033_v27  ;;  %v2041_v27 = vld [vmem:[#allocation4 + $0x70] sm:$0xff] }
 0x60d   : > { %v2057_v25 = vmul.f32 %v8610_v5, %v2041_v27  ;;  %v10236_v5 = vld [vmem:[#allocation93_spill] sm:$0xff] }
 0x616   : > { %v8814_v10 = vpop.eup %6922 }
 0x617   : > { %10229 = vst [vmem:[#allocation82_spill] sm:$0xff] %v8814_v10  ;;  %3106 = vadd.xlane.f32.xlu0 %v8814_v10  ;;  %v2035_v10 = vld [vmem:[#allocation4 + $0x40] sm:$0xff] }
 0x630   : > { %v2991_v11 = vpop.permute.xlu0 %2990 }
 0x631   : > { %v3020_v39 = vsub.f32 %v10189_v23, %v2991_v11 }
 0x633   : > { %v3048_v52 = vmul.f32 1.442695, %v3020_v39  ;;  %v10232_v39 = vld [vmem:[#allocation76_spill] sm:$0xff] }
 0x634   : > { %v3001_v35 = vpop.permute.xlu0 %3000 }
 0x635   : > { %6924 = vpow2.f32 %v3048_v52  ;;  %v3022_v38 = vsub.f32 %v10190_v46, %v3001_v35  ;;  %v2051_v46 = vmul.f32 %v10232_v39, %v2035_v10  ;;  %v2037_v35 = vld [vmem:[#allocation4 + $0x50] sm:$0xff]  ;;  %v2055_v10 = vmul.f32 %v8590_v47, %v2039_v54 }
 0x637   : > { %v3052_v13 = vmul.f32 1.442695, %v3022_v38 }
 0x638   : > { %v2068_v12 = vpop.xlane.xlu1 %2067 }
 0x639   : > { %6926 = vpow2.f32 %v3052_v13  ;;  %v2095_v62 = vadd.f32 %v2068_v12, %v2047_v57  ;;  %v2053_v13 = vmul.f32 %v8530_v61, %v2037_v35 }
 0x63b   : > { %2112 = vst.msk [vmem:[#allocation4 + $0x20] sm:$0xff] %vm2107_vm4, %v2095_v62 }
 0x63c   : > { %v2072_v33 = vpop.xlane.xlu1 %2071 }
 0x63d   : > { %v2097_v23 = vadd.f32 %v2072_v33, %v2049_v31  ;;  %v10233_v31 = vld [vmem:[#allocation92_spill] sm:$0xff] }
 0x63e   : > { %v2880_v61 = vsub.f32 %v10233_v31, %v8126_v37  ;;  %v2883_v37 = vsub.f32 %v10236_v5, %v8136_v59 }
 0x63f   : > { %v8822_v11 = vpop.eup %6924  ;;  %2114 = vst.msk [vmem:[#allocation4 + $0x30] sm:$0xff] %vm2107_vm4, %v2097_v23 }
 0x640   : > { %3112 = vadd.xlane.f32.xlu1 %v8822_v11  ;;  %v2076_v52 = vpop.xlane.xlu1 %2075  ;;  %v2896_v35 = vmul.f32 1.442695, %v2880_v61  ;;  %v10237_v61 = vld [vmem:[#allocation95_spill] sm:$0xff] }
 0x641   : > { %v2099_v51 = vadd.f32 %v2076_v52, %v2051_v46  ;;  %v3153_v46 = vld [vmem:[%s7288_s22] sm:$0xff]  ;;  %v3154_v52 = vld [vmem:[%s7288_s22 + $0x8] sm:$0xff] }
 0x642   : > { %6928 = vpow2.f32 %v2896_v35 }
 0x643   : > { %v8827_v38 = vpop.eup %6926  ;;  %2116 = vst.msk [vmem:[#allocation4 + $0x40] sm:$0xff] %vm2107_vm4, %v2099_v51  ;;  %v10234_v51 = vld [vmem:[#allocation94_spill] sm:$0xff] }
 0x644   : > { %3116 = vadd.xlane.f32.xlu1 %v8827_v38  ;;  %v2080_v33 = vpop.xlane.xlu1 %2079  ;;  %v2882_v47 = vsub.f32 %v10234_v51, %v8147_v20  ;;  %v2902_v20 = vmul.f32 1.442695, %v2883_v37 }
 0x645   : > { %v2101_v57 = vadd.f32 %v2080_v33, %v2053_v13  ;;  %v10235_v33 = vld [vmem:[#allocation48_spill] sm:$0xff] }
 0x647   : > { %2118 = vst.msk [vmem:[#allocation4 + $0x50] sm:$0xff] %vm2107_vm4, %v2101_v57  ;;  %v8844_v57 = vpack.i.bf16 %v3154_v52, %v3153_v46  ;;  %v10238_v52 = vld [vmem:[#allocation96_spill] sm:$0xff] }
 0x648   : > { %v2084_v12 = vpop.xlane.xlu1 %2083  ;;  %v2887_v35 = vsub.f32 %v10238_v52, %v10192_v41 }
 0x649   : > { %v2103_v62 = vadd.f32 %v2084_v12, %v2055_v10  ;;  %v2900_v12 = vmul.f32 1.442695, %v2882_v47 }
 0x64b   : > { %2120 = vst.msk [vmem:[#allocation4 + $0x60] sm:$0xff] %vm2107_vm4, %v2103_v62 }
 0x64c   : > { %v2088_v23 = vpop.xlane.xlu1 %2087  ;;  %v8856_v51 = vpop.eup %6928 }
 0x64d   : > { %v2105_v39 = vadd.f32 %v2088_v23, %v2057_v25  ;;  %v2885_v23 = vsub.f32 %v10237_v61, %v8159_v22  ;;  %v2910_v22 = vmul.f32 1.442695, %v2887_v35  ;;  %v3061_v61 = vld [vmem:[#allocation4 + $0x28] sm:$0xff]  ;;  %v3063_v35 = vld [vmem:[#allocation4 + $0x38] sm:$0xff] }
 0x64f   : > { %2122 = vst.msk [vmem:[#allocation4 + $0x70] sm:$0xff] %vm2107_vm4, %v2105_v39  ;;  %v2906_v59 = vmul.f32 1.442695, %v2885_v23 }
 0x650   : > { %v2986_v13 = vpop.permute.xlu1 %2985 }
 0x651   : > { %v3019_v54 = vsub.f32 %v10235_v33, %v2986_v13 }
 0x653   : > { %v3046_v10 = vmul.f32 1.442695, %v3019_v54 }
 0x654   : > { %v2996_v27 = vpop.permute.xlu1 %2995 }
 0x655   : > { %6930 = vpow2.f32 %v3046_v10  ;;  %v3021_v62 = vsub.f32 %v10179_v36, %v2996_v27  ;;  %6689 = vrot.lane.b32.xlu1 %v8844_v57, %s7151_s16  ;;  %v3056_v36 = vld [vmem:[#allocation4] sm:$0xff] }
 0x656   : > { %6932 = vpow2.f32 %v2900_v12  ;;  %v3072_v13 = vmul.f32 %v8856_v51, %v3056_v36  ;;  %v3059_v12 = vld [vmem:[#allocation4 + $0x18] sm:$0xff] }
 0x657   : > { %v3050_v25 = vmul.f32 1.442695, %v3021_v62 }
 0x658   : > { %v3006_v31 = vpop.permute.xlu1 %3005 }
 0x659   : > { %6934 = vpow2.f32 %v3050_v25  ;;  %v3023_v39 = vsub.f32 %v10180_v42, %v3006_v31  ;;  %v3058_v42 = vld [vmem:[#allocation4 + $0x10] sm:$0xff] }
 0x65a   : > { %6936 = vpow2.f32 %v2902_v20 }
 0x65b   : > { %v3054_v46 = vmul.f32 1.442695, %v3023_v39 }
 0x65d   : > { %6938 = vpow2.f32 %v3054_v46  ;;  %v10239_v46 = vld [vmem:[#allocation61_spill] sm:$0xff] }
 0x65e   : > { %6940 = vpow2.f32 %v2906_v59 }
 0x65f   : > { %v8858_v47 = vpop.eup %6930  ;;  %6942 = vpow2.f32 %v2910_v22  ;;  %v10240_v22 = vld [vmem:[#allocation60_spill] sm:$0xff] }
 0x660   : > { %3110 = vadd.xlane.f32.xlu0 %v8858_v47  ;;  %v8862_v54 = vpop.eup %6932 }
 0x661   : > { %v3089_v33 = vpop.xlane.xlu0 %3088  ;;  %v3074_v41 = vmul.f32 %v8862_v54, %v3058_v42 }
 0x662   : > { %v3120_v10 = vadd.f32 %v3089_v33, %v3072_v13 }
 0x663   : > { %v8864_v5 = vpop.eup %6934 }
 0x664   : > { %3137 = vst.msk [vmem:[#allocation4] sm:$0xff] %vm3136_vm5, %v3120_v10  ;;  %3114 = vadd.xlane.f32.xlu0 %v8864_v5  ;;  %v8869_v27 = vpop.eup %6936 }
 0x665   : > { %v3093_v37 = vpop.xlane.xlu0 %3092  ;;  %v3075_v20 = vmul.f32 %v8869_v27, %v3059_v12 }
 0x666   : > { %v3122_v62 = vadd.f32 %v3093_v37, %v3074_v41  ;;  %v10241_v41 = vld [vmem:[#allocation63_spill] sm:$0xff] }
 0x667   : > { %v8871_v25 = vpop.eup %6938  ;;  %v10242_v37 = vld [vmem:[#allocation91_spill] sm:$0xff] }
 0x668   : > { %3139 = vst.msk [vmem:[#allocation4 + $0x10] sm:$0xff] %vm3136_vm5, %v3122_v62  ;;  %3118 = vadd.xlane.f32.xlu0 %v8871_v25  ;;  %v8876_v39 = vpop.eup %6940  ;;  %v2881_v12 = vsub.f32 %v10242_v37, %v8123_v56  ;;  %v10243_v62 = vld [vmem:[#allocation62_spill] sm:$0xff] }
 0x669   : > { %v3095_v31 = vpop.xlane.xlu0 %3094  ;;  %v3077_v59 = vmul.f32 %v8876_v39, %v3061_v61  ;;  %v8881_v13 = vpop.eup %6942 }
 0x66a   : > { %v3123_v23 = vadd.f32 %v3095_v31, %v3075_v20  ;;  %v3079_v33 = vmul.f32 %v8881_v13, %v3063_v35  ;;  %v2898_v20 = vmul.f32 1.442695, %v2881_v12  ;;  %v10244_v31 = vld [vmem:[#allocation106_spill] sm:$0xff]  ;;  %v10251_v12 = vld [vmem:[#allocation64_spill] sm:$0xff] }
 0x66b   : > { %v2884_v61 = vsub.f32 %v10244_v31, %v8239_v60  ;;  %v10252_v31 = vld [vmem:[#allocation74_spill] sm:$0xff] }
 0x66c   : > { %3140 = vst.msk [vmem:[#allocation4 + $0x18] sm:$0xff] %vm3136_vm5, %v3123_v23  ;;  %3873 = vmax.xlane.f32.xlu0 %v10239_v46  ;;  %v10245_v23 = vld [vmem:[#allocation55_spill] sm:$0xff]  ;;  %6944 = vpow2.f32 %v2898_v20 }
 0x66d   : > { %v3099_v52 = vpop.xlane.xlu0 %3098  ;;  %v2904_v35 = vmul.f32 1.442695, %v2884_v61  ;;  %v3057_v61 = vld [vmem:[#allocation4 + $0x8] sm:$0xff] }
 0x66e   : > { %v3125_v36 = vadd.f32 %v3099_v52, %v3077_v59  ;;  %v10246_v59 = vld [vmem:[#allocation65_spill] sm:$0xff]  ;;  %v9976_v52 = vmov 3  }
 0x66f   : > { %6744 = vset.pattern.permute.xlu1 %v9976_v52  ;;  %6743 = vset.pattern.permute.xlu0 %v9976_v52  ;;  %6946 = vpow2.f32 %v2904_v35  ;;  %v3155_v52 = vld [vmem:[%s7288_s22 + $0x10] sm:$0xff] }
 0x670   : > { %3142 = vst.msk [vmem:[#allocation4 + $0x28] sm:$0xff] %vm3136_vm5, %v3125_v36  ;;  %3875 = vmax.xlane.f32.xlu0 %v10240_v22  ;;  %v10247_v36 = vld [vmem:[#allocation32_spill] sm:$0xff]  ;;  %v3166_v22 = vld [vmem:[%s7288_s22 + $0x68] sm:$0xff] }
 0x671   : > { %v3103_v42 = vpop.xlane.xlu0 %3102  ;;  %v2886_v56 = vsub.f32 %v10247_v36, %v8300_v44  ;;  %v2890_v44 = vsub.f32 %v10252_v31, %v8435_v48  ;;  %v3159_v48 = vld [vmem:[%s7288_s22 + $0x30] sm:$0xff]  ;;  %v3160_v31 = vld [vmem:[%s7288_s22 + $0x38] sm:$0xff] }
 0x672   : > { %v3127_v10 = vadd.f32 %v3103_v42, %v3079_v33  ;;  %v10248_v33 = vld [vmem:[#allocation58_spill] sm:$0xff] }
 0x673   : > { %v10249_v42 = vld [vmem:[#allocation54_spill] sm:$0xff]  ;;  %v2908_v60 = vmul.f32 1.442695, %v2886_v56 }
 0x674   : > { %3144 = vst.msk [vmem:[#allocation4 + $0x38] sm:$0xff] %vm3136_vm5, %v3127_v10  ;;  %3877 = vmax.xlane.f32.xlu0 %v10241_v41  ;;  %v10250_v10 = vld [vmem:[#allocation43_spill] sm:$0xff]  ;;  %v3165_v41 = vld [vmem:[%s7288_s22 + $0x60] sm:$0xff] }
 0x675   : > { %v2888_v37 = vsub.f32 %v10250_v10, %v10193_v50  ;;  %6948 = vpow2.f32 %v2908_v60  ;;  %v2916_v50 = vmul.f32 1.442695, %v2890_v44  ;;  %v3060_v10 = vld [vmem:[#allocation4 + $0x20] sm:$0xff]  ;;  %v3062_v44 = vld [vmem:[#allocation4 + $0x30] sm:$0xff] }
 0x676   : > { %v8906_v36 = vpop.eup %6944 }
 0x677   : > { %v2912_v20 = vmul.f32 1.442695, %v2888_v37  ;;  %v3073_v35 = vmul.f32 %v8906_v36, %v3057_v61 }
 0x678   : > { %3879 = vmax.xlane.f32.xlu0 %v10243_v62  ;;  %v10254_v62 = vld [vmem:[#allocation67_spill] sm:$0xff] }
 0x679   : > { %3861 = vmax.xlane.f32.xlu1 %v10245_v23  ;;  %6950 = vpow2.f32 %v2912_v20 }
 0x67a   : > { %6952 = vpow2.f32 %v2916_v50  ;;  %v10256_v50 = vld [vmem:[#allocation56_spill] sm:$0xff] }
 0x67c   : > { %3881 = vmax.xlane.f32.xlu0 %v10246_v59  ;;  %v10253_v59 = vld [vmem:[#allocation57_spill] sm:$0xff] }
 0x67d   : > { %3871 = vmax.xlane.f32.xlu1 %v10248_v33  ;;  %v3156_v33 = vld [vmem:[%s7288_s22 + $0x18] sm:$0xff] }
 0x67e   : > { %v8912_v37 = vpack.i.bf16 %v3156_v33, %v3155_v52  ;;  %v8923_v52 = vpack.i.bf16 %v3160_v31, %v3159_v48 }
 0x680   : > { %3863 = vmax.xlane.f32.xlu0 %v10249_v42 }
 0x684   : > { %3883 = vmax.xlane.f32.xlu0 %v10251_v12  ;;  %v8914_v12 = vpop.eup %6946 }
 0x685   : > { %v8925_v33 = vpop.eup %6948 }
 0x686   : > { %v8938_v31 = vpop.eup %6950 }
 0x688   : > { %3865 = vmax.xlane.f32.xlu0 %v10253_v59  ;;  %v3076_v59 = vmul.f32 %v8914_v12, %v3060_v10 }
 0x689   : > { %v3091_v56 = vpop.xlane.xlu1 %3090 }
 0x68a   : > { %v3121_v60 = vadd.f32 %v3091_v56, %v3073_v35  ;;  %v3161_v35 = vld [vmem:[%s7288_s22 + $0x40] sm:$0xff]  ;;  %v3162_v56 = vld [vmem:[%s7288_s22 + $0x48] sm:$0xff] }
 0x68b   : > { %v8936_v48 = vpack.i.bf16 %v3162_v56, %v3161_v35  ;;  %v8947_v35 = vpack.i.bf16 %v3166_v22, %v3165_v41  ;;  %v8949_v56 = vpop.eup %6952  ;;  %v10259_v22 = vld [vmem:[#allocation69_spill] sm:$0xff]  ;;  %v3157_v41 = vld [vmem:[%s7288_s22 + $0x20] sm:$0xff] }
 0x68c   : > { %3138 = vst.msk [vmem:[#allocation4 + $0x8] sm:$0xff] %vm3136_vm5, %v3121_v60  ;;  %3885 = vmax.xlane.f32.xlu0 %v10254_v62  ;;  %v10255_v60 = vld [vmem:[#allocation108_spill] sm:$0xff] }
 0x68d   : > { %v3097_v20 = vpop.xlane.xlu1 %3096  ;;  %v2889_v62 = vsub.f32 %v10255_v60, %v10202_v55  ;;  %v10257_v55 = vld [vmem:[#allocation66_spill] sm:$0xff] }
 0x68e   : > { %v3124_v61 = vadd.f32 %v3097_v20, %v3076_v59  ;;  %6694 = vrot.lane.b32.xlu1 %v8912_v37, %s7151_s16  ;;  %v3078_v59 = vmul.f32 %v8925_v33, %v3062_v44  ;;  %v3064_v20 = vld [vmem:[#allocation4 + $0x40] sm:$0xff]  ;;  %v3066_v60 = vld [vmem:[#allocation4 + $0x50] sm:$0xff] }
 0x68f   : > { %v2914_v23 = vmul.f32 1.442695, %v2889_v62  ;;  %v10258_v62 = vld [vmem:[#allocation59_spill] sm:$0xff] }
 0x690   : > { %3141 = vst.msk [vmem:[#allocation4 + $0x20] sm:$0xff] %vm3136_vm5, %v3124_v61  ;;  %3867 = vmax.xlane.f32.xlu0 %v10256_v50  ;;  %v3080_v61 = vmul.f32 %v8938_v31, %v3064_v20 }
 0x691   : > { %v3101_v10 = vpop.xlane.xlu1 %3100  ;;  %6954 = vpow2.f32 %v2914_v23  ;;  %v3158_v23 = vld [vmem:[%s7288_s22 + $0x28] sm:$0xff] }
 0x692   : > { %v3126_v42 = vadd.f32 %v3101_v10, %v3078_v59  ;;  %6704 = vrot.lane.b32.xlu1 %v8923_v52, %s7151_s16 }
 0x694   : > { %3143 = vst.msk [vmem:[#allocation4 + $0x30] sm:$0xff] %vm3136_vm5, %v3126_v42  ;;  %3887 = vmax.xlane.f32.xlu0 %v10257_v55  ;;  %v3082_v42 = vmul.f32 %v8949_v56, %v3066_v60  ;;  %v6698_v60 = vpack.i.bf16 %v3158_v23, %v3157_v41  ;;  %v3164_v55 = vld [vmem:[%s7288_s22 + $0x58] sm:$0xff]  ;;  %v10261_v23 = vsub.f32 %v8740_v26, %v8743_v7  ;;  %v3070_v26 = vld [vmem:[#allocation4 + $0x70] sm:$0xff] }
 0x695   : > { %v3105_v44 = vpop.xlane.xlu1 %3104 }
 0x696   : > { %v3128_v59 = vadd.f32 %v3105_v44, %v3080_v61  ;;  %6709 = vrot.lane.b32.xlu1 %v8936_v48, %s7151_s16  ;;  %v10260_v61 = vld [vmem:[#allocation68_spill] sm:$0xff]  ;;  %v3065_v44 = vld [vmem:[#allocation4 + $0x48] sm:$0xff] }
 0x698   : > { %3145 = vst.msk [vmem:[#allocation4 + $0x40] sm:$0xff] %vm3136_vm5, %v3128_v59  ;;  %3869 = vmax.xlane.f32.xlu0 %v10258_v62 }
 0x699   : > { %v3109_v10 = vpop.xlane.xlu1 %3108 }
 0x69a   : > { %v3130_v20 = vadd.f32 %v3109_v10, %v3082_v42  ;;  %6719 = vrot.lane.b32.xlu1 %v8947_v35, %s7151_s16 }
 0x69b   : > { %v8963_v59 = vpop.eup %6954 }
 0x69c   : > { %3147 = vst.msk [vmem:[#allocation4 + $0x50] sm:$0xff] %vm3136_vm5, %v3130_v20  ;;  %3889 = vmax.xlane.f32.xlu0 %v10259_v22  ;;  %v3081_v42 = vmul.f32 %v8963_v59, %v3065_v44  ;;  %v3163_v22 = vld [vmem:[%s7288_s22 + $0x50] sm:$0xff]  ;;  %v2920_v44 = vmul.f32 1.442695, %v10261_v23 }
 0x69d   : > { %v8971_v62 = vpack.i.bf16 %v3164_v55, %v3163_v22  ;;  %v3068_v22 = vld [vmem:[#allocation4 + $0x60] sm:$0xff] }
 0x69e   : > { %6729 = vrot.lane.b32.xlu1 %v8844_v57, %s7152_s17  ;;  %v3167_v57 = vld [vmem:[%s7288_s22 + $0x70] sm:$0xff]  ;;  %6956 = vpow2.f32 %v2920_v44 }
 0x6a0   : > { %3891 = vmax.xlane.f32.xlu0 %v10260_v61  ;;  %v3168_v61 = vld [vmem:[%s7288_s22 + $0x78] sm:$0xff] }
 0x6a1   : > { %v8977_v41 = vpack.i.bf16 %v3168_v61, %v3167_v57 }
 0x6a2   : > { %6739 = vrot.lane.b32.xlu1 %v6698_v60, %s7152_s17 }
 0x6a4   : > { %v3107_v10 = vpop.xlane.xlu0 %3106 }
 0x6a5   : > { %v3129_v20 = vadd.f32 %v3107_v10, %v3081_v42 }
 0x6a7   : > { %3146 = vst.msk [vmem:[#allocation4 + $0x48] sm:$0xff] %vm3136_vm5, %v3129_v20 }
 0x6a8   : > { %v8989_v42 = vpop.eup %6956 }
 0x6a9   : > { %v3084_v61 = vmul.f32 %v8989_v42, %v3068_v22 }
 0x6b6   : > { %6699 = vrot.lane.b32.xlu0 %v6698_v60, %s7151_s16  ;;  %v10262_v60 = vsub.f32 %v8753_v4, %v8756_v49 }
 0x6b8   : > { %v2924_v55 = vmul.f32 1.442695, %v10262_v60 }
 0x6ba   : > { %6714 = vrot.lane.b32.xlu0 %v8971_v62, %s7151_s16  ;;  %6958 = vpow2.f32 %v2924_v55  ;;  %v10263_v55 = vld [vmem:[#allocation33_spill] sm:$0xff] }
 0x6bb   : > { %v2891_v22 = vsub.f32 %v10263_v55, %v10216_v45  ;;  %v3071_v55 = vld [vmem:[#allocation4 + $0x78] sm:$0xff] }
 0x6be   : > { %6724 = vrot.lane.b32.xlu0 %v8977_v41, %s7151_s16 }
 0x6c2   : > { %6734 = vrot.lane.b32.xlu0 %v8912_v37, %s7152_s17 }
 0x6c4   : > { %v8992_v20 = vpop.eup %6958 }
 0x6c5   : > { %v3086_v57 = vmul.f32 %v8992_v20, %v3070_v26  ;;  %v2895_v26 = vsub.f32 %v8657_v30, %v8660_v24 }
 0x6cd   : > { %v3113_v10 = vpop.xlane.xlu1 %3112 }
 0x6ce   : > { %v3132_v7 = vadd.f32 %v3113_v10, %v3084_v61  ;;  %v2918_v61 = vmul.f32 1.442695, %v2891_v22  ;;  %v2893_v10 = vsub.f32 %v8646_v63, %v8649_v21 }
 0x6d0   : > { %3149 = vst.msk [vmem:[#allocation4 + $0x60] sm:$0xff] %vm3136_vm5, %v3132_v7  ;;  %6960 = vpow2.f32 %v2918_v61  ;;  %v2922_v7 = vmul.f32 1.442695, %v2893_v10 }
 0x6d1   : > { %v3117_v4 = vpop.xlane.xlu1 %3116 }
 0x6d2   : > { %v3134_v49 = vadd.f32 %v3117_v4, %v3086_v57  ;;  %6962 = vpow2.f32 %v2922_v7  ;;  %v2926_v57 = vmul.f32 1.442695, %v2895_v26  ;;  %v3067_v4 = vld [vmem:[#allocation4 + $0x58] sm:$0xff]  ;;  %v9015_v7 = vld [vmem:[#allocation3 + $0x30] sm:$0xff] }
 0x6d3   : > { %10264 = vst [vmem:[#allocation21_spill] sm:$0xff] %v9015_v7 }
 0x6d4   : > { %3151 = vst.msk [vmem:[#allocation4 + $0x70] sm:$0xff] %vm3136_vm5, %v3134_v49  ;;  %6964 = vpow2.f32 %v2926_v57 }
 0x6d5   : > { %v6690_v37 = vpop.permute.xlu1 %6689 }
 0x6d6   : > { %v6692_v23 = vunpack.i.h.bf16 %v6690_v37  ;;  %v6691_v44 = vunpack.i.l.bf16 %v6690_v37 }
 0x6d8   : > { %v6458_v60 = vpack.c.bf16 %v6692_v23, %v6691_v44  ;;  %v3069_v23 = vld [vmem:[#allocation4 + $0x68] sm:$0xff] }
 0x6da   : > { %6459 = vmatprep.subr.bf16.mxu1 %v6458_v60  ;;  %v9003_v49 = vpop.eup %6960 }
 0x6db   : > { %6461 = vmatpush3.bf16.msra.mxu1 %v6458_v60  ;;  %v3083_v37 = vmul.f32 %v9003_v49, %v3067_v4 }
 0x6dc   : > { %v9006_v60 = vpop.eup %6962 }
 0x6dd   : > { %v3085_v63 = vmul.f32 %v9006_v60, %v3069_v23 }
 0x6de   : > { %v9010_v24 = vpop.eup %6964 }
 0x6df   : > { %v3087_v22 = vmul.f32 %v9010_v24, %v3071_v55 }
 0x6ed   : > { %v3111_v45 = vpop.xlane.xlu0 %3110 }
 0x6ee   : > { %v3131_v44 = vadd.f32 %v3111_v45, %v3083_v37  ;;  %v9025_v37 = vld [vmem:[#allocation3 + $0x38] sm:$0xff] }
 0x6ef   : > { %10266 = vst [vmem:[#allocation23_spill] sm:$0xff] %v9025_v37 }
 0x6f0   : > { %3148 = vst.msk [vmem:[#allocation4 + $0x58] sm:$0xff] %vm3136_vm5, %v3131_v44  ;;  %v9073_v44 = vld [vmem:[#allocation3 + $0x28] sm:$0xff] }
 0x6f1   : > { %v3115_v21 = vpop.xlane.xlu0 %3114  ;;  %10270 = vst [vmem:[#allocation27_spill] sm:$0xff] %v9073_v44 }
 0x6f2   : > { %v3133_v30 = vadd.f32 %v3115_v21, %v3085_v63  ;;  %v9035_v63 = vld [vmem:[#allocation3 + $0x40] sm:$0xff] }
 0x6f4   : > { %3150 = vst.msk [vmem:[#allocation4 + $0x68] sm:$0xff] %vm3136_vm5, %v3133_v30 }
 0x6f5   : > { %v3119_v61 = vpop.xlane.xlu0 %3118 }
 0x6f6   : > { %v3135_v10 = vadd.f32 %v3119_v61, %v3087_v22  ;;  %v9047_v22 = vld [vmem:[#allocation3 + $0x48] sm:$0xff] }
 0x6f7   : > { %10268 = vst [vmem:[#allocation25_spill] sm:$0xff] %v9047_v22 }
 0x6f8   : > { %3152 = vst.msk [vmem:[#allocation4 + $0x78] sm:$0xff] %vm3136_vm5, %v3135_v10 }
 0x6f9   : > { %v3874_v26 = vpop.xlane.xlu0 %3873 }
 0x6fa   : > { %v9018_v57 = vmax.f32 %v9015_v7, %v3874_v26  ;;  %v9052_v26 = vld [vmem:[#allocation3] sm:$0xff] }
 0x6fc   : > { %10265 = vst [vmem:[#allocation22_spill] sm:$0xff] %v9018_v57  ;;  %4622 = vst.msk [vmem:[#allocation3 + $0x30] sm:$0xff] %vm4165_vm6, %v9018_v57  ;;  %3989 = vperm.xlu0 %6743, %v9018_v57  }
 0x6fd   : > { %v3876_v45 = vpop.xlane.xlu0 %3875 }
 0x6fe   : > { %v9028_v23 = vmax.f32 %v9025_v37, %v3876_v45 }
 0x700   : > { %10267 = vst [vmem:[#allocation24_spill] sm:$0xff] %v9028_v23  ;;  %4623 = vst.msk [vmem:[#allocation3 + $0x38] sm:$0xff] %vm4165_vm6, %v9028_v23  ;;  %3994 = vperm.xlu1 %6744, %v9028_v23  }
 0x701   : > { %v3878_v21 = vpop.xlane.xlu0 %3877 }
 0x702   : > { %v9038_v55 = vmax.f32 %v9035_v63, %v3878_v21 }
 0x704   : > { %4624 = vst.msk [vmem:[#allocation3 + $0x40] sm:$0xff] %vm4165_vm6, %v9038_v55  ;;  %6746 = vrot.lane.b32.xlu1 %v8923_v52, %s7152_s17  ;;  %3999 = vperm.xlu0 %6743, %v9038_v55  }
 0x705   : > { %v3880_v61 = vpop.xlane.xlu0 %3879 }
 0x706   : > { %v9050_v10 = vmax.f32 %v9047_v22, %v3880_v61  ;;  %v3862_v45 = vpop.xlane.xlu1 %3861  ;;  %v9068_v61 = vld [vmem:[#allocation3 + $0x50] sm:$0xff] }
 0x707   : > { %v9055_v21 = vmax.f32 %v9052_v26, %v3862_v45 }
 0x708   : > { %10269 = vst [vmem:[#allocation26_spill] sm:$0xff] %v9050_v10  ;;  %4625 = vst.msk [vmem:[#allocation3 + $0x48] sm:$0xff] %vm4165_vm6, %v9050_v10  ;;  %4004 = vperm.xlu1 %6744, %v9050_v10   ;;  %6751 = vrot.lane.b32.xlu0 %v8936_v48, %s7152_s17 }
 0x709   : > { %4616 = vst.msk [vmem:[#allocation3] sm:$0xff] %vm4165_vm6, %v9055_v21  ;;  %v3882_v45 = vpop.xlane.xlu0 %3881 }
 0x70a   : > { %v9071_v4 = vmax.f32 %v9068_v61, %v3882_v45  ;;  %v3872_v30 = vpop.xlane.xlu1 %3871 }
 0x70b   : > { %v9076_v10 = vmax.f32 %v9073_v44, %v3872_v30  ;;  %v9089_v30 = vld [vmem:[#allocation3 + $0x8] sm:$0xff] }
 0x70c   : > { %4626 = vst.msk [vmem:[#allocation3 + $0x50] sm:$0xff] %vm4165_vm6, %v9071_v4  ;;  %3959 = vperm.xlu1 %6744, %v9055_v21   ;;  %2479 = vrot.lane.b32.xlu0 %v8672_v16, %s7157_s30  ;;  %v9102_v16 = vld [vmem:[#allocation3 + $0x58] sm:$0xff] }
 0x70d   : > { %4621 = vst.msk [vmem:[#allocation3 + $0x28] sm:$0xff] %vm4165_vm6, %v9076_v10  ;;  %v3864_v52 = vpop.xlane.xlu0 %3863  ;;  %10271 = vst [vmem:[#allocation28_spill] sm:$0xff] %v9102_v16 }
 0x70e   : > { %v9092_v48 = vmax.f32 %v9089_v30, %v3864_v52  ;;  %v6695_v22 = vpop.permute.xlu1 %6694 }
 0x70f   : > { %v6697_v23 = vunpack.i.h.bf16 %v6695_v22  ;;  %v6696_v37 = vunpack.i.l.bf16 %v6695_v22 }
 0x710   : > { %4617 = vst.msk [vmem:[#allocation3 + $0x8] sm:$0xff] %vm4165_vm6, %v9092_v48  ;;  %2477 = vrot.lane.b32.xlu1 %v8674_v1, %s7157_s30  ;;  %2483 = vrot.lane.b32.xlu0 %v8678_v6, %s7157_s30  ;;  %v9117_v1 = vld [vmem:[#allocation3 + $0x10] sm:$0xff] }
 0x711   : > { %v3884_v45 = vpop.xlane.xlu0 %3883  ;;  %v6462_v52 = vpack.c.bf16 %v6697_v23, %v6696_v37 }
 0x712   : > { %v9105_v7 = vmax.f32 %v9102_v16, %v3884_v45  ;;  %v9107_v22 = vpop.permute.xlu1 %6704 }
 0x713   : > { %6463 = vmatprep.subr.bf16.mxu1 %v6462_v52 }
 0x714   : > { %10272 = vst [vmem:[#allocation29_spill] sm:$0xff] %v9105_v7  ;;  %4627 = vst.msk [vmem:[#allocation3 + $0x58] sm:$0xff] %vm4165_vm6, %v9105_v7  ;;  %2481 = vrot.lane.b32.xlu1 %v8680_v8, %s7157_s30  ;;  %2487 = vrot.lane.b32.xlu0 %v8684_v0, %s7157_s30  ;;  %v9132_v8 = vld [vmem:[#allocation3 + $0x60] sm:$0xff] }
 0x715   : > { %v3866_v6 = vpop.xlane.xlu0 %3865  ;;  %6465 = vmatpush3.bf16.msra.mxu1 %v6462_v52  ;;  %10273 = vst [vmem:[#allocation30_spill] sm:$0xff] %v9132_v8 }
 0x716   : > { %v9120_v37 = vmax.f32 %v9117_v1, %v3866_v6  ;;  %v9122_v23 = vpop.permute.xlu1 %6709 }
 0x718   : > { %4618 = vst.msk [vmem:[#allocation3 + $0x10] sm:$0xff] %vm4165_vm6, %v9120_v37  ;;  %2485 = vrot.lane.b32.xlu1 %v8686_v2, %s7157_s30  ;;  %2491 = vrot.lane.b32.xlu0 %v8688_v18, %s7157_s30  ;;  %v9147_v2 = vld [vmem:[#allocation3 + $0x18] sm:$0xff] }
 0x719   : > { %v3886_v0 = vpop.xlane.xlu0 %3885 }
 0x71a   : > { %v9135_v52 = vmax.f32 %v9132_v8, %v3886_v0  ;;  %v9137_v6 = vpop.permute.xlu1 %6719 }
 0x71c   : > { %10274 = vst [vmem:[#allocation31_spill] sm:$0xff] %v9135_v52  ;;  %4628 = vst.msk [vmem:[#allocation3 + $0x60] sm:$0xff] %vm4165_vm6, %v9135_v52  ;;  %2489 = vrot.lane.b32.xlu1 %v8690_v17, %s7157_s30  ;;  %2495 = vrot.lane.b32.xlu0 %v8696_v19, %s7157_s30  ;;  %v9160_v17 = vld [vmem:[#allocation3 + $0x68] sm:$0xff] }
 0x71d   : > { %v3868_v18 = vpop.xlane.xlu0 %3867  ;;  %10276 = vst [vmem:[#allocation52_spill] sm:$0xff] %v9160_v17 }
 0x71e   : > { %v9150_v0 = vmax.f32 %v9147_v2, %v3868_v18  ;;  %v6730_v45 = vpop.permute.xlu1 %6729 }
 0x71f   : > { %v6732_v16 = vunpack.i.h.bf16 %v6730_v45  ;;  %v6731_v44 = vunpack.i.l.bf16 %v6730_v45 }
 0x720   : > { %10275 = vst [vmem:[#allocation50_spill] sm:$0xff] %v9150_v0  ;;  %4619 = vst.msk [vmem:[#allocation3 + $0x18] sm:$0xff] %vm4165_vm6, %v9150_v0  ;;  %2493 = vrot.lane.b32.xlu1 %v8699_v32, %s7157_s30  ;;  %2499 = vrot.lane.b32.xlu0 %v8706_v40, %s7157_s30  ;;  %v9176_v32 = vld [vmem:[#allocation3 + $0x20] sm:$0xff] }
 0x721   : > { %v3888_v19 = vpop.xlane.xlu0 %3887  ;;  %v9162_v18 = vpack.c.bf16 %v6732_v16, %v6731_v44  ;;  %10278 = vst [vmem:[#allocation70_spill] sm:$0xff] %v9176_v32  ;;  %v6706_v16 = vunpack.i.l.bf16 %v9107_v22 }
 0x722   : > { %v9165_v8 = vmax.f32 %v9160_v17, %v3888_v19 }
 0x723   : > { %6491 = vmatprep.subr.bf16.mxu0 %v9162_v18 }
 0x724   : > { %10277 = vst [vmem:[#allocation85_spill] sm:$0xff] %v9165_v8  ;;  %4629 = vst.msk [vmem:[#allocation3 + $0x68] sm:$0xff] %vm4165_vm6, %v9165_v8  ;;  %2497 = vrot.lane.b32.xlu1 %v8708_v9, %s7157_s30  ;;  %2503 = vrot.lane.b32.xlu0 %v8713_v29, %s7157_s30  ;;  %v9190_v9 = vld [vmem:[#allocation3 + $0x70] sm:$0xff] }
 0x725   : > { %v3870_v40 = vpop.xlane.xlu0 %3869  ;;  %6493 = vmatpush3.bf16.msra.mxu0 %v9162_v18  ;;  %10279 = vst [vmem:[#allocation88_spill] sm:$0xff] %v9190_v9 }
 0x726   : > { %v9180_v44 = vmax.f32 %v9176_v32, %v3870_v40 }
 0x728   : > { %4620 = vst.msk [vmem:[#allocation3 + $0x20] sm:$0xff] %vm4165_vm6, %v9180_v44  ;;  %2501 = vrot.lane.b32.xlu1 %v8717_v43, %s7157_s30  ;;  %2507 = vrot.lane.b32.xlu0 %v8721_v34, %s7157_s30  ;;  %v9202_v43 = vld [vmem:[#allocation3 + $0x78] sm:$0xff] }
 0x729   : > { %v3890_v29 = vpop.xlane.xlu0 %3889  ;;  %10280 = vst [vmem:[#allocation51_spill] sm:$0xff] %v9202_v43 }
 0x72a   : > { %v9193_v19 = vmax.f32 %v9190_v9, %v3890_v29  ;;  %v6712_v29 = vunpack.i.h.bf16 %v9122_v23 }
 0x72c   : > { %4630 = vst.msk [vmem:[#allocation3 + $0x70] sm:$0xff] %vm4165_vm6, %v9193_v19  ;;  %2505 = vrot.lane.b32.xlu1 %v8723_v3, %s7157_s30  ;;  %4009 = vperm.xlu0 %6743, %v9071_v4   ;;  %v6707_v3 = vunpack.i.h.bf16 %v9107_v22 }
 0x72d   : > { %v3892_v34 = vpop.xlane.xlu0 %3891 }
 0x72e   : > { %v9205_v45 = vmax.f32 %v9202_v43, %v3892_v34  ;;  %v6711_v43 = vunpack.i.l.bf16 %v9122_v23  ;;  %v6470_v9 = vpack.c.bf16 %v6707_v3, %v6706_v16  ;;  %v6740_v23 = vpop.permute.xlu1 %6739 }
 0x730   : > { %4631 = vst.msk [vmem:[#allocation3 + $0x78] sm:$0xff] %vm4165_vm6, %v9205_v45  ;;  %3964 = vperm.xlu1 %6744, %v9092_v48   ;;  %4014 = vperm.xlu0 %6743, %v9105_v7   ;;  %v6474_v7 = vpack.c.bf16 %v6712_v29, %v6711_v43 }
 0x731   : > { %v6700_v40 = vpop.permute.xlu0 %6699 }
 0x732   : > { %v6702_v57 = vunpack.i.h.bf16 %v6700_v40  ;;  %v6701_v17 = vunpack.i.l.bf16 %v6700_v40 }
 0x734   : > { %6756 = vrot.lane.b32.xlu1 %v8971_v62, %s7152_s17  ;;  %3969 = vperm.xlu0 %6743, %v9120_v37   ;;  %v6466_v34 = vpack.c.bf16 %v6702_v57, %v6701_v17  ;;  %v6722_v57 = vunpack.i.h.bf16 %v9137_v6  ;;  %v6721_v17 = vunpack.i.l.bf16 %v9137_v6 }
 0x735   : > { %v6715_v32 = vpop.permute.xlu0 %6714 }
 0x736   : > { %6467 = vmatprep.subr.bf16.mxu1 %v6466_v34  ;;  %v6717_v22 = vunpack.i.h.bf16 %v6715_v32  ;;  %v6716_v40 = vunpack.i.l.bf16 %v6715_v32  ;;  %v6482_v29 = vpack.c.bf16 %v6722_v57, %v6721_v17 }
 0x737   : > { %6469 = vmatpush3.bf16.msra.mxu1 %v6466_v34  ;;  %v6742_v34 = vunpack.i.h.bf16 %v6740_v23 }
 0x738   : > { %4019 = vperm.xlu1 %6744, %v9135_v52   ;;  %3974 = vperm.xlu0 %6743, %v9150_v0   ;;  %v6478_v16 = vpack.c.bf16 %v6717_v22, %v6716_v40  ;;  %v6741_v52 = vunpack.i.l.bf16 %v6740_v23 }
 0x739   : > { %6471 = vmatprep.subr.bf16.mxu1 %v6470_v9  ;;  %v6725_v62 = vpop.permute.xlu0 %6724 }
 0x73a   : > { %v6726_v43 = vunpack.i.l.bf16 %v6725_v62 }
 0x73b   : > { %6473 = vmatpush3.bf16.msra.mxu1 %v6470_v9 }
 0x73c   : > { %4024 = vperm.xlu1 %6744, %v9165_v8   ;;  %6761 = vrot.lane.b32.xlu0 %v8947_v35, %s7152_s17  ;;  %v6727_v35 = vunpack.i.h.bf16 %v6725_v62  ;;  %v6498_v8 = vpack.c.bf16 %v6742_v34, %v6741_v52  ;;  %v10291_v62 = vld [vmem:[#allocation72_spill] sm:$0xff] }
 0x73d   : > { %6475 = vmatprep.subr.bf16.mxu1 %v6474_v7  ;;  %v6735_v3 = vpop.permute.xlu0 %6734 }
 0x73e   : > { %v6737_v0 = vunpack.i.h.bf16 %v6735_v3  ;;  %v6736_v32 = vunpack.i.l.bf16 %v6735_v3  ;;  %v6486_v6 = vpack.c.bf16 %v6727_v35, %v6726_v43  ;;  %v10293_v43 = vld [vmem:[#allocation81_spill] sm:$0xff] }
 0x73f   : > { %6477 = vmatpush3.bf16.msra.mxu1 %v6474_v7  ;;  %v10281_v7 = vmov 2  }
 0x740   : > { %3979 = vperm.xlu1 %6744, %v9180_v44   ;;  %4029 = vperm.xlu0 %6743, %v9193_v19   ;;  %v6494_v9 = vpack.c.bf16 %v6737_v0, %v6736_v32  ;;  %v2349_v0 = vld [vmem:[#allocation5] sm:$0xff]  ;;  %v2351_v32 = vld [vmem:[#allocation5 + $0x10] sm:$0xff] }
 0x741   : > { %6479 = vmatprep.subr.bf16.mxu1 %v6478_v16 }
 0x742   : > { %6495 = vmatprep.subr.bf16.mxu0 %v6494_v9 }
 0x743   : > { %6481 = vmatpush3.bf16.msra.mxu1 %v6478_v16  ;;  %6497 = vmatpush3.bf16.msra.mxu0 %v6494_v9  ;;  %v2354_v16 = vld [vmem:[#allocation5 + $0x28] sm:$0xff] }
 0x744   : > { %3984 = vperm.xlu1 %6744, %v9076_v10   ;;  %4034 = vperm.xlu0 %6743, %v9205_v45  }
 0x745   : > { %6483 = vmatprep.subr.bf16.mxu1 %v6482_v29  ;;  %6499 = vmatprep.subr.bf16.mxu0 %v6498_v8 }
 0x747   : > { %6485 = vmatpush3.bf16.msra.mxu1 %v6482_v29  ;;  %6501 = vmatpush3.bf16.msra.mxu0 %v6498_v8  ;;  %v2450_v29 = vmul.f32 %v10293_v43, %v2354_v16  ;;  %v2359_v16 = vld [vmem:[#allocation5 + $0x50] sm:$0xff] }
 0x748   : > { %6766 = vrot.lane.b32.xlu1 %v8977_v41, %s7152_s17  ;;  %6770 = vset.pattern.permute.xlu0 %v10281_v7  ;;  %v10288_v41 = vld [vmem:[#allocation75_spill] sm:$0xff] }
 0x749   : > { %3396 = vperm.xlu0 %6770, %v8856_v51   ;;  %6487 = vmatprep.subr.bf16.mxu1 %v6486_v6  ;;  %v10282_v51 = vld [vmem:[#allocation16_spill] sm:$0xff] }
 0x74a   : > { %6771 = vset.pattern.permute.xlu1 %v10281_v7 }
 0x74b   : > { %6489 = vmatpush3.bf16.msra.mxu1 %v6486_v6 }
 0x74c   : > { %3401 = vperm.xlu1 %6771, %v8906_v36   ;;  %6534 = vmatprep.subr.bf16.mxu1 %v9162_v18 }
 0x74d   : > { %3411 = vperm.xlu0 %6770, %v8869_v27  }
 0x74e   : > { %6249 = vmatmul.mubr.f32.vlgmr.msra.gmra.mrb[32].mxu1 %v8796_v58  ;;  %v10283_v58 = vld [vmem:[#allocation18_spill] sm:$0xff] }
 0x74f   : > { %6251 = vmatprep.mubr.f32.mxu1 %v8777_v28  ;;  %6542 = vmatpush3.bf16.msra.mxu1 %v9162_v18  ;;  %v10284_v28 = vld [vmem:[#allocation19_spill] sm:$0xff]  ;;  %v10290_v18 = vld [vmem:[#allocation86_spill] sm:$0xff] }
 0x750   : > { %3406 = vperm.xlu1 %6771, %v8862_v54   ;;  %6535 = vmatprep.subr.bf16.mxu1 %v6494_v9  ;;  %v10286_v54 = vld [vmem:[#allocation20_spill] sm:$0xff]  ;;  %v2445_v22 = vmul.f32 %v10290_v18, %v2349_v0 }
 0x751   : > { %3421 = vperm.xlu0 %6770, %v8876_v39   ;;  %v10299_v18 = vld [vmem:[#allocation12_spill] sm:$0xff] }
 0x752   : > { %6252 = vmatmul.mubr.f32.gmra.mrb[34].mxu1 %v10282_v51  ;;  %v2356_v51 = vld [vmem:[#allocation5 + $0x38] sm:$0xff] }
 0x753   : > { %6254 = vmatprep.mubr.f32.mxu1 %v8799_v15  ;;  %6543 = vmatpush3.bf16.msra.mxu1 %v6494_v9  ;;  %v10285_v15 = vld [vmem:[#allocation82_spill] sm:$0xff] }
 0x754   : > { %3416 = vperm.xlu1 %6771, %v8914_v12   ;;  %6536 = vmatprep.subr.bf16.mxu1 %v6498_v8  ;;  %v10292_v9 = vld [vmem:[#allocation90_spill] sm:$0xff] }
 0x755   : > { %3431 = vperm.xlu0 %6770, %v8881_v13   ;;  %v2447_v35 = vmul.f32 %v10292_v9, %v2351_v32  ;;  %v10301_v32 = vld [vmem:[#allocation13_spill] sm:$0xff] }
 0x756   : > { %6255 = vmatmul.mubr.f32.gmra.mrb[36].mxu1 %v10283_v58 }
 0x757   : > { %6257 = vmatprep.mubr.f32.mxu1 %v8803_v14  ;;  %6544 = vmatpush3.bf16.msra.mxu1 %v6498_v8  ;;  %v10287_v14 = vmov 3  }
 0x758   : > { %3426 = vperm.xlu1 %6771, %v8925_v33  }
 0x759   : > { %3441 = vperm.xlu0 %6770, %v8963_v59  }
 0x75a   : > { %6258 = vmatmul.mubr.f32.gmra.mrb[38].mxu1 %v10284_v28 }
 0x75b   : > { %6260 = vmatprep.mubr.f32.mxu1 %v8807_v53 }
 0x75c   : > { %3436 = vperm.xlu1 %6771, %v8938_v31   ;;  %v2350_v31 = vld [vmem:[#allocation5 + $0x8] sm:$0xff] }
 0x75d   : > { %3451 = vperm.xlu0 %6770, %v9003_v49  }
 0x75e   : > { %6261 = vmatmul.mubr.f32.gmra.mrb[40].mxu1 %v10285_v15  ;;  %v2353_v15 = vld [vmem:[#allocation5 + $0x20] sm:$0xff] }
 0x75f   : > { %6263 = vmatprep.mubr.f32.mxu1 %v10286_v54  ;;  %v10294_v54 = vld [vmem:[#allocation84_spill] sm:$0xff] }
 0x760   : > { %3446 = vperm.xlu1 %6771, %v8949_v56  }
 0x761   : > { %3461 = vperm.xlu0 %6770, %v9006_v60   ;;  %v2352_v60 = vld [vmem:[#allocation5 + $0x18] sm:$0xff] }
 0x762   : > { %6264 = vmatmul.mubr.f32.gmra.mrb[42].mxu1 %v8858_v47  ;;  %v2448_v57 = vmul.f32 %v10291_v62, %v2352_v60 }
 0x763   : > { %6266 = vmatprep.mubr.f32.mxu1 %v8822_v11 }
 0x764   : > { %3456 = vperm.xlu1 %6771, %v8989_v42   ;;  %v2446_v42 = vmul.f32 %v10288_v41, %v2350_v31 }
 0x765   : > { %3471 = vperm.xlu0 %6770, %v9010_v24   ;;  %v10289_v24 = vld [vmem:[#allocation55_spill] sm:$0xff] }
 0x766   : > { %6267 = vmatmul.mubr.f32.gmra.mrb[44].mxu1 %v8864_v5 }
 0x767   : > { %6269 = vmatprep.mubr.f32.mxu1 %v8827_v38 }
 0x768   : > { %3466 = vperm.xlu1 %6771, %v8992_v20  }
 0x769   : > { %6772 = vset.pattern.permute.xlu0 %v10287_v14 }
 0x76a   : > { %6270 = vmatmul.mubr.f32.gmra.mrb[46].mxu1 %v8871_v25 }
 0x76c   : > { %6773 = vset.pattern.permute.xlu1 %v10287_v14  ;;  %v2449_v14 = vmul.f32 %v10294_v54, %v2353_v15  ;;  %v10303_v15 = vld [vmem:[#allocation14_spill] sm:$0xff] }
 0x77b   : > { %v3990_v53 = vpop.permute.xlu0 %3989 }
 0x77c   : > { %v4043_v47 = vsub.f32 %v10239_v46, %v3990_v53  ;;  %v10295_v53 = vld [vmem:[#allocation80_spill] sm:$0xff] }
 0x77e   : > { %v4065_v11 = vmul.f32 1.442695, %v4043_v47  ;;  %v2452_v47 = vmul.f32 %v10295_v53, %v2356_v51  ;;  %v2361_v51 = vld [vmem:[#allocation5 + $0x60] sm:$0xff] }
 0x77f   : > { %v9271_v27 = vpop.permute.xlu1 %3994 }
 0x780   : > { %6966 = vpow2.f32 %v4065_v11 }
 0x783   : > { %v6747_v39 = vpop.permute.xlu1 %6746  ;;  %v9273_v13 = vpop.permute.xlu0 %3999 }
 0x784   : > { %v6749_v5 = vunpack.i.h.bf16 %v6747_v39  ;;  %v6748_v38 = vunpack.i.l.bf16 %v6747_v39 }
 0x786   : > { %v6502_v12 = vpack.c.bf16 %v6749_v5, %v6748_v38  ;;  %v2358_v5 = vld [vmem:[#allocation5 + $0x48] sm:$0xff] }
 0x787   : > { %v9275_v36 = vpop.permute.xlu1 %4004  ;;  %v6752_v33 = vpop.permute.xlu0 %6751 }
 0x788   : > { %v6754_v25 = vunpack.i.h.bf16 %v6752_v33  ;;  %v6753_v56 = vunpack.i.l.bf16 %v6752_v33  ;;  %6503 = vmatprep.subr.bf16.mxu0 %v6502_v12  ;;  %6537 = vmatprep.subr.bf16.mxu1 %v6502_v12  ;;  %v2355_v33 = vld [vmem:[#allocation5 + $0x30] sm:$0xff] }
 0x789   : > { %6505 = vmatpush3.bf16.msra.mxu0 %v6502_v12  ;;  %6545 = vmatpush3.bf16.msra.mxu1 %v6502_v12 }
 0x78a   : > { %v9277_v46 = vpop.eup %6966  ;;  %v6506_v59 = vpack.c.bf16 %v6754_v25, %v6753_v56  ;;  %v10296_v25 = vld [vmem:[#allocation79_spill] sm:$0xff] }
 0x78b   : > { %v3960_v20 = vpop.permute.xlu1 %3959  ;;  %v2480_v49 = vpop.permute.xlu0 %2479  ;;  %6339 = vmatprep.mubr.f32.mxu1 %v9277_v46  ;;  %v2451_v56 = vmul.f32 %v10296_v25, %v2355_v33 }
 0x78c   : > { %v4037_v8 = vsub.f32 %v10289_v24, %v3960_v20  ;;  %v2526_v52 = vadd.f32 %v2480_v49, %v2446_v42  ;;  %6507 = vmatprep.subr.bf16.mxu0 %v6506_v59  ;;  %6538 = vmatprep.subr.bf16.mxu1 %v6506_v59  ;;  %v2360_v49 = vld [vmem:[#allocation5 + $0x58] sm:$0xff] }
 0x78d   : > { %6509 = vmatpush3.bf16.msra.mxu0 %v6506_v59  ;;  %6546 = vmatpush3.bf16.msra.mxu1 %v6506_v59  ;;  %v10297_v59 = vld [vmem:[#allocation11_spill] sm:$0xff] }
 0x78e   : > { %v4053_v40 = vmul.f32 1.442695, %v4037_v8  ;;  %2543 = vst.msk [vmem:[#allocation5 + $0x8] sm:$0xff] %vm2541_vm7, %v2526_v52  ;;  %v2454_v41 = vmul.f32 %v10297_v59, %v2358_v5  ;;  %v2357_v8 = vld [vmem:[#allocation5 + $0x40] sm:$0xff]  ;;  %v10298_v52 = vld [vmem:[#allocation89_spill] sm:$0xff]  ;;  %v10304_v5 = vld [vmem:[#allocation87_spill] sm:$0xff] }
 0x78f   : > { %v2478_v23 = vpop.permute.xlu1 %2477  ;;  %v2484_v17 = vpop.permute.xlu0 %2483  ;;  %v2453_v0 = vmul.f32 %v10298_v52, %v2357_v8  ;;  %v10305_v52 = vld [vmem:[#allocation60_spill] sm:$0xff] }
 0x790   : > { %6968 = vpow2.f32 %v4053_v40  ;;  %v2525_v3 = vadd.f32 %v2478_v23, %v2445_v22  ;;  %v2528_v34 = vadd.f32 %v2484_v17, %v2448_v57  ;;  %v2456_v22 = vmul.f32 %v10299_v18, %v2360_v49  ;;  %v2362_v57 = vld [vmem:[#allocation5 + $0x68] sm:$0xff] }
 0x791   : > { %v2458_v9 = vmul.f32 %v10301_v32, %v2362_v57 }
 0x792   : > { %2542 = vst.msk [vmem:[#allocation5] sm:$0xff] %vm2541_vm7, %v2525_v3  ;;  %2545 = vst.msk [vmem:[#allocation5 + $0x18] sm:$0xff] %vm2541_vm7, %v2528_v34  ;;  %v10300_v3 = vld [vmem:[#allocation17_spill] sm:$0xff] }
 0x793   : > { %v2482_v6 = vpop.permute.xlu1 %2481  ;;  %v2488_v7 = vpop.permute.xlu0 %2487  ;;  %v2455_v34 = vmul.f32 %v10300_v3, %v2359_v16  ;;  %v10308_v3 = vld [vmem:[#allocation57_spill] sm:$0xff] }
 0x794   : > { %v2527_v58 = vadd.f32 %v2482_v6, %v2447_v35  ;;  %v2530_v28 = vadd.f32 %v2488_v7, %v2450_v29  ;;  %v2364_v29 = vld [vmem:[#allocation5 + $0x78] sm:$0xff] }
 0x795   : > { %v2460_v54 = vmul.f32 %v10303_v15, %v2364_v29 }
 0x796   : > { %2544 = vst.msk [vmem:[#allocation5 + $0x10] sm:$0xff] %vm2541_vm7, %v2527_v58  ;;  %2547 = vst.msk [vmem:[#allocation5 + $0x28] sm:$0xff] %vm2541_vm7, %v2530_v28  ;;  %v10302_v58 = vld [vmem:[#allocation15_spill] sm:$0xff] }
 0x797   : > { %v2486_v11 = vpop.permute.xlu1 %2485  ;;  %v2492_v39 = vpop.permute.xlu0 %2491  ;;  %v2457_v28 = vmul.f32 %v10302_v58, %v2361_v51 }
 0x798   : > { %v2529_v38 = vadd.f32 %v2486_v11, %v2449_v14  ;;  %v2532_v12 = vadd.f32 %v2492_v39, %v2452_v47  ;;  %v2363_v39 = vld [vmem:[#allocation5 + $0x70] sm:$0xff] }
 0x79a   : > { %v9293_v31 = vpop.eup %6968  ;;  %2546 = vst.msk [vmem:[#allocation5 + $0x20] sm:$0xff] %vm2541_vm7, %v2529_v38  ;;  %2549 = vst.msk [vmem:[#allocation5 + $0x38] sm:$0xff] %vm2541_vm7, %v2532_v12  ;;  %v2459_v38 = vmul.f32 %v10304_v5, %v2363_v39  ;;  %v10313_v5 = vld [vmem:[#allocation58_spill] sm:$0xff] }
 0x79b   : > { %6330 = vmatprep.mubr.f32.mxu0 %v9293_v31  ;;  %v2490_v42 = vpop.permute.xlu1 %2489  ;;  %v2496_v20 = vpop.permute.xlu0 %2495 }
 0x79c   : > { %v2531_v60 = vadd.f32 %v2490_v42, %v2451_v56  ;;  %v2534_v24 = vadd.f32 %v2496_v20, %v2454_v41 }
 0x79e   : > { %2548 = vst.msk [vmem:[#allocation5 + $0x30] sm:$0xff] %vm2541_vm7, %v2531_v60  ;;  %2551 = vst.msk [vmem:[#allocation5 + $0x48] sm:$0xff] %vm2541_vm7, %v2534_v24 }
 0x79f   : > { %v2494_v40 = vpop.permute.xlu1 %2493  ;;  %v2500_v62 = vpop.permute.xlu0 %2499 }
 0x7a0   : > { %v2533_v23 = vadd.f32 %v2494_v40, %v2453_v0  ;;  %v2536_v17 = vadd.f32 %v2500_v62, %v2456_v22  ;;  %v4044_v0 = vsub.f32 %v10305_v52, %v9271_v27  ;;  %v10306_v40 = vld [vmem:[#allocation63_spill] sm:$0xff] }
 0x7a1   : > { %v4045_v62 = vsub.f32 %v10306_v40, %v9273_v13 }
 0x7a2   : > { %2550 = vst.msk [vmem:[#allocation5 + $0x40] sm:$0xff] %vm2541_vm7, %v2533_v23  ;;  %2553 = vst.msk [vmem:[#allocation5 + $0x58] sm:$0xff] %vm2541_vm7, %v2536_v17  ;;  %v10307_v17 = vld [vmem:[#allocation54_spill] sm:$0xff] }
 0x7a3   : > { %v2498_v35 = vpop.permute.xlu1 %2497  ;;  %v2504_v43 = vpop.permute.xlu0 %2503 }
 0x7a4   : > { %v2535_v6 = vadd.f32 %v2498_v35, %v2455_v34  ;;  %v2538_v7 = vadd.f32 %v2504_v43, %v2458_v9  ;;  %v4067_v9 = vmul.f32 1.442695, %v4044_v0  ;;  %v10309_v35 = vld [vmem:[#allocation62_spill] sm:$0xff] }
 0x7a5   : > { %v4046_v43 = vsub.f32 %v10309_v35, %v9275_v36  ;;  %v10312_v36 = vld [vmem:[#allocation64_spill] sm:$0xff] }
 0x7a6   : > { %2552 = vst.msk [vmem:[#allocation5 + $0x50] sm:$0xff] %vm2541_vm7, %v2535_v6  ;;  %2555 = vst.msk [vmem:[#allocation5 + $0x68] sm:$0xff] %vm2541_vm7, %v2538_v7  ;;  %v4069_v6 = vmul.f32 1.442695, %v4045_v62  ;;  %v10310_v7 = vld [vmem:[#allocation65_spill] sm:$0xff]  ;;  %6970 = vpow2.f32 %v4067_v9  ;;  %v10317_v62 = vld [vmem:[#allocation68_spill] sm:$0xff] }
 0x7a7   : > { %v2502_v14 = vpop.permute.xlu1 %2501  ;;  %v2508_v53 = vpop.permute.xlu0 %2507 }
 0x7a8   : > { %v2537_v47 = vadd.f32 %v2502_v14, %v2457_v28  ;;  %v2540_v11 = vadd.f32 %v2508_v53, %v2460_v54  ;;  %v10311_v28 = vld [vmem:[#allocation59_spill] sm:$0xff]  ;;  %v4071_v54 = vmul.f32 1.442695, %v4046_v43  ;;  %6972 = vpow2.f32 %v4069_v6 }
 0x7aa   : > { %2554 = vst.msk [vmem:[#allocation5 + $0x60] sm:$0xff] %vm2541_vm7, %v2537_v47  ;;  %2557 = vst.msk [vmem:[#allocation5 + $0x78] sm:$0xff] %vm2541_vm7, %v2540_v11 }
 0x7ab   : > { %v2506_v12 = vpop.permute.xlu1 %2505  ;;  %v4010_v33 = vpop.permute.xlu0 %4009 }
 0x7ac   : > { %v2539_v25 = vadd.f32 %v2506_v12, %v2459_v38  ;;  %v4047_v27 = vsub.f32 %v10310_v7, %v4010_v33  ;;  %v10314_v12 = vld [vmem:[#allocation67_spill] sm:$0xff] }
 0x7ae   : > { %2556 = vst.msk [vmem:[#allocation5 + $0x70] sm:$0xff] %vm2541_vm7, %v2539_v25  ;;  %v4073_v53 = vmul.f32 1.442695, %v4047_v27 }
 0x7af   : > { %v3965_v56 = vpop.permute.xlu1 %3964  ;;  %v4015_v59 = vpop.permute.xlu0 %4014 }
 0x7b0   : > { %v4038_v16 = vsub.f32 %v10307_v17, %v3965_v56  ;;  %v4048_v47 = vsub.f32 %v10312_v36, %v4015_v59 }
 0x7b2   : > { %v4055_v51 = vmul.f32 1.442695, %v4038_v16  ;;  %v4075_v56 = vmul.f32 1.442695, %v4048_v47 }
 0x7b3   : > { %v6757_v41 = vpop.permute.xlu1 %6756  ;;  %v3970_v42 = vpop.permute.xlu0 %3969 }
 0x7b4   : > { %v6759_v20 = vunpack.i.h.bf16 %v6757_v41  ;;  %v6758_v49 = vunpack.i.l.bf16 %v6757_v41  ;;  %v4039_v34 = vsub.f32 %v10308_v3, %v3970_v42  ;;  %6974 = vpow2.f32 %v4055_v51 }
 0x7b6   : > { %v6510_v60 = vpack.c.bf16 %v6759_v20, %v6758_v49  ;;  %v4057_v58 = vmul.f32 1.442695, %v4039_v34  ;;  %v10315_v20 = vld [vmem:[#allocation66_spill] sm:$0xff] }
 0x7b7   : > { %v4020_v24 = vpop.permute.xlu1 %4019  ;;  %v3975_v8 = vpop.permute.xlu0 %3974 }
 0x7b8   : > { %6511 = vmatprep.subr.bf16.mxu0 %v6510_v60  ;;  %6539 = vmatprep.subr.bf16.mxu1 %v6510_v60  ;;  %v4040_v13 = vsub.f32 %v10256_v50, %v3975_v8  ;;  %6976 = vpow2.f32 %v4057_v58  ;;  %v4049_v50 = vsub.f32 %v10314_v12, %v4020_v24  ;;  %v10316_v8 = vld [vmem:[#allocation69_spill] sm:$0xff]  ;;  %v9332_v24 = vpop.eup %6970 }
 0x7b9   : > { %6513 = vmatpush3.bf16.msra.mxu0 %v6510_v60  ;;  %6547 = vmatpush3.bf16.msra.mxu1 %v6510_v60  ;;  %6978 = vpow2.f32 %v4071_v54 }
 0x7ba   : > { %v4059_v39 = vmul.f32 1.442695, %v4040_v13  ;;  %6980 = vpow2.f32 %v4073_v53  ;;  %v4077_v59 = vmul.f32 1.442695, %v4049_v50 }
 0x7bb   : > { %v4025_v18 = vpop.permute.xlu1 %4024  ;;  %v6762_v22 = vpop.permute.xlu0 %6761 }
 0x7bc   : > { %v6764_v57 = vunpack.i.h.bf16 %v6762_v22  ;;  %v6763_v23 = vunpack.i.l.bf16 %v6762_v22  ;;  %6982 = vpow2.f32 %v4059_v39  ;;  %v4050_v49 = vsub.f32 %v10315_v20, %v4025_v18 }
 0x7be   : > { %v6514_v32 = vpack.c.bf16 %v6764_v57, %v6763_v23  ;;  %v4079_v40 = vmul.f32 1.442695, %v4050_v49  ;;  %v9335_v23 = vpop.eup %6972 }
 0x7bf   : > { %v3980_v29 = vpop.permute.xlu1 %3979  ;;  %v4030_v11 = vpop.permute.xlu0 %4029 }
 0x7c0   : > { %6515 = vmatprep.subr.bf16.mxu0 %v6514_v32  ;;  %6540 = vmatprep.subr.bf16.mxu1 %v6514_v32  ;;  %v4041_v15 = vsub.f32 %v10311_v28, %v3980_v29  ;;  %v4051_v52 = vsub.f32 %v10316_v8, %v4030_v11  ;;  %v6975_v17 = vpop.eup %6974  ;;  %v10318_v8 = vsub.f32 %v9052_v26, %v9055_v21 }
 0x7c1   : > { %6517 = vmatpush3.bf16.msra.mxu0 %v6514_v32  ;;  %6548 = vmatpush3.bf16.msra.mxu1 %v6514_v32  ;;  %v10322_v26 = vsub.f32 %v9068_v61, %v9071_v4 }
 0x7c2   : > { %v4061_v33 = vmul.f32 1.442695, %v4041_v15  ;;  %v4081_v18 = vmul.f32 1.442695, %v4051_v52  ;;  %v6977_v16 = vpop.eup %6976  ;;  %v3925_v52 = vmul.f32 1.442695, %v10318_v8 }
 0x7c3   : > { %v3985_v14 = vpop.permute.xlu1 %3984  ;;  %v4035_v0 = vpop.permute.xlu0 %4034  ;;  %v3945_v21 = vmul.f32 1.442695, %v10322_v26  ;;  %v10337_v8 = vld [vmem:[#allocation23_spill] sm:$0xff] }
 0x7c4   : > { %v4042_v38 = vsub.f32 %v10313_v5, %v3985_v14  ;;  %6984 = vpow2.f32 %v4061_v33  ;;  %v4052_v57 = vsub.f32 %v10317_v62, %v4035_v0  ;;  %v9338_v3 = vpop.eup %6978  ;;  %v10319_v0 = vsub.f32 %v9089_v30, %v9092_v48  ;;  %v10323_v48 = vld [vmem:[#allocation50_spill] sm:$0xff] }
 0x7c5   : > { %6986 = vpow2.f32 %v4075_v56  ;;  %v9341_v32 = vpop.eup %6980 }
 0x7c6   : > { %v4063_v60 = vmul.f32 1.442695, %v4042_v38  ;;  %v4083_v34 = vmul.f32 1.442695, %v4052_v57  ;;  %v6983_v9 = vpop.eup %6982  ;;  %v10321_v57 = vsub.f32 %v9117_v1, %v9120_v37  ;;  %v10326_v1 = vld [vmem:[#allocation31_spill] sm:$0xff] }
 0x7c7   : > { %v6767_v25 = vpop.permute.xlu1 %6766 }
 0x7c8   : > { %v6769_v41 = vunpack.i.h.bf16 %v6767_v25  ;;  %v6768_v42 = vunpack.i.l.bf16 %v6767_v25  ;;  %6988 = vpow2.f32 %v4063_v60  ;;  %v3397_v25 = vpop.permute.xlu0 %3396 }
 0x7c9   : > { %6990 = vpow2.f32 %v4077_v59 }
 0x7ca   : > { %v6518_v22 = vpack.c.bf16 %v6769_v41, %v6768_v42  ;;  %6992 = vpow2.f32 %v4079_v40 }
 0x7cb   : > { %6994 = vpow2.f32 %v4081_v18  ;;  %v3402_v56 = vpop.permute.xlu1 %3401 }
 0x7cc   : > { %6519 = vmatprep.subr.bf16.mxu0 %v6518_v22  ;;  %6541 = vmatprep.subr.bf16.mxu1 %v6518_v22  ;;  %6996 = vpow2.f32 %v4083_v34  ;;  %v9363_v41 = vpop.permute.xlu0 %3411  ;;  %v10328_v34 = vld [vmem:[#allocation70_spill] sm:$0xff] }
 0x7cd   : > { %6521 = vmatpush3.bf16.msra.mxu0 %v6518_v22  ;;  %6549 = vmatpush3.bf16.msra.mxu1 %v6518_v22  ;;  %v3927_v22 = vmul.f32 1.442695, %v10319_v0  ;;  %6998 = vpow2.f32 %v3925_v52  ;;  %v10338_v52 = vld [vmem:[#allocation24_spill] sm:$0xff] }
 0x7ce   : > { %v6985_v35 = vpop.eup %6984  ;;  %v10339_v0 = vsub.f32 %v10337_v8, %v10338_v52  ;;  %v3389_v52 = vld [vmem:[#allocation5 + $0x58] sm:$0xff] }
 0x7cf   : > { %v6987_v43 = vpop.eup %6986  ;;  %v9365_v42 = vpop.permute.xlu1 %3406  ;;  %7000 = vpow2.f32 %v3927_v22 }
 0x7d0   : > { %6331 = vmatmul.mubr.f32.vlgmr.msra.gmra.mrb[64].mxu0 %v6975_v17  ;;  %6340 = vmatmul.mubr.f32.vlgmr.msra.gmra.mrb[48].mxu1 %v9332_v24  ;;  %v9370_v20 = vpop.permute.xlu0 %3421  ;;  %v3939_v22 = vmul.f32 1.442695, %v10339_v0 }
 0x7d1   : > { %6333 = vmatprep.mubr.f32.mxu0 %v6977_v16  ;;  %6342 = vmatprep.mubr.f32.mxu1 %v9335_v23 }
 0x7d2   : > { %v6989_v29 = vpop.eup %6988 }
 0x7d3   : > { %v6991_v6 = vpop.eup %6990 }
 0x7d4   : > { %6334 = vmatmul.mubr.f32.gmra.mrb[66].mxu0 %v6983_v9  ;;  %6343 = vmatmul.mubr.f32.gmra.mrb[50].mxu1 %v9338_v3  ;;  %v6993_v7 = vpop.eup %6992 }
 0x7d5   : > { %6336 = vmatprep.mubr.f32.mxu0 %v6985_v35  ;;  %6345 = vmatprep.mubr.f32.mxu1 %v9341_v32  ;;  %v6995_v27 = vpop.eup %6994 }
 0x7d6   : > { %v6997_v51 = vpop.eup %6996 }
 0x7d7   : > { %v9415_v61 = vpop.eup %6998 }
 0x7d8   : > { %6337 = vmatmul.mubr.f32.gmra.mrb[68].mxu0 %v6989_v29  ;;  %6346 = vmatmul.mubr.f32.gmra.mrb[52].mxu1 %v6987_v43 }
 0x7d9   : > { %6348 = vmatprep.mubr.f32.mxu1 %v6991_v6 }
 0x7dc   : > { %6349 = vmatmul.mubr.f32.gmra.mrb[54].mxu1 %v6993_v7 }
 0x7dd   : > { %6351 = vmatprep.mubr.f32.mxu1 %v6995_v27 }
 0x7e0   : > { %6352 = vmatmul.mubr.f32.gmra.mrb[56].mxu1 %v6997_v51 }
 0x821   : > { %v6250_v13 = vpop.f32.mrb[32].mxu1 }
 0x822   : > { %3508 = vrot.lane.b32.xlu0 %v6250_v13, %s7158_s21  ;;  %v3299_v58 = vpop.f32.mrb[33].mxu1  ;;  %v3379_v13 = vld [vmem:[#allocation5 + $0x8] sm:$0xff] }
 0x823   : > { %3506 = vrot.lane.b32.xlu1 %v3299_v58, %s7158_s21 }
 0x825   : > { %v6253_v28 = vpop.f32.mrb[34].mxu1 }
 0x826   : > { %3512 = vrot.lane.b32.xlu0 %v6253_v28, %s7158_s21  ;;  %v3309_v15 = vpop.f32.mrb[35].mxu1  ;;  %v3378_v28 = vld [vmem:[#allocation5] sm:$0xff] }
 0x827   : > { %3510 = vrot.lane.b32.xlu1 %v3309_v15, %s7158_s21  ;;  %v3475_v15 = vmul.f32 %v3402_v56, %v3379_v13 }
 0x829   : > { %v6256_v54 = vpop.f32.mrb[36].mxu1 }
 0x82a   : > { %3516 = vrot.lane.b32.xlu0 %v6256_v54, %s7158_s21  ;;  %v3319_v14 = vpop.f32.mrb[37].mxu1 }
 0x82b   : > { %3514 = vrot.lane.b32.xlu1 %v3319_v14, %s7158_s21  ;;  %v10335_v14 = vld [vmem:[#allocation22_spill] sm:$0xff] }
 0x82d   : > { %v6259_v53 = vpop.f32.mrb[38].mxu1 }
 0x82e   : > { %3520 = vrot.lane.b32.xlu0 %v6259_v53, %s7158_s21  ;;  %v3329_v36 = vpop.f32.mrb[39].mxu1 }
 0x82f   : > { %3518 = vrot.lane.b32.xlu1 %v3329_v36, %s7158_s21 }
 0x831   : > { %v6262_v47 = vpop.f32.mrb[40].mxu1 }
 0x832   : > { %3524 = vrot.lane.b32.xlu0 %v6262_v47, %s7158_s21  ;;  %v3339_v11 = vpop.f32.mrb[41].mxu1 }
 0x833   : > { %3522 = vrot.lane.b32.xlu1 %v3339_v11, %s7158_s21 }
 0x835   : > { %v6265_v39 = vpop.f32.mrb[42].mxu1 }
 0x836   : > { %3528 = vrot.lane.b32.xlu0 %v6265_v39, %s7158_s21  ;;  %v3349_v5 = vpop.f32.mrb[43].mxu1 }
 0x837   : > { %3526 = vrot.lane.b32.xlu1 %v3349_v5, %s7158_s21  ;;  %v3381_v5 = vld [vmem:[#allocation5 + $0x18] sm:$0xff] }
 0x839   : > { %v6268_v38 = vpop.f32.mrb[44].mxu1 }
 0x83a   : > { %3532 = vrot.lane.b32.xlu0 %v6268_v38, %s7158_s21  ;;  %v3359_v12 = vpop.f32.mrb[45].mxu1 }
 0x83b   : > { %3530 = vrot.lane.b32.xlu1 %v3359_v12, %s7158_s21 }
 0x83d   : > { %v6271_v50 = vpop.f32.mrb[46].mxu1 }
 0x83e   : > { %3536 = vrot.lane.b32.xlu0 %v6271_v50, %s7158_s21  ;;  %v3369_v33 = vpop.f32.mrb[47].mxu1  ;;  %v3477_v50 = vmul.f32 %v9363_v41, %v3381_v5 }
 0x83f   : > { %3534 = vrot.lane.b32.xlu1 %v3369_v33, %s7158_s21  ;;  %v3380_v33 = vld [vmem:[#allocation5 + $0x10] sm:$0xff] }
 0x85d   : > { %4119 = vadd.xlane.f32.xlu0 %v6975_v17 }
 0x861   : > { %4121 = vadd.xlane.f32.xlu0 %v6977_v16  ;;  %v10325_v16 = vld [vmem:[#allocation30_spill] sm:$0xff] }
 0x862   : > { %v10327_v37 = vsub.f32 %v10325_v16, %v10326_v1  ;;  %v10341_v16 = vld [vmem:[#allocation26_spill] sm:$0xff] }
 0x863   : > { %4117 = vadd.xlane.f32.xlu1 %v9293_v31  ;;  %v9372_v31 = vpop.permute.xlu1 %3416 }
 0x865   : > { %4125 = vadd.xlane.f32.xlu0 %v6985_v35 }
 0x867   : > { %4123 = vadd.xlane.f32.xlu1 %v6983_v9  ;;  %v9377_v49 = vpop.permute.xlu1 %3426  ;;  %v9417_v9 = vpop.eup %7000 }
 0x869   : > { %4129 = vadd.xlane.f32.xlu0 %v9277_v46  ;;  %v9375_v46 = vpop.permute.xlu0 %3431 }
 0x86b   : > { %4127 = vadd.xlane.f32.xlu1 %v6989_v29  ;;  %v9381_v59 = vpop.permute.xlu1 %3436 }
 0x86d   : > { %4133 = vadd.xlane.f32.xlu0 %v9335_v23  ;;  %v9379_v60 = vpop.permute.xlu0 %3441  ;;  %v3929_v23 = vmul.f32 1.442695, %v10321_v57  ;;  %v3383_v57 = vld [vmem:[#allocation5 + $0x28] sm:$0xff] }
 0x86f   : > { %4131 = vadd.xlane.f32.xlu1 %v9332_v24  ;;  %v10320_v24 = vsub.f32 %v9035_v63, %v9038_v55  ;;  %v9397_v18 = vpop.permute.xlu1 %3446  ;;  %v10324_v63 = vsub.f32 %v9147_v2, %v10323_v48  ;;  %v10330_v2 = vld [vmem:[#allocation88_spill] sm:$0xff] }
 0x870   : > { %v10331_v35 = vsub.f32 %v10330_v2, %v9193_v19  ;;  %v3474_v19 = vmul.f32 %v3397_v25, %v3378_v28  ;;  %v3476_v25 = vmul.f32 %v9365_v42, %v3380_v33  ;;  %v3479_v42 = vmul.f32 %v9370_v20, %v3383_v57 }
 0x871   : > { %4137 = vadd.xlane.f32.xlu0 %v9341_v32  ;;  %v3941_v40 = vmul.f32 1.442695, %v10320_v24  ;;  %v9392_v62 = vpop.permute.xlu0 %3451  ;;  %v3931_v55 = vmul.f32 1.442695, %v10324_v63  ;;  %v10329_v32 = vsub.f32 %v10328_v34, %v9180_v44 }
 0x873   : > { %4135 = vadd.xlane.f32.xlu1 %v9338_v3  ;;  %7002 = vpow2.f32 %v3941_v40  ;;  %v9407_v17 = vpop.permute.xlu1 %3456  ;;  %v3949_v3 = vmul.f32 1.442695, %v10327_v37  ;;  %v3933_v4 = vmul.f32 1.442695, %v10329_v32  ;;  %v3385_v32 = vld [vmem:[#allocation5 + $0x38] sm:$0xff] }
 0x874   : > { %7004 = vpow2.f32 %v3929_v23 }
 0x875   : > { %4141 = vadd.xlane.f32.xlu0 %v6991_v6  ;;  %v9405_v30 = vpop.permute.xlu0 %3461  ;;  %7006 = vpow2.f32 %v3945_v21  ;;  %v10332_v6 = vld [vmem:[#allocation27_spill] sm:$0xff]  ;;  %v3382_v21 = vld [vmem:[#allocation5 + $0x20] sm:$0xff] }
 0x876   : > { %7008 = vpow2.f32 %v3931_v55  ;;  %v3478_v48 = vmul.f32 %v9372_v31, %v3382_v21  ;;  %v10340_v55 = vld [vmem:[#allocation25_spill] sm:$0xff]  ;;  %v3481_v31 = vmul.f32 %v9375_v46, %v3385_v32  ;;  %v3390_v32 = vld [vmem:[#allocation5 + $0x60] sm:$0xff] }
 0x877   : > { %4139 = vadd.xlane.f32.xlu1 %v6987_v43  ;;  %7010 = vpow2.f32 %v3949_v3  ;;  %v3953_v43 = vmul.f32 1.442695, %v10331_v35  ;;  %v10342_v1 = vsub.f32 %v10340_v55, %v10341_v16  ;;  %v3384_v35 = vld [vmem:[#allocation5 + $0x30] sm:$0xff]  ;;  %v3387_v46 = vld [vmem:[#allocation5 + $0x48] sm:$0xff] }
 0x878   : > { %7012 = vpow2.f32 %v3933_v4 }
 0x879   : > { %4145 = vadd.xlane.f32.xlu0 %v6995_v27  ;;  %v9423_v29 = vpop.permute.xlu0 %3471  ;;  %v9429_v27 = vpop.permute.xlu1 %3466  ;;  %7014 = vpow2.f32 %v3953_v43  ;;  %v3943_v37 = vmul.f32 1.442695, %v10342_v1  ;;  %v3480_v43 = vmul.f32 %v9377_v49, %v3384_v35  ;;  %v3486_v35 = vmul.f32 %v9407_v17, %v3390_v32  ;;  %v4092_v32 = vld [vmem:[#allocation4 + $0x38] sm:$0xff] }
 0x87b   : > { %4143 = vadd.xlane.f32.xlu1 %v6993_v7  ;;  %v10333_v7 = vsub.f32 %v10332_v6, %v9076_v10  ;;  %v10334_v10 = vld [vmem:[#allocation21_spill] sm:$0xff] }
 0x87c   : > { %v10336_v53 = vsub.f32 %v10334_v10, %v10335_v14  ;;  %v3483_v14 = vmul.f32 %v9379_v60, %v3387_v46 }
 0x87d   : > { %v3935_v44 = vmul.f32 1.442695, %v10333_v7  ;;  %v10343_v7 = vld [vmem:[#allocation28_spill] sm:$0xff] }
 0x87e   : > { %v3937_v36 = vmul.f32 1.442695, %v10336_v53  ;;  %v3386_v53 = vld [vmem:[#allocation5 + $0x40] sm:$0xff] }
 0x87f   : > { %4147 = vadd.xlane.f32.xlu1 %v6997_v51  ;;  %v9431_v51 = vpop.eup %7002  ;;  %7016 = vpow2.f32 %v3935_v44  ;;  %v10344_v44 = vld [vmem:[#allocation29_spill] sm:$0xff] }
 0x880   : > { %v9433_v58 = vpop.eup %7004  ;;  %7018 = vpow2.f32 %v3937_v36  ;;  %v10345_v13 = vsub.f32 %v10343_v7, %v10344_v44 }
 0x881   : > { %v9440_v39 = vpop.eup %7006  ;;  %7020 = vpow2.f32 %v3939_v22  ;;  %v3485_v22 = vmul.f32 %v9392_v62, %v3389_v52 }
 0x882   : > { %v9442_v12 = vpop.eup %7008  ;;  %7022 = vpow2.f32 %v3943_v37  ;;  %v3947_v28 = vmul.f32 1.442695, %v10345_v13  ;;  %v3391_v37 = vld [vmem:[#allocation5 + $0x68] sm:$0xff] }
 0x883   : > { %v9453_v41 = vpop.eup %7010 }
 0x884   : > { %v9455_v26 = vpop.eup %7012  ;;  %7024 = vpow2.f32 %v3947_v28 }
 0x885   : > { %v9466_v20 = vpop.eup %7014 }
 0x889   : > { %v9468_v2 = vpop.eup %7016 }
 0x88a   : > { %v9479_v10 = vpop.eup %7018 }
 0x88f   : > { %4425 = vperm.xlu0 %6772, %v9415_v61  }
 0x890   : > { %4430 = vperm.xlu1 %6773, %v9417_v9  }
 0x893   : > { %4465 = vperm.xlu0 %6772, %v9431_v51  }
 0x894   : > { %v3509_v54 = vpop.permute.xlu0 %3508  ;;  %4435 = vperm.xlu1 %6773, %v9433_v58  }
 0x895   : > { %v3555_v47 = vadd.f32 %v3509_v54, %v3475_v15  ;;  %v3507_v11 = vpop.permute.xlu1 %3506 }
 0x896   : > { %v3554_v38 = vadd.f32 %v3507_v11, %v3474_v19 }
 0x897   : > { %3572 = vst.msk [vmem:[#allocation5 + $0x8] sm:$0xff] %vm3570_vm8, %v3555_v47  ;;  %4475 = vperm.xlu0 %6772, %v9440_v39   ;;  %v3482_v47 = vmul.f32 %v9381_v59, %v3386_v53  ;;  %v9494_v59 = vpop.eup %7020 }
 0x898   : > { %3571 = vst.msk [vmem:[#allocation5] sm:$0xff] %vm3570_vm8, %v3554_v38  ;;  %v3513_v56 = vpop.permute.xlu0 %3512  ;;  %4440 = vperm.xlu1 %6773, %v9442_v12   ;;  %v10346_v38 = vld [vmem:[#allocation52_spill] sm:$0xff] }
 0x899   : > { %v3557_v24 = vadd.f32 %v3513_v56, %v3477_v50  ;;  %v3511_v40 = vpop.permute.xlu1 %3510  ;;  %v10347_v50 = vld [vmem:[#allocation85_spill] sm:$0xff] }
 0x89a   : > { %v3556_v23 = vadd.f32 %v3511_v40, %v3476_v25  ;;  %v10348_v33 = vsub.f32 %v10346_v38, %v10347_v50 }
 0x89b   : > { %3574 = vst.msk [vmem:[#allocation5 + $0x18] sm:$0xff] %vm3570_vm8, %v3557_v24  ;;  %4485 = vperm.xlu0 %6772, %v9453_v41   ;;  %v3388_v24 = vld [vmem:[#allocation5 + $0x50] sm:$0xff] }
 0x89c   : > { %3573 = vst.msk [vmem:[#allocation5 + $0x10] sm:$0xff] %vm3570_vm8, %v3556_v23  ;;  %v3517_v63 = vpop.permute.xlu0 %3516  ;;  %4445 = vperm.xlu1 %6773, %v9455_v26   ;;  %v3951_v60 = vmul.f32 1.442695, %v10348_v33  ;;  %v3484_v23 = vmul.f32 %v9397_v18, %v3388_v24  ;;  %v3487_v18 = vmul.f32 %v9405_v30, %v3391_v37  ;;  %v3393_v30 = vld [vmem:[#allocation5 + $0x78] sm:$0xff]  ;;  %v4089_v24 = vld [vmem:[#allocation4 + $0x20] sm:$0xff] }
 0x89d   : > { %v3559_v3 = vadd.f32 %v3517_v63, %v3479_v42  ;;  %v3515_v34 = vpop.permute.xlu1 %3514  ;;  %v4093_v37 = vld [vmem:[#allocation4 + $0x40] sm:$0xff] }
 0x89e   : > { %v3558_v4 = vadd.f32 %v3515_v34, %v3478_v48  ;;  %7026 = vpow2.f32 %v3951_v60  ;;  %v10349_v48 = vld [vmem:[#allocation51_spill] sm:$0xff]  ;;  %v9505_v34 = vpop.eup %7022 }
 0x89f   : > { %3576 = vst.msk [vmem:[#allocation5 + $0x28] sm:$0xff] %vm3570_vm8, %v3559_v3  ;;  %4495 = vperm.xlu0 %6772, %v9466_v20   ;;  %v10350_v63 = vsub.f32 %v10349_v48, %v9205_v45  ;;  %v9513_v28 = vpop.eup %7024  ;;  %v4091_v48 = vld [vmem:[#allocation4 + $0x30] sm:$0xff] }
 0x8a0   : > { %3575 = vst.msk [vmem:[#allocation5 + $0x20] sm:$0xff] %vm3570_vm8, %v3558_v4  ;;  %v3521_v6 = vpop.permute.xlu0 %3520  ;;  %4450 = vperm.xlu1 %6773, %v9468_v2  }
 0x8a1   : > { %v3561_v15 = vadd.f32 %v3521_v6, %v3481_v31  ;;  %v3519_v19 = vpop.permute.xlu1 %3518  ;;  %v3955_v55 = vmul.f32 1.442695, %v10350_v63 }
 0x8a2   : > { %v3560_v54 = vadd.f32 %v3519_v19, %v3480_v43  ;;  %v3392_v19 = vld [vmem:[#allocation5 + $0x70] sm:$0xff] }
 0x8a3   : > { %3578 = vst.msk [vmem:[#allocation5 + $0x38] sm:$0xff] %vm3570_vm8, %v3561_v15  ;;  %v9483_v49 = vpop.f32.mrb[64].mxu0  ;;  %v9485_v36 = vpop.f32.mrb[48].mxu1  ;;  %7028 = vpow2.f32 %v3955_v55  ;;  %v3489_v15 = vmul.f32 %v9423_v29, %v3393_v30  ;;  %v3488_v46 = vmul.f32 %v9429_v27, %v3392_v19  ;;  %v4097_v30 = vld [vmem:[#allocation4 + $0x60] sm:$0xff]  ;;  %v4096_v19 = vld [vmem:[#allocation4 + $0x58] sm:$0xff] }
 0x8a4   : > { %3577 = vst.msk [vmem:[#allocation5 + $0x30] sm:$0xff] %vm3570_vm8, %v3560_v54  ;;  %v4328_v11 = vpop.f32.mrb[65].mxu0  ;;  %v3525_v5 = vpop.permute.xlu0 %3524  ;;  %4455 = vperm.xlu1 %6773, %v9479_v10  }
 0x8a5   : > { %v3563_v25 = vadd.f32 %v3525_v5, %v3483_v14  ;;  %v4358_v56 = vpop.f32.mrb[49].mxu1  ;;  %v3523_v8 = vpop.permute.xlu1 %3522  ;;  %4535 = vrot.lane.b32.xlu0 %v4328_v11, %s7159_s6 }
 0x8a6   : > { %v3562_v0 = vadd.f32 %v3523_v8, %v3482_v47 }
 0x8a7   : > { %3580 = vst.msk [vmem:[#allocation5 + $0x48] sm:$0xff] %vm3570_vm8, %v3563_v25  ;;  %v6335_v40 = vpop.f32.mrb[66].mxu0  ;;  %v6344_v57 = vpop.f32.mrb[50].mxu1  ;;  %v4087_v25 = vld [vmem:[#allocation4 + $0x10] sm:$0xff] }
 0x8a8   : > { %3579 = vst.msk [vmem:[#allocation5 + $0x40] sm:$0xff] %vm3570_vm8, %v3562_v0  ;;  %v4338_v42 = vpop.f32.mrb[67].mxu0  ;;  %v3529_v21 = vpop.permute.xlu0 %3528  ;;  %4460 = vperm.xlu1 %6773, %v9494_v59  }
 0x8a9   : > { %v3565_v16 = vadd.f32 %v3529_v21, %v3485_v22  ;;  %v4368_v62 = vpop.f32.mrb[51].mxu1  ;;  %v3527_v1 = vpop.permute.xlu1 %3526  ;;  %4539 = vrot.lane.b32.xlu0 %v4338_v42, %s7159_s6 }
 0x8aa   : > { %v3564_v3 = vadd.f32 %v3527_v1, %v3484_v23  ;;  %v9521_v5 = vpop.eup %7026  ;;  %v4088_v23 = vld [vmem:[#allocation4 + $0x18] sm:$0xff] }
 0x8ab   : > { %3582 = vst.msk [vmem:[#allocation5 + $0x58] sm:$0xff] %vm3570_vm8, %v3565_v16  ;;  %v6338_v4 = vpop.f32.mrb[68].mxu0  ;;  %v6347_v31 = vpop.f32.mrb[52].mxu1  ;;  %v4104_v21 = vmul.f32 %v9442_v12, %v4088_v23  ;;  %v4090_v16 = vld [vmem:[#allocation4 + $0x28] sm:$0xff]  ;;  %v4109_v12 = vmul.f32 %v9431_v51, %v4093_v37 }
 0x8ac   : > { %3581 = vst.msk [vmem:[#allocation5 + $0x50] sm:$0xff] %vm3570_vm8, %v3564_v3  ;;  %v4348_v45 = vpop.f32.mrb[69].mxu0  ;;  %v3533_v43 = vpop.permute.xlu0 %3532  ;;  %4470 = vperm.xlu1 %6773, %v9505_v34  }
 0x8ad   : > { %v3567_v6 = vadd.f32 %v3533_v43, %v3487_v18  ;;  %v4378_v7 = vpop.f32.mrb[53].mxu1  ;;  %v3531_v44 = vpop.permute.xlu1 %3530  ;;  %4543 = vrot.lane.b32.xlu0 %v4348_v45, %s7159_s6 }
 0x8ae   : > { %v3566_v13 = vadd.f32 %v3531_v44, %v3486_v35  ;;  %v9527_v38 = vpop.eup %7028  ;;  %v4095_v35 = vld [vmem:[#allocation4 + $0x50] sm:$0xff] }
 0x8af   : > { %3584 = vst.msk [vmem:[#allocation5 + $0x68] sm:$0xff] %vm3570_vm8, %v3567_v6  ;;  %v6350_v17 = vpop.f32.mrb[54].mxu1  ;;  %v4094_v6 = vld [vmem:[#allocation4 + $0x48] sm:$0xff] }
 0x8b0   : > { %3583 = vst.msk [vmem:[#allocation5 + $0x60] sm:$0xff] %vm3570_vm8, %v3566_v13  ;;  %v3537_v54 = vpop.permute.xlu0 %3536  ;;  %4480 = vperm.xlu1 %6773, %v9513_v28   ;;  %v4388_v14 = vpop.f32.mrb[55].mxu1  ;;  %v4110_v51 = vmul.f32 %v9505_v34, %v4094_v6 }
 0x8b1   : > { %v3569_v53 = vadd.f32 %v3537_v54, %v3489_v15  ;;  %v3535_v47 = vpop.permute.xlu1 %3534  ;;  %4547 = vrot.lane.b32.xlu0 %v4358_v56, %s7159_s6  ;;  %v4103_v56 = vmul.f32 %v9433_v58, %v4087_v25  ;;  %v4099_v54 = vld [vmem:[#allocation4 + $0x70] sm:$0xff] }
 0x8b2   : > { %v3568_v11 = vadd.f32 %v3535_v47, %v3488_v46  ;;  %v4115_v34 = vmul.f32 %v9466_v20, %v4099_v54  ;;  %v4098_v47 = vld [vmem:[#allocation4 + $0x68] sm:$0xff] }
 0x8b3   : > { %3586 = vst.msk [vmem:[#allocation5 + $0x78] sm:$0xff] %vm3570_vm8, %v3569_v53  ;;  %v6353_v29 = vpop.f32.mrb[56].mxu1 }
 0x8b4   : > { %3585 = vst.msk [vmem:[#allocation5 + $0x70] sm:$0xff] %vm3570_vm8, %v3568_v11  ;;  %4490 = vperm.xlu1 %6773, %v9521_v5   ;;  %v4398_v27 = vpop.f32.mrb[57].mxu1 }
 0x8b5   : > { %4551 = vrot.lane.b32.xlu0 %v4368_v62, %s7159_s6 }
 0x8b7   : > { %v4419_v6 = vld [vmem:[#allocation5 + $0x60] sm:$0xff] }
 0x8b8   : > { %4500 = vperm.xlu1 %6773, %v9527_v38  }
 0x8b9   : > { %4555 = vrot.lane.b32.xlu0 %v4378_v7, %s7159_s6 }
 0x8bc   : > { %4537 = vrot.lane.b32.xlu1 %v9483_v49, %s7159_s6  ;;  %v4086_v49 = vld [vmem:[#allocation4 + $0x8] sm:$0xff] }
 0x8bd   : > { %4559 = vrot.lane.b32.xlu0 %v4388_v14, %s7159_s6  ;;  %v4102_v50 = vmul.f32 %v9417_v9, %v4086_v49  ;;  %v4100_v49 = vld [vmem:[#allocation4 + $0x78] sm:$0xff] }
 0x8c0   : > { %4541 = vrot.lane.b32.xlu1 %v6335_v40, %s7159_s6 }
 0x8c1   : > { %4563 = vrot.lane.b32.xlu0 %v4398_v27, %s7159_s6 }
 0x8c4   : > { %4545 = vrot.lane.b32.xlu1 %v6338_v4, %s7159_s6 }
 0x8c8   : > { %4549 = vrot.lane.b32.xlu1 %v9485_v36, %s7159_s6  ;;  %v4085_v36 = vld [vmem:[#allocation4] sm:$0xff] }
 0x8c9   : > { %v4101_v0 = vmul.f32 %v9415_v61, %v4085_v36  ;;  %v4107_v61 = vmul.f32 %v9479_v10, %v4091_v48  ;;  %v4108_v10 = vmul.f32 %v9494_v59, %v4092_v32  ;;  %v4113_v59 = vmul.f32 %v9453_v41, %v4097_v30  ;;  %v4411_v48 = vld [vmem:[#allocation5 + $0x20] sm:$0xff] }
 0x8ca   : > { %v4114_v41 = vmul.f32 %v9521_v5, %v4098_v47 }
 0x8cc   : > { %4553 = vrot.lane.b32.xlu1 %v6344_v57, %s7159_s6  ;;  %v4105_v57 = vmul.f32 %v9455_v26, %v4089_v24  ;;  %v4106_v26 = vmul.f32 %v9468_v2, %v4090_v16  ;;  %v4111_v2 = vmul.f32 %v9440_v39, %v4095_v35  ;;  %v4112_v39 = vmul.f32 %v9513_v28, %v4096_v19 }
 0x8cd   : > { %v4116_v28 = vmul.f32 %v9527_v38, %v4100_v49  ;;  %v4409_v38 = vld [vmem:[#allocation5 + $0x10] sm:$0xff]  ;;  %v4414_v49 = vld [vmem:[#allocation5 + $0x38] sm:$0xff] }
 0x8d0   : > { %4557 = vrot.lane.b32.xlu1 %v6347_v31, %s7159_s6 }
 0x8d4   : > { %4561 = vrot.lane.b32.xlu1 %v6350_v17, %s7159_s6 }
 0x8d8   : > { %4565 = vrot.lane.b32.xlu1 %v6353_v29, %s7159_s6 }
 0x8ea   : > { %v4120_v33 = vpop.xlane.xlu0 %4119 }
 0x8eb   : > { %v4150_v60 = vadd.f32 %v4120_v33, %v4102_v50 }
 0x8ed   : > { %4167 = vst.msk [vmem:[#allocation4 + $0x8] sm:$0xff] %vm4165_vm6, %v4150_v60 }
 0x8ee   : > { %v4122_v8 = vpop.xlane.xlu0 %4121 }
 0x8ef   : > { %v4151_v52 = vadd.f32 %v4122_v8, %v4103_v56 }
 0x8f0   : > { %v4118_v22 = vpop.xlane.xlu1 %4117 }
 0x8f1   : > { %4168 = vst.msk [vmem:[#allocation4 + $0x10] sm:$0xff] %vm4165_vm6, %v4151_v52  ;;  %v4149_v40 = vadd.f32 %v4118_v22, %v4101_v0  ;;  %v4407_v22 = vld [vmem:[#allocation5] sm:$0xff] }
 0x8f2   : > { %v4126_v9 = vpop.xlane.xlu0 %4125 }
 0x8f3   : > { %4166 = vst.msk [vmem:[#allocation4] sm:$0xff] %vm4165_vm6, %v4149_v40  ;;  %v4153_v42 = vadd.f32 %v4126_v9, %v4105_v57 }
 0x8f4   : > { %v4124_v58 = vpop.xlane.xlu1 %4123 }
 0x8f5   : > { %4170 = vst.msk [vmem:[#allocation4 + $0x20] sm:$0xff] %vm4165_vm6, %v4153_v42  ;;  %v4152_v63 = vadd.f32 %v4124_v58, %v4104_v21 }
 0x8f6   : > { %v4130_v55 = vpop.xlane.xlu0 %4129 }
 0x8f7   : > { %4169 = vst.msk [vmem:[#allocation4 + $0x18] sm:$0xff] %vm4165_vm6, %v4152_v63  ;;  %v4155_v62 = vadd.f32 %v4130_v55, %v4107_v61 }
 0x8f8   : > { %v4128_v1 = vpop.xlane.xlu1 %4127 }
 0x8f9   : > { %4172 = vst.msk [vmem:[#allocation4 + $0x30] sm:$0xff] %vm4165_vm6, %v4155_v62  ;;  %v4154_v3 = vadd.f32 %v4128_v1, %v4106_v26  ;;  %v4413_v62 = vld [vmem:[#allocation5 + $0x30] sm:$0xff] }
 0x8fa   : > { %v4134_v18 = vpop.xlane.xlu0 %4133 }
 0x8fb   : > { %4171 = vst.msk [vmem:[#allocation4 + $0x28] sm:$0xff] %vm4165_vm6, %v4154_v3  ;;  %v4157_v4 = vadd.f32 %v4134_v18, %v4109_v12  ;;  %v4415_v12 = vld [vmem:[#allocation5 + $0x40] sm:$0xff] }
 0x8fc   : > { %v4132_v31 = vpop.xlane.xlu1 %4131 }
 0x8fd   : > { %4174 = vst.msk [vmem:[#allocation4 + $0x40] sm:$0xff] %vm4165_vm6, %v4157_v4  ;;  %v4156_v45 = vadd.f32 %v4132_v31, %v4108_v10  ;;  %v4417_v31 = vld [vmem:[#allocation5 + $0x50] sm:$0xff] }
 0x8fe   : > { %v4138_v43 = vpop.xlane.xlu0 %4137 }
 0x8ff   : > { %4173 = vst.msk [vmem:[#allocation4 + $0x38] sm:$0xff] %vm4165_vm6, %v4156_v45  ;;  %v4159_v7 = vadd.f32 %v4138_v43, %v4111_v2 }
 0x900   : > { %v4136_v44 = vpop.xlane.xlu1 %4135 }
 0x901   : > { %4176 = vst.msk [vmem:[#allocation4 + $0x50] sm:$0xff] %vm4165_vm6, %v4159_v7  ;;  %v4158_v13 = vadd.f32 %v4136_v44, %v4110_v51  ;;  %v4408_v44 = vld [vmem:[#allocation5 + $0x8] sm:$0xff] }
 0x902   : > { %v4142_v15 = vpop.xlane.xlu0 %4141 }
 0x903   : > { %4175 = vst.msk [vmem:[#allocation4 + $0x48] sm:$0xff] %vm4165_vm6, %v4158_v13  ;;  %v4161_v17 = vadd.f32 %v4142_v15, %v4113_v59  ;;  %v4421_v15 = vld [vmem:[#allocation5 + $0x70] sm:$0xff] }
 0x904   : > { %v4140_v46 = vpop.xlane.xlu1 %4139 }
 0x905   : > { %4178 = vst.msk [vmem:[#allocation4 + $0x60] sm:$0xff] %vm4165_vm6, %v4161_v17  ;;  %v4160_v14 = vadd.f32 %v4140_v46, %v4112_v39  ;;  %v4410_v46 = vld [vmem:[#allocation5 + $0x18] sm:$0xff] }
 0x906   : > { %v4146_v53 = vpop.xlane.xlu0 %4145 }
 0x907   : > { %4177 = vst.msk [vmem:[#allocation4 + $0x58] sm:$0xff] %vm4165_vm6, %v4160_v14  ;;  %v4163_v11 = vadd.f32 %v4146_v53, %v4115_v34 }
 0x908   : > { %v4144_v29 = vpop.xlane.xlu1 %4143 }
 0x909   : > { %4180 = vst.msk [vmem:[#allocation4 + $0x70] sm:$0xff] %vm4165_vm6, %v4163_v11  ;;  %v4162_v27 = vadd.f32 %v4144_v29, %v4114_v41  ;;  %v4412_v11 = vld [vmem:[#allocation5 + $0x28] sm:$0xff] }
 0x90b   : > { %4179 = vst.msk [vmem:[#allocation4 + $0x68] sm:$0xff] %vm4165_vm6, %v4162_v27 }
 0x90c   : > { %v4148_v50 = vpop.xlane.xlu1 %4147 }
 0x90d   : > { %v4164_v33 = vadd.f32 %v4148_v50, %v4116_v28 }
 0x90e   : > { %v4426_v60 = vpop.permute.xlu0 %4425 }
 0x90f   : > { %4181 = vst.msk [vmem:[#allocation4 + $0x78] sm:$0xff] %vm4165_vm6, %v4164_v33  ;;  %v4503_v40 = vmul.f32 %v4426_v60, %v4407_v22  ;;  %v4416_v60 = vld [vmem:[#allocation5 + $0x48] sm:$0xff] }
 0x910   : > { %v4431_v20 = vpop.permute.xlu1 %4430 }
 0x911   : > { %v4504_v13 = vmul.f32 %v4431_v20, %v4408_v44  ;;  %v4642_v44 = vld [vmem:[#allocation4 + $0x30] sm:$0xff] (!%p5739_p1) }
 0x912   : > { %v4466_v25 = vpop.permute.xlu0 %4465 }
 0x913   : > { %v4511_v32 = vmul.f32 %v4466_v25, %v4415_v12  ;;  %v4640_v12 = vld [vmem:[#allocation4 + $0x20] sm:$0xff] (!%p5739_p1) }
 0x914   : > { %v4436_v56 = vpop.permute.xlu1 %4435 }
 0x915   : > { %v4505_v42 = vmul.f32 %v4436_v56, %v4409_v38 }
 0x916   : > { %v4476_v8 = vpop.permute.xlu0 %4475 }
 0x917   : > { %v4513_v45 = vmul.f32 %v4476_v8, %v4417_v31  ;;  %v4418_v8 = vld [vmem:[#allocation5 + $0x58] sm:$0xff] }
 0x918   : > { %v4441_v36 = vpop.permute.xlu1 %4440 }
 0x919   : > { %v4506_v14 = vmul.f32 %v4441_v36, %v4410_v46  ;;  %v7162_v46 = vmov (!%p5739_p1), 2  }
 0x91a   : > { %v4486_v5 = vpop.permute.xlu0 %4485 }
 0x91b   : > { %v4515_v51 = vmul.f32 %v4486_v5, %v4419_v6 }
 0x91c   : > { %v4446_v52 = vpop.permute.xlu1 %4445 }
 0x91d   : > { %v4507_v61 = vmul.f32 %v4446_v52, %v4411_v48  ;;  %v7160_v48 = vmov (!%p5739_p1), 0  }
 0x91e   : > { %v4496_v0 = vpop.permute.xlu0 %4495  ;;  %7031 = vset.pattern.permute.xlu1 (!%p5739_p1), %v7160_v48  ;;  %7030 = vset.pattern.permute.xlu0 (!%p5739_p1), %v7160_v48 }
 0x91f   : > { %v4517_v17 = vmul.f32 %v4496_v0, %v4421_v15  ;;  %v4420_v0 = vld [vmem:[#allocation5 + $0x68] sm:$0xff]  ;;  %v4651_v15 = vld [vmem:[#allocation4 + $0x78] sm:$0xff] (!%p5739_p1) }
 0x920   : > { %v4451_v24 = vpop.permute.xlu1 %4450 }
 0x921   : > { %v4508_v41 = vmul.f32 %v4451_v24, %v4412_v11  ;;  %v5295_v11 = vld [vmem:[%s9834_s4 + $0x18] sm:$0xff] (!%p5739_p1) }
 0x922   : > { %v4536_v57 = vpop.permute.xlu0 %4535 }
 0x923   : > { %v4583_v9 = vadd.f32 %v4536_v57, %v4503_v40  ;;  %v4422_v57 = vld [vmem:[#allocation5 + $0x78] sm:$0xff] }
 0x924   : > { %v4456_v23 = vpop.permute.xlu1 %4455 }
 0x925   : > { %4600 = vst.msk [vmem:[#allocation5] sm:$0xff] %vm4599_vm9, %v4583_v9  ;;  %v4509_v1 = vmul.f32 %v4456_v23, %v4413_v62  ;;  %v4639_v62 = vld [vmem:[#allocation4 + $0x18] sm:$0xff] (!%p5739_p1) }
 0x926   : > { %v4540_v21 = vpop.permute.xlu0 %4539 }
 0x927   : > { %v4585_v58 = vadd.f32 %v4540_v21, %v4505_v42  ;;  %v4637_v42 = vld [vmem:[#allocation4 + $0x8] sm:$0xff] (!%p5739_p1)  ;;  %v4636_v21 = vld [vmem:[#allocation4] sm:$0xff] (!%p5739_p1) }
 0x928   : > { %v4461_v63 = vpop.permute.xlu1 %4460  ;;  %7044 = vrcp.f32 (!%p5739_p1), %v4637_v42 }
 0x929   : > { %4602 = vst.msk [vmem:[#allocation5 + $0x10] sm:$0xff] %vm4599_vm9, %v4585_v58  ;;  %v4510_v28 = vmul.f32 %v4461_v63, %v4414_v49  ;;  %v4645_v58 = vld [vmem:[#allocation4 + $0x48] sm:$0xff] (!%p5739_p1)  ;;  %v4644_v63 = vld [vmem:[#allocation4 + $0x40] sm:$0xff] (!%p5739_p1)  ;;  %7046 = vrcp.f32 (!%p5739_p1), %v4636_v21 }
 0x92a   : > { %v4544_v55 = vpop.permute.xlu0 %4543  ;;  %7048 = vrcp.f32 (!%p5739_p1), %v4645_v58 }
 0x92b   : > { %v4587_v16 = vadd.f32 %v4544_v55, %v4507_v61  ;;  %7050 = vrcp.f32 (!%p5739_p1), %v4644_v63  ;;  %v4646_v61 = vld [vmem:[#allocation4 + $0x50] sm:$0xff] (!%p5739_p1) }
 0x92c   : > { %v4471_v26 = vpop.permute.xlu1 %4470  ;;  %v4638_v55 = vld [vmem:[#allocation4 + $0x10] sm:$0xff] (!%p5739_p1)  ;;  %7052 = vrcp.f32 (!%p5739_p1), %v4646_v61 }
 0x92d   : > { %4604 = vst.msk [vmem:[#allocation5 + $0x20] sm:$0xff] %vm4599_vm9, %v4587_v16  ;;  %v4512_v20 = vmul.f32 %v4471_v26, %v4416_v60  ;;  %7054 = vrcp.f32 (!%p5739_p1), %v4638_v55  ;;  %v4647_v16 = vld [vmem:[#allocation4 + $0x58] sm:$0xff] (!%p5739_p1) }
 0x92e   : > { %v4548_v37 = vpop.permute.xlu0 %4547  ;;  %7056 = vrcp.f32 (!%p5739_p1), %v4647_v16 }
 0x92f   : > { %v4589_v3 = vadd.f32 %v4548_v37, %v4509_v1  ;;  %7058 = vrcp.f32 (!%p5739_p1), %v4639_v62  ;;  %v4648_v37 = vld [vmem:[#allocation4 + $0x60] sm:$0xff] (!%p5739_p1) }
 0x930   : > { %v4481_v18 = vpop.permute.xlu1 %4480  ;;  %7060 = vrcp.f32 (!%p5739_p1), %v4648_v37 }
 0x931   : > { %4606 = vst.msk [vmem:[#allocation5 + $0x30] sm:$0xff] %vm4599_vm9, %v4589_v3  ;;  %v4514_v36 = vmul.f32 %v4481_v18, %v4418_v8  ;;  %7062 = vrcp.f32 (!%p5739_p1), %v4640_v12 }
 0x932   : > { %v4552_v4 = vpop.permute.xlu0 %4551  ;;  %v9594_v26 = vpop.eup (!%p5739_p1), %7044 }
 0x933   : > { %v4591_v10 = vadd.f32 %v4552_v4, %v4511_v32  ;;  %v9596_v1 = vpop.eup (!%p5739_p1), %7046  ;;  %4691 = vperm.xlu1 (!%p5739_p1), %7031, %v9594_v26   ;;  %v4649_v32 = vld [vmem:[#allocation4 + $0x68] sm:$0xff] (!%p5739_p1) }
 0x934   : > { %v4491_v35 = vpop.permute.xlu1 %4490  ;;  %v9599_v3 = vpop.eup (!%p5739_p1), %7048  ;;  %4686 = vperm.xlu0 (!%p5739_p1), %7030, %v9596_v1   ;;  %7064 = vrcp.f32 (!%p5739_p1), %v4649_v32 }
 0x935   : > { %4608 = vst.msk [vmem:[#allocation5 + $0x40] sm:$0xff] %vm4599_vm9, %v4591_v10  ;;  %v4516_v22 = vmul.f32 %v4491_v35, %v4420_v0  ;;  %v9602_v18 = vpop.eup (!%p5739_p1), %7050  ;;  %v4641_v10 = vld [vmem:[#allocation4 + $0x28] sm:$0xff] (!%p5739_p1) }
 0x936   : > { %v4556_v2 = vpop.permute.xlu0 %4555  ;;  %v9605_v4 = vpop.eup (!%p5739_p1), %7052  ;;  %7066 = vrcp.f32 (!%p5739_p1), %v4641_v10 }
 0x937   : > { %v4593_v43 = vadd.f32 %v4556_v2, %v4513_v45  ;;  %4731 = vperm.xlu1 (!%p5739_p1), %7031, %v9599_v3   ;;  %v9608_v31 = vpop.eup (!%p5739_p1), %7054  ;;  %v4650_v45 = vld [vmem:[#allocation4 + $0x70] sm:$0xff] (!%p5739_p1) }
 0x938   : > { %v4501_v7 = vpop.permute.xlu1 %4500  ;;  %4726 = vperm.xlu0 (!%p5739_p1), %7030, %v9602_v18   ;;  %v9611_v35 = vpop.eup (!%p5739_p1), %7056  ;;  %7068 = vrcp.f32 (!%p5739_p1), %v4650_v45 }
 0x939   : > { %4610 = vst.msk [vmem:[#allocation5 + $0x50] sm:$0xff] %vm4599_vm9, %v4593_v43  ;;  %v4518_v9 = vmul.f32 %v4501_v7, %v4422_v57  ;;  %v9614_v2 = vpop.eup (!%p5739_p1), %7058  ;;  %7070 = vrcp.f32 (!%p5739_p1), %v4642_v44  ;;  %v4674_v44 = vld [vmem:[#allocation5 + $0x30] sm:$0xff] (!%p5739_p1) }
 0x93a   : > { %v4560_v30 = vpop.permute.xlu0 %4559  ;;  %v9617_v43 = vpop.eup (!%p5739_p1), %7060 }
 0x93b   : > { %v4595_v59 = vadd.f32 %v4560_v30, %v4515_v51  ;;  %4736 = vperm.xlu1 (!%p5739_p1), %7031, %v9605_v4   ;;  %v9620_v6 = vpop.eup (!%p5739_p1), %7062 }
 0x93c   : > { %v4538_v19 = vpop.permute.xlu1 %4537  ;;  %4696 = vperm.xlu0 (!%p5739_p1), %7030, %v9608_v31  }
 0x93d   : > { %4612 = vst.msk [vmem:[#allocation5 + $0x60] sm:$0xff] %vm4599_vm9, %v4595_v59  ;;  %v4584_v39 = vadd.f32 %v4538_v19, %v4504_v13  ;;  %v4643_v13 = vld [vmem:[#allocation4 + $0x38] sm:$0xff] (!%p5739_p1)  ;;  %v7161_v59 = vmov (!%p5739_p1), 1  }
 0x93e   : > { %v4564_v54 = vpop.permute.xlu0 %4563  ;;  %v9623_v7 = vpop.eup (!%p5739_p1), %7064  ;;  %7072 = vrcp.f32 (!%p5739_p1), %v4643_v13 }
 0x93f   : > { %4601 = vst.msk [vmem:[#allocation5 + $0x8] sm:$0xff] %vm4599_vm9, %v4584_v39  ;;  %v4597_v34 = vadd.f32 %v4564_v54, %v4517_v17  ;;  %4741 = vperm.xlu1 (!%p5739_p1), %7031, %v9611_v35   ;;  %7074 = vrcp.f32 (!%p5739_p1), %v4651_v15  ;;  %v7163_v54 = vmov (!%p5739_p1), 3  }
 0x940   : > { %v4542_v53 = vpop.permute.xlu1 %4541  ;;  %4701 = vperm.xlu0 (!%p5739_p1), %7030, %v9614_v2   ;;  %v9626_v51 = vpop.eup (!%p5739_p1), %7066 }
 0x941   : > { %4614 = vst.msk [vmem:[#allocation5 + $0x70] sm:$0xff] %vm4599_vm9, %v4597_v34  ;;  %v4586_v47 = vadd.f32 %v4542_v53, %v4506_v14  ;;  %v5292_v14 = vld [vmem:[%s9834_s4] sm:$0xff] (!%p5739_p1)  ;;  %v5293_v34 = vld [vmem:[%s9834_s4 + $0x8] sm:$0xff] (!%p5739_p1) }
 0x942   : > { %v7069_v30 = vpop.eup (!%p5739_p1), %7068  ;;  %v6522_v53 = vpack.c.bf16 (!%p5739_p1), %v5293_v34, %v5292_v14 }
 0x943   : > { %4603 = vst.msk [vmem:[#allocation5 + $0x18] sm:$0xff] %vm4599_vm9, %v4586_v47  ;;  %4746 = vperm.xlu1 (!%p5739_p1), %7031, %v9617_v43   ;;  %v9633_v19 = vpop.eup (!%p5739_p1), %7070  ;;  %v5294_v47 = vld [vmem:[%s9834_s4 + $0x10] sm:$0xff] (!%p5739_p1) }
 0x944   : > { %v4546_v29 = vpop.permute.xlu1 %4545  ;;  %4706 = vperm.xlu0 (!%p5739_p1), %7030, %v9620_v6   ;;  %6550 = vmatprep.subr.bf16.mxu1 (!%p5739_p1), %v6522_v53  ;;  %v4680_v58 = vld [vmem:[#allocation5 + $0x60] sm:$0xff] (!%p5739_p1) }
 0x945   : > { %v4588_v27 = vadd.f32 %v4546_v29, %v4508_v41  ;;  %6552 = vmatpush3.bf16.msra.mxu1 (!%p5739_p1), %v6522_v53  ;;  %6523 = vmatprep.subr.bf16.mxu0 (!%p5739_p1), %v6522_v53  ;;  %v6526_v41 = vpack.c.bf16 (!%p5739_p1), %v5295_v11, %v5294_v47 }
 0x946   : > { %6525 = vmatpush3.bf16.msra.mxu0 (!%p5739_p1), %v6522_v53  ;;  %v4669_v29 = vld [vmem:[#allocation5 + $0x8] sm:$0xff] (!%p5739_p1) }
 0x947   : > { %4605 = vst.msk [vmem:[#allocation5 + $0x28] sm:$0xff] %vm4599_vm9, %v4588_v27  ;;  %4751 = vperm.xlu1 (!%p5739_p1), %7031, %v9623_v7   ;;  %6551 = vmatprep.subr.bf16.mxu1 (!%p5739_p1), %v6526_v41  ;;  %v4668_v27 = vld [vmem:[#allocation5] sm:$0xff] (!%p5739_p1) }
 0x948   : > { %v4550_v50 = vpop.permute.xlu1 %4549  ;;  %4711 = vperm.xlu0 (!%p5739_p1), %7030, %v9626_v51   ;;  %v9638_v17 = vpop.eup (!%p5739_p1), %7072  ;;  %6527 = vmatprep.subr.bf16.mxu0 (!%p5739_p1), %v6526_v41  ;;  %v4682_v32 = vld [vmem:[#allocation5 + $0x70] sm:$0xff] (!%p5739_p1) }
 0x949   : > { %v4590_v33 = vadd.f32 %v4550_v50, %v4510_v28  ;;  %v7075_v39 = vpop.eup (!%p5739_p1), %7074  ;;  %6553 = vmatpush3.bf16.msra.mxu1 (!%p5739_p1), %v6526_v41 }
 0x94a   : > { %6529 = vmatpush3.bf16.msra.mxu0 (!%p5739_p1), %v6526_v41 }
 0x94b   : > { %4607 = vst.msk [vmem:[#allocation5 + $0x38] sm:$0xff] %vm4599_vm9, %v4590_v33  ;;  %7032 = vset.pattern.permute.xlu1 (!%p5739_p1), %v7161_v59 }
 0x94c   : > { %v4554_v25 = vpop.permute.xlu1 %4553  ;;  %4756 = vperm.xlu0 (!%p5739_p1), %7030, %v7069_v30   ;;  %4886 = vperm.xlu1 (!%p5739_p1), %7032, %v9602_v18  }
 0x94d   : > { %v4592_v56 = vadd.f32 %v4554_v25, %v4512_v20  ;;  %v4676_v20 = vld [vmem:[#allocation5 + $0x40] sm:$0xff] (!%p5739_p1) }
 0x94f   : > { %4609 = vst.msk [vmem:[#allocation5 + $0x48] sm:$0xff] %vm4599_vm9, %v4592_v56 }
 0x950   : > { %v4558_v5 = vpop.permute.xlu1 %4557  ;;  %7034 = vset.pattern.permute.xlu0 (!%p5739_p1), %v7161_v59  ;;  %4851 = vperm.xlu1 (!%p5739_p1), %7032, %v9594_v26  }
 0x951   : > { %v4594_v52 = vadd.f32 %v4558_v5, %v4514_v36  ;;  %4846 = vperm.xlu0 (!%p5739_p1), %7034, %v9596_v1   ;;  %v4678_v5 = vld [vmem:[#allocation5 + $0x50] sm:$0xff] (!%p5739_p1) }
 0x953   : > { %4611 = vst.msk [vmem:[#allocation5 + $0x58] sm:$0xff] %vm4599_vm9, %v4594_v52  ;;  %v4670_v52 = vld [vmem:[#allocation5 + $0x10] sm:$0xff] (!%p5739_p1) }
 0x954   : > { %v4562_v24 = vpop.permute.xlu1 %4561  ;;  %7033 = vset.pattern.permute.xlu1 (!%p5739_p1), %v7160_v48  ;;  %v4672_v48 = vld [vmem:[#allocation5 + $0x20] sm:$0xff] (!%p5739_p1) }
 0x955   : > { %v4596_v40 = vadd.f32 %v4562_v24, %v4516_v22  ;;  %4635 = sbr.rel (%p5739_p1) target bundleno = 2856 (0xb28), region = 86  ;;  %4891 = vperm.xlu0 (!%p5739_p1), %7034, %v9599_v3   ;;  %4716 = vperm.xlu1 (!%p5739_p1), %7033, %v9633_v19  }
 0x956   : > { %v4677_v60 = vld [vmem:[#allocation5 + $0x48] sm:$0xff] (!%p5739_p1) }
 0x957   : > { %4613 = vst.msk [vmem:[#allocation5 + $0x68] sm:$0xff] %vm4599_vm9, %v4596_v40 }
 0x958   : > { %v4566_v38 = vpop.permute.xlu1 %4565 }
 0x959   : > { %v4598_v23 = vadd.f32 %v4566_v38, %v4518_v9  ;;  %4856 = vperm.xlu0 (!%p5739_p1), %7034, %v9608_v31   ;;  %4721 = vperm.xlu1 (!%p5739_p1), %7033, %v9638_v17   ;;  %v4671_v9 = vld [vmem:[#allocation5 + $0x18] sm:$0xff] (!%p5739_p1) }
 0x95a   : > { %v4679_v57 = vld [vmem:[#allocation5 + $0x58] sm:$0xff] (!%p5739_p1) }
 0x95b   : > { %4615 = vst.msk [vmem:[#allocation5 + $0x78] sm:$0xff] %vm4599_vm9, %v4598_v23 }
 0x95d   : > { %4901 = vperm.xlu0 %7034, %v9611_v35   ;;  %4761 = vperm.xlu1 %7033, %v7075_v39  }
 0x95e   : > { %v4681_v62 = vld [vmem:[#allocation5 + $0x68] sm:$0xff] }
 0x961   : > { %4906 = vperm.xlu0 %7034, %v9617_v43   ;;  %7035 = vset.pattern.permute.xlu1 %v7161_v59 }
 0x962   : > { %4896 = vperm.xlu1 %7035, %v9605_v4   ;;  %v4683_v53 = vld [vmem:[#allocation5 + $0x78] sm:$0xff] }
 0x965   : > { %4911 = vperm.xlu0 %7034, %v9623_v7  }
 0x966   : > { %4861 = vperm.xlu1 %7035, %v9614_v2  }
 0x969   : > { %4876 = vperm.xlu0 %7034, %v9633_v19  }
 0x96a   : > { %4866 = vperm.xlu1 %7035, %v9620_v6  }
 0x96d   : > { %4921 = vperm.xlu0 %7034, %v7075_v39  }
 0x96e   : > { %4871 = vperm.xlu1 %7035, %v9626_v51  }
 0x971   : > { %7038 = vset.pattern.permute.xlu0 %v7162_v46 }
 0x972   : > { %5046 = vperm.xlu0 %7038, %v9602_v18   ;;  %7036 = vset.pattern.permute.xlu1 %v7162_v46 }
 0x973   : > { %5006 = vperm.xlu1 %7036, %v9596_v1  }
 0x976   : > { %5056 = vperm.xlu0 %7038, %v9605_v4  }
 0x977   : > { %5011 = vperm.xlu1 %7036, %v9594_v26  }
 0x97a   : > { %5026 = vperm.xlu0 %7038, %v9620_v6  }
 0x97b   : > { %5051 = vperm.xlu1 %7036, %v9599_v3  }
 0x97e   : > { %5031 = vperm.xlu0 %7038, %v9626_v51  }
 0x97f   : > { %7037 = vset.pattern.permute.xlu1 %v7161_v59 }
 0x980   : > { %4916 = vperm.xlu1 %7037, %v7069_v30  }
 0x982   : > { %5076 = vperm.xlu0 %7038, %v7069_v30  }
 0x984   : > { %4881 = vperm.xlu1 %7037, %v9638_v17  }
 0x986   : > { %7042 = vset.pattern.permute.xlu0 %v7163_v54 }
 0x987   : > { %5166 = vperm.xlu0 %7042, %v9596_v1  }
 0x988   : > { %7039 = vset.pattern.permute.xlu1 %v7162_v46 }
 0x989   : > { %5016 = vperm.xlu1 %7039, %v9608_v31  }
 0x98b   : > { %5211 = vperm.xlu0 %7042, %v9599_v3  }
 0x98d   : > { %5021 = vperm.xlu1 %7039, %v9614_v2  }
 0x98f   : > { %5176 = vperm.xlu0 %7042, %v9608_v31  }
 0x991   : > { %5061 = vperm.xlu1 %7039, %v9611_v35  }
 0x993   : > { %5221 = vperm.xlu0 %7042, %v9611_v35  }
 0x995   : > { %5066 = vperm.xlu1 %7039, %v9617_v43  }
 0x997   : > { %5226 = vperm.xlu0 %7042, %v9617_v43  }
 0x999   : > { %5071 = vperm.xlu1 %7039, %v9623_v7  }
 0x99b   : > { %5231 = vperm.xlu0 %7042, %v9623_v7  }
 0x99d   : > { %7040 = vset.pattern.permute.xlu1 %v7163_v54 }
 0x99e   : > { %5206 = vperm.xlu1 %7040, %v9602_v18  }
 0x99f   : > { %5236 = vperm.xlu0 %7042, %v7069_v30  }
 0x9a2   : > { %5171 = vperm.xlu1 %7040, %v9594_v26   ;;  %v4673_v26 = vld [vmem:[#allocation5 + $0x28] sm:$0xff] }
 0x9a3   : > { %5241 = vperm.xlu0 %7042, %v7075_v39  }
 0x9a6   : > { %7041 = vset.pattern.permute.xlu1 %v7162_v46 }
 0x9a7   : > { %5036 = vperm.xlu1 %7041, %v9633_v19  }
 0x9ab   : > { %5041 = vperm.xlu1 %7041, %v9638_v17  }
 0x9af   : > { %5081 = vperm.xlu1 %7041, %v7075_v39   ;;  %v4675_v39 = vld [vmem:[#allocation5 + $0x38] sm:$0xff] }
 0x9b2   : > { %v4692_v49 = vpop.permute.xlu1 %4691 }
 0x9b3   : > { %v4765_v28 = vmul.f32 %v4692_v49, %v4669_v29  ;;  %7043 = vset.pattern.permute.xlu1 %v7163_v54  ;;  %v4687_v50 = vpop.permute.xlu0 %4686 }
 0x9b4   : > { %v4764_v33 = vmul.f32 %v4687_v50, %v4668_v27  ;;  %5216 = vperm.xlu1 %7043, %v9605_v4  }
 0x9b5   : > { %4781 = vst.msk [vmem:[#allocation5 + $0x8] sm:$0xff] %vm693_vm2, %v4765_v28 }
 0x9b6   : > { %4780 = vst.msk [vmem:[#allocation5] sm:$0xff] %vm693_vm2, %v4764_v33  ;;  %v4732_v25 = vpop.permute.xlu1 %4731 }
 0x9b7   : > { %v4773_v56 = vmul.f32 %v4732_v25, %v4677_v60  ;;  %v4727_v8 = vpop.permute.xlu0 %4726 }
 0x9b8   : > { %v4772_v36 = vmul.f32 %v4727_v8, %v4676_v20  ;;  %5181 = vperm.xlu1 %7043, %v9614_v2  }
 0x9b9   : > { %4789 = vst.msk [vmem:[#allocation5 + $0x48] sm:$0xff] %vm693_vm2, %v4773_v56 }
 0x9ba   : > { %4788 = vst.msk [vmem:[#allocation5 + $0x40] sm:$0xff] %vm693_vm2, %v4772_v36  ;;  %v4737_v0 = vpop.permute.xlu1 %4736 }
 0x9bb   : > { %v4774_v22 = vmul.f32 %v4737_v0, %v4678_v5  ;;  %v4697_v24 = vpop.permute.xlu0 %4696 }
 0x9bc   : > { %v4766_v40 = vmul.f32 %v4697_v24, %v4670_v52  ;;  %5186 = vperm.xlu1 %7043, %v9620_v6   ;;  %v4829_v2 = vld [vmem:[#allocation5 + $0x8] sm:$0xff] }
 0x9bd   : > { %4790 = vst.msk [vmem:[#allocation5 + $0x50] sm:$0xff] %vm693_vm2, %v4774_v22  ;;  %v4828_v45 = vld [vmem:[#allocation5] sm:$0xff] }
 0x9be   : > { %4782 = vst.msk [vmem:[#allocation5 + $0x10] sm:$0xff] %vm693_vm2, %v4766_v40  ;;  %v4742_v38 = vpop.permute.xlu1 %4741 }
 0x9bf   : > { %v4775_v23 = vmul.f32 %v4742_v38, %v4679_v57  ;;  %v4702_v42 = vpop.permute.xlu0 %4701 }
 0x9c0   : > { %v4767_v21 = vmul.f32 %v4702_v42, %v4671_v9  ;;  %5191 = vperm.xlu1 %7043, %v9626_v51   ;;  %v4837_v30 = vld [vmem:[#allocation5 + $0x48] sm:$0xff] }
 0x9c1   : > { %4791 = vst.msk [vmem:[#allocation5 + $0x58] sm:$0xff] %vm693_vm2, %v4775_v23  ;;  %v4836_v18 = vld [vmem:[#allocation5 + $0x40] sm:$0xff] }
 0x9c2   : > { %4783 = vst.msk [vmem:[#allocation5 + $0x18] sm:$0xff] %vm693_vm2, %v4767_v21  ;;  %v4747_v63 = vpop.permute.xlu1 %4746 }
 0x9c3   : > { %v4776_v61 = vmul.f32 %v4747_v63, %v4680_v58  ;;  %v4707_v55 = vpop.permute.xlu0 %4706 }
 0x9c4   : > { %v4768_v16 = vmul.f32 %v4707_v55, %v4672_v48  ;;  %5196 = vperm.xlu1 %7043, %v9633_v19   ;;  %v4838_v33 = vld [vmem:[#allocation5 + $0x50] sm:$0xff] }
 0x9c5   : > { %4792 = vst.msk [vmem:[#allocation5 + $0x60] sm:$0xff] %vm693_vm2, %v4776_v61 }
 0x9c6   : > { %4784 = vst.msk [vmem:[#allocation5 + $0x20] sm:$0xff] %vm693_vm2, %v4768_v16  ;;  %v4752_v1 = vpop.permute.xlu1 %4751 }
 0x9c7   : > { %v4777_v37 = vmul.f32 %v4752_v1, %v4681_v62  ;;  %v4712_v3 = vpop.permute.xlu0 %4711 }
 0x9c8   : > { %v4769_v12 = vmul.f32 %v4712_v3, %v4673_v26  ;;  %5201 = vperm.xlu1 %7043, %v9638_v17   ;;  %v4830_v17 = vld [vmem:[#allocation5 + $0x10] sm:$0xff]  ;;  %v4839_v47 = vld [vmem:[#allocation5 + $0x58] sm:$0xff] }
 0x9c9   : > { %4793 = vst.msk [vmem:[#allocation5 + $0x68] sm:$0xff] %vm693_vm2, %v4777_v37  ;;  %v4831_v5 = vld [vmem:[#allocation5 + $0x18] sm:$0xff] }
 0x9ca   : > { %4785 = vst.msk [vmem:[#allocation5 + $0x28] sm:$0xff] %vm693_vm2, %v4769_v12 }
 0x9cb   : > { %v4887_v4 = vpop.permute.xlu1 %4886  ;;  %v4757_v10 = vpop.permute.xlu0 %4756 }
 0x9cc   : > { %v4932_v31 = vmul.f32 %v4887_v4, %v4836_v18  ;;  %v4778_v35 = vmul.f32 %v4757_v10, %v4682_v32  ;;  %v4840_v49 = vld [vmem:[#allocation5 + $0x60] sm:$0xff] }
 0x9cd   : > { %v4832_v57 = vld [vmem:[#allocation5 + $0x20] sm:$0xff] }
 0x9ce   : > { %4948 = vst.msk [vmem:[#allocation5 + $0x40] sm:$0xff] %vm2541_vm7, %v4932_v31 }
 0x9cf   : > { %4794 = vst.msk [vmem:[#allocation5 + $0x70] sm:$0xff] %vm693_vm2, %v4778_v35  ;;  %v4852_v43 = vpop.permute.xlu1 %4851 }
 0x9d0   : > { %v4925_v6 = vmul.f32 %v4852_v43, %v4829_v2  ;;  %v4847_v7 = vpop.permute.xlu0 %4846  ;;  %v4841_v25 = vld [vmem:[#allocation5 + $0x68] sm:$0xff] }
 0x9d1   : > { %v4924_v51 = vmul.f32 %v4847_v7, %v4828_v45  ;;  %v4833_v58 = vld [vmem:[#allocation5 + $0x28] sm:$0xff] }
 0x9d2   : > { %4941 = vst.msk [vmem:[#allocation5 + $0x8] sm:$0xff] %vm2541_vm7, %v4925_v6 }
 0x9d3   : > { %4940 = vst.msk [vmem:[#allocation5] sm:$0xff] %vm2541_vm7, %v4924_v51 }
 0x9d4   : > { %v4892_v13 = vpop.permute.xlu0 %4891  ;;  %v4717_v59 = vpop.permute.xlu1 %4716 }
 0x9d5   : > { %v4933_v15 = vmul.f32 %v4892_v13, %v4837_v30  ;;  %v4770_v19 = vmul.f32 %v4717_v59, %v4674_v44  ;;  %v4996_v63 = vld [vmem:[#allocation5 + $0x40] sm:$0xff] }
 0x9d6   : > { %v4842_v44 = vld [vmem:[#allocation5 + $0x70] sm:$0xff] }
 0x9d7   : > { %4949 = vst.msk [vmem:[#allocation5 + $0x48] sm:$0xff] %vm2541_vm7, %v4933_v15 }
 0x9d8   : > { %4786 = vst.msk [vmem:[#allocation5 + $0x30] sm:$0xff] %vm693_vm2, %v4770_v19  ;;  %v4857_v46 = vpop.permute.xlu0 %4856  ;;  %v4722_v54 = vpop.permute.xlu1 %4721 }
 0x9d9   : > { %v4926_v14 = vmul.f32 %v4857_v46, %v4830_v17  ;;  %v4771_v34 = vmul.f32 %v4722_v54, %v4675_v39  ;;  %v4989_v12 = vld [vmem:[#allocation5 + $0x8] sm:$0xff] }
 0x9da   : > { %v4988_v62 = vld [vmem:[#allocation5] sm:$0xff] }
 0x9db   : > { %4942 = vst.msk [vmem:[#allocation5 + $0x10] sm:$0xff] %vm2541_vm7, %v4926_v14 }
 0x9dc   : > { %4787 = vst.msk [vmem:[#allocation5 + $0x38] sm:$0xff] %vm693_vm2, %v4771_v34  ;;  %v4902_v11 = vpop.permute.xlu0 %4901  ;;  %v4762_v41 = vpop.permute.xlu1 %4761 }
 0x9dd   : > { %v4935_v29 = vmul.f32 %v4902_v11, %v4839_v47  ;;  %v4779_v27 = vmul.f32 %v4762_v41, %v4683_v53 }
 0x9de   : > { %v4997_v45 = vld [vmem:[#allocation5 + $0x48] sm:$0xff] }
 0x9df   : > { %4951 = vst.msk [vmem:[#allocation5 + $0x58] sm:$0xff] %vm2541_vm7, %v4935_v29  ;;  %v4834_v0 = vld [vmem:[#allocation5 + $0x30] sm:$0xff] }
 0x9e0   : > { %4795 = vst.msk [vmem:[#allocation5 + $0x78] sm:$0xff] %vm693_vm2, %v4779_v27  ;;  %v4907_v28 = vpop.permute.xlu0 %4906 }
 0x9e1   : > { %v4936_v50 = vmul.f32 %v4907_v28, %v4840_v49  ;;  %v4897_v60 = vpop.permute.xlu1 %4896 }
 0x9e2   : > { %v4934_v20 = vmul.f32 %v4897_v60, %v4838_v33  ;;  %v4990_v14 = vld [vmem:[#allocation5 + $0x10] sm:$0xff] }
 0x9e3   : > { %4952 = vst.msk [vmem:[#allocation5 + $0x60] sm:$0xff] %vm2541_vm7, %v4936_v50  ;;  %v4835_v59 = vld [vmem:[#allocation5 + $0x38] sm:$0xff] }
 0x9e4   : > { %4950 = vst.msk [vmem:[#allocation5 + $0x50] sm:$0xff] %vm2541_vm7, %v4934_v20  ;;  %v4912_v56 = vpop.permute.xlu0 %4911 }
 0x9e5   : > { %v4937_v8 = vmul.f32 %v4912_v56, %v4841_v25  ;;  %v4862_v36 = vpop.permute.xlu1 %4861 }
 0x9e6   : > { %v4927_v52 = vmul.f32 %v4862_v36, %v4831_v5  ;;  %v4999_v60 = vld [vmem:[#allocation5 + $0x58] sm:$0xff] }
 0x9e7   : > { %4953 = vst.msk [vmem:[#allocation5 + $0x68] sm:$0xff] %vm2541_vm7, %v4937_v8  ;;  %v4843_v38 = vld [vmem:[#allocation5 + $0x78] sm:$0xff] }
 0x9e8   : > { %4943 = vst.msk [vmem:[#allocation5 + $0x18] sm:$0xff] %vm2541_vm7, %v4927_v52  ;;  %v4877_v22 = vpop.permute.xlu0 %4876 }
 0x9e9   : > { %v4930_v24 = vmul.f32 %v4877_v22, %v4834_v0  ;;  %v4867_v40 = vpop.permute.xlu1 %4866 }
 0x9ea   : > { %v4928_v9 = vmul.f32 %v4867_v40, %v4832_v57  ;;  %v5000_v52 = vld [vmem:[#allocation5 + $0x60] sm:$0xff] }
 0x9eb   : > { %4946 = vst.msk [vmem:[#allocation5 + $0x30] sm:$0xff] %vm2541_vm7, %v4930_v24  ;;  %v4998_v1 = vld [vmem:[#allocation5 + $0x50] sm:$0xff] }
 0x9ec   : > { %4944 = vst.msk [vmem:[#allocation5 + $0x20] sm:$0xff] %vm2541_vm7, %v4928_v9  ;;  %v4922_v23 = vpop.permute.xlu0 %4921 }
 0x9ed   : > { %v4939_v42 = vmul.f32 %v4922_v23, %v4843_v38  ;;  %v4872_v21 = vpop.permute.xlu1 %4871 }
 0x9ee   : > { %v4929_v48 = vmul.f32 %v4872_v21, %v4833_v58  ;;  %v5001_v40 = vld [vmem:[#allocation5 + $0x68] sm:$0xff] }
 0x9ef   : > { %4955 = vst.msk [vmem:[#allocation5 + $0x78] sm:$0xff] %vm2541_vm7, %v4939_v42  ;;  %v4991_v49 = vld [vmem:[#allocation5 + $0x18] sm:$0xff] }
 0x9f0   : > { %4945 = vst.msk [vmem:[#allocation5 + $0x28] sm:$0xff] %vm2541_vm7, %v4929_v48 }
 0x9f1   : > { %v5047_v61 = vpop.permute.xlu0 %5046 }
 0x9f2   : > { %v5092_v55 = vmul.f32 %v5047_v61, %v4996_v63  ;;  %v5007_v16 = vpop.permute.xlu1 %5006 }
 0x9f3   : > { %v5084_v26 = vmul.f32 %v5007_v16, %v4988_v62  ;;  %v4992_v4 = vld [vmem:[#allocation5 + $0x20] sm:$0xff] }
 0x9f4   : > { %5108 = vst.msk [vmem:[#allocation5 + $0x40] sm:$0xff] %vm3570_vm8, %v5092_v55 }
 0x9f5   : > { %5100 = vst.msk [vmem:[#allocation5] sm:$0xff] %vm3570_vm8, %v5084_v26  ;;  %v5057_v37 = vpop.permute.xlu0 %5056 }
 0x9f6   : > { %v5094_v3 = vmul.f32 %v5057_v37, %v4998_v1  ;;  %v5012_v18 = vpop.permute.xlu1 %5011 }
 0x9f7   : > { %v5085_v32 = vmul.f32 %v5012_v18, %v4989_v12  ;;  %v4993_v43 = vld [vmem:[#allocation5 + $0x28] sm:$0xff]  ;;  %v4994_v18 = vld [vmem:[#allocation5 + $0x30] sm:$0xff] }
 0x9f8   : > { %5110 = vst.msk [vmem:[#allocation5 + $0x50] sm:$0xff] %vm3570_vm8, %v5094_v3 }
 0x9f9   : > { %5101 = vst.msk [vmem:[#allocation5 + $0x8] sm:$0xff] %vm3570_vm8, %v5085_v32  ;;  %v5027_v10 = vpop.permute.xlu0 %5026 }
 0x9fa   : > { %v5088_v31 = vmul.f32 %v5027_v10, %v4992_v4  ;;  %v5052_v35 = vpop.permute.xlu1 %5051 }
 0x9fb   : > { %v5093_v2 = vmul.f32 %v5052_v35, %v4997_v45  ;;  %v5156_v21 = vld [vmem:[#allocation5 + $0x40] sm:$0xff] }
 0x9fc   : > { %5104 = vst.msk [vmem:[#allocation5 + $0x20] sm:$0xff] %vm3570_vm8, %v5088_v31  ;;  %v5148_v17 = vld [vmem:[#allocation5] sm:$0xff] }
 0x9fd   : > { %5109 = vst.msk [vmem:[#allocation5 + $0x48] sm:$0xff] %vm3570_vm8, %v5093_v2  ;;  %v5032_v6 = vpop.permute.xlu0 %5031 }
 0x9fe   : > { %v5089_v7 = vmul.f32 %v5032_v6, %v4993_v43 }
 0x9ff   : > { %v4917_v51 = vpop.permute.xlu1 %4916 }
 0xa00   : > { %5105 = vst.msk [vmem:[#allocation5 + $0x28] sm:$0xff] %vm3570_vm8, %v5089_v7  ;;  %v4938_v30 = vmul.f32 %v4917_v51, %v4842_v44  ;;  %v5149_v62 = vld [vmem:[#allocation5 + $0x8] sm:$0xff]  ;;  %v5003_v7 = vld [vmem:[#allocation5 + $0x78] sm:$0xff] }
 0xa01   : > { %v5077_v13 = vpop.permute.xlu0 %5076 }
 0xa02   : > { %4954 = vst.msk [vmem:[#allocation5 + $0x70] sm:$0xff] %vm2541_vm7, %v4938_v30  ;;  %v5158_v30 = vld [vmem:[#allocation5 + $0x50] sm:$0xff] }
 0xa03   : > { %v4882_v15 = vpop.permute.xlu1 %4881 }
 0xa04   : > { %v4931_v19 = vmul.f32 %v4882_v15, %v4835_v59  ;;  %v5157_v11 = vld [vmem:[#allocation5 + $0x48] sm:$0xff] }
 0xa06   : > { %4947 = vst.msk [vmem:[#allocation5 + $0x38] sm:$0xff] %vm2541_vm7, %v4931_v19  ;;  %v5167_v39 = vpop.permute.xlu0 %5166 }
 0xa07   : > { %v5244_v46 = vmul.f32 %v5167_v39, %v5148_v17 }
 0xa08   : > { %v5017_v54 = vpop.permute.xlu1 %5016 }
 0xa09   : > { %v5002_v34 = vld [vmem:[#allocation5 + $0x70] sm:$0xff]  ;;  %5260 = vst.msk [vmem:[#allocation5] sm:$0xff] %vm4599_vm9, %v5244_v46  ;;  %v5086_v53 = vmul.f32 %v5017_v54, %v4990_v14  ;;  %v5152_v14 = vld [vmem:[#allocation5 + $0x20] sm:$0xff] }
 0xa0a   : > { %v5098_v47 = vmul.f32 %v5077_v13, %v5002_v34  ;;  %v5212_v41 = vpop.permute.xlu0 %5211 }
 0xa0b   : > { %5102 = vst.msk [vmem:[#allocation5 + $0x10] sm:$0xff] %vm3570_vm8, %v5086_v53  ;;  %v5253_v29 = vmul.f32 %v5212_v41, %v5157_v11  ;;  %v5153_v41 = vld [vmem:[#allocation5 + $0x28] sm:$0xff] }
 0xa0c   : > { %5114 = vst.msk [vmem:[#allocation5 + $0x70] sm:$0xff] %vm3570_vm8, %v5098_v47  ;;  %v5022_v27 = vpop.permute.xlu1 %5021 }
 0xa0d   : > { %5269 = vst.msk [vmem:[#allocation5 + $0x48] sm:$0xff] %vm4599_vm9, %v5253_v29  ;;  %v5087_v28 = vmul.f32 %v5022_v27, %v4991_v49  ;;  %v4995_v31 = vld [vmem:[#allocation5 + $0x38] sm:$0xff] }
 0xa0e   : > { %v5177_v50 = vpop.permute.xlu0 %5176 }
 0xa0f   : > { %5103 = vst.msk [vmem:[#allocation5 + $0x18] sm:$0xff] %vm3570_vm8, %v5087_v28 }
 0xa10   : > { %v5062_v33 = vpop.permute.xlu1 %5061  ;;  %v5276_v20 = vld [vmem:[#allocation5] sm:$0xff] }
 0xa11   : > { %v5095_v25 = vmul.f32 %v5062_v33, %v4999_v60  ;;  %6362 = vmatprep.mubr.msk.f32.mxu0 %vm5296_vm10, %v5276_v20 }
 0xa12   : > { %v5150_v56 = vld [vmem:[#allocation5 + $0x10] sm:$0xff]  ;;  %v5222_v8 = vpop.permute.xlu0 %5221 }
 0xa13   : > { %v5246_v36 = vmul.f32 %v5177_v50, %v5150_v56  ;;  %5111 = vst.msk [vmem:[#allocation5 + $0x58] sm:$0xff] %vm3570_vm8, %v5095_v25  ;;  %v5162_v63 = vld [vmem:[#allocation5 + $0x70] sm:$0xff] }
 0xa14   : > { %v5067_v5 = vpop.permute.xlu1 %5066  ;;  %v5285_v10 = vld [vmem:[#allocation5 + $0x48] sm:$0xff] }
 0xa15   : > { %5262 = vst.msk [vmem:[#allocation5 + $0x10] sm:$0xff] %vm4599_vm9, %v5246_v36  ;;  %v5096_v0 = vmul.f32 %v5067_v5, %v5000_v52 }
 0xa16   : > { %v5227_v22 = vpop.permute.xlu0 %5226  ;;  %v5151_v15 = vld [vmem:[#allocation5 + $0x18] sm:$0xff] }
 0xa17   : > { %5112 = vst.msk [vmem:[#allocation5 + $0x60] sm:$0xff] %vm3570_vm8, %v5096_v0 }
 0xa18   : > { %v5072_v24 = vpop.permute.xlu1 %5071 }
 0xa19   : > { %v5097_v57 = vmul.f32 %v5072_v24, %v5001_v40 }
 0xa1a   : > { %v5159_v9 = vld [vmem:[#allocation5 + $0x58] sm:$0xff]  ;;  %v5232_v38 = vpop.permute.xlu0 %5231 }
 0xa1b   : > { %v5255_v23 = vmul.f32 %v5222_v8, %v5159_v9  ;;  %5113 = vst.msk [vmem:[#allocation5 + $0x68] sm:$0xff] %vm3570_vm8, %v5097_v57 }
 0xa1c   : > { %v5278_v43 = vld [vmem:[#allocation5 + $0x10] sm:$0xff] }
 0xa1d   : > { %5271 = vst.msk [vmem:[#allocation5 + $0x58] sm:$0xff] %vm4599_vm9, %v5255_v23  ;;  %v5207_v42 = vpop.permute.xlu1 %5206 }
 0xa1e   : > { %v5160_v58 = vld [vmem:[#allocation5 + $0x60] sm:$0xff]  ;;  %v5252_v48 = vmul.f32 %v5207_v42, %v5156_v21  ;;  %v5237_v61 = vpop.permute.xlu0 %5236 }
 0xa1f   : > { %v5256_v55 = vmul.f32 %v5227_v22, %v5160_v58  ;;  %v5258_v16 = vmul.f32 %v5237_v61, %v5162_v63 }
 0xa20   : > { %5268 = vst.msk [vmem:[#allocation5 + $0x40] sm:$0xff] %vm4599_vm9, %v5252_v48 }
 0xa21   : > { %5272 = vst.msk [vmem:[#allocation5 + $0x60] sm:$0xff] %vm4599_vm9, %v5256_v55  ;;  %5274 = vst.msk [vmem:[#allocation5 + $0x70] sm:$0xff] %vm4599_vm9, %v5258_v16  ;;  %v5172_v26 = vpop.permute.xlu1 %5171 }
 0xa22   : > { %v5161_v1 = vld [vmem:[#allocation5 + $0x68] sm:$0xff]  ;;  %v5245_v37 = vmul.f32 %v5172_v26, %v5149_v62  ;;  %v5242_v19 = vpop.permute.xlu0 %5241 }
 0xa23   : > { %v5257_v3 = vmul.f32 %v5232_v38, %v5161_v1 }
 0xa24   : > { %5261 = vst.msk [vmem:[#allocation5 + $0x8] sm:$0xff] %vm4599_vm9, %v5245_v37  ;;  %v5287_v47 = vld [vmem:[#allocation5 + $0x58] sm:$0xff] }
 0xa25   : > { %5273 = vst.msk [vmem:[#allocation5 + $0x68] sm:$0xff] %vm4599_vm9, %v5257_v3 }
 0xa26   : > { %v5037_v12 = vpop.permute.xlu1 %5036 }
 0xa27   : > { %v5090_v32 = vmul.f32 %v5037_v12, %v4994_v18  ;;  %v5284_v4 = vld [vmem:[#allocation5 + $0x40] sm:$0xff] }
 0xa28   : > { %6374 = vmatprep.mubr.msk.f32.mxu1 %vm5296_vm10, %v5284_v4  ;;  %v5288_v29 = vld [vmem:[#allocation5 + $0x60] sm:$0xff]  ;;  %v5290_v60 = vld [vmem:[#allocation5 + $0x70] sm:$0xff] }
 0xa29   : > { %5106 = vst.msk [vmem:[#allocation5 + $0x30] sm:$0xff] %vm3570_vm8, %v5090_v32  ;;  %6375 = vmatmul.mubr.msk.f32.vlgmr.msra.gmra.mrb[0].mxu1 %vm5296_vm10, %v5285_v10 }
 0xa2a   : > { %v5042_v35 = vpop.permute.xlu1 %5041 }
 0xa2b   : > { %v5091_v45 = vmul.f32 %v5042_v35, %v4995_v31  ;;  %v5277_v2 = vld [vmem:[#allocation5 + $0x8] sm:$0xff] }
 0xa2c   : > { %6363 = vmatmul.mubr.msk.f32.vlgmr.msra.gmra.mrb[0].mxu0 %vm5296_vm10, %v5277_v2  ;;  %v5289_v28 = vld [vmem:[#allocation5 + $0x68] sm:$0xff] }
 0xa2d   : > { %5107 = vst.msk [vmem:[#allocation5 + $0x38] sm:$0xff] %vm3570_vm8, %v5091_v45  ;;  %6365 = vmatprep.mubr.msk.f32.mxu0 %vm5296_vm10, %v5278_v43 }
 0xa2e   : > { %v5082_v6 = vpop.permute.xlu1 %5081 }
 0xa2f   : > { %v5099_v51 = vmul.f32 %v5082_v6, %v5003_v7 }
 0xa30   : > { %v5154_v33 = vld [vmem:[#allocation5 + $0x30] sm:$0xff] }
 0xa31   : > { %5115 = vst.msk [vmem:[#allocation5 + $0x78] sm:$0xff] %vm3570_vm8, %v5099_v51 }
 0xa33   : > { %v5217_v44 = vpop.permute.xlu1 %5216 }
 0xa34   : > { %v5254_v13 = vmul.f32 %v5217_v44, %v5158_v30  ;;  %v5155_v8 = vld [vmem:[#allocation5 + $0x38] sm:$0xff] }
 0xa36   : > { %5270 = vst.msk [vmem:[#allocation5 + $0x50] sm:$0xff] %vm4599_vm9, %v5254_v13 }
 0xa37   : > { %v5182_v59 = vpop.permute.xlu1 %5181 }
 0xa38   : > { %v5163_v17 = vld [vmem:[#allocation5 + $0x78] sm:$0xff]  ;;  %v5247_v39 = vmul.f32 %v5182_v59, %v5151_v15 }
 0xa39   : > { %v5259_v46 = vmul.f32 %v5242_v19, %v5163_v17 }
 0xa3a   : > { %5263 = vst.msk [vmem:[#allocation5 + $0x18] sm:$0xff] %vm4599_vm9, %v5247_v39 }
 0xa3b   : > { %5275 = vst.msk [vmem:[#allocation5 + $0x78] sm:$0xff] %vm4599_vm9, %v5259_v46  ;;  %v5187_v54 = vpop.permute.xlu1 %5186 }
 0xa3c   : > { %v5248_v34 = vmul.f32 %v5187_v54, %v5152_v14 }
 0xa3d   : > { %v5286_v53 = vld [vmem:[#allocation5 + $0x50] sm:$0xff] }
 0xa3e   : > { %5264 = vst.msk [vmem:[#allocation5 + $0x20] sm:$0xff] %vm4599_vm9, %v5248_v34  ;;  %6377 = vmatprep.mubr.msk.f32.mxu1 %vm5296_vm10, %v5286_v53 }
 0xa3f   : > { %v5192_v11 = vpop.permute.xlu1 %5191  ;;  %6378 = vmatmul.mubr.msk.f32.gmra.mrb[2].mxu1 %vm5296_vm10, %v5287_v47 }
 0xa40   : > { %v5249_v27 = vmul.f32 %v5192_v11, %v5153_v41  ;;  %6380 = vmatprep.mubr.msk.f32.mxu1 %vm5296_vm10, %v5288_v29 }
 0xa41   : > { %v5279_v49 = vld [vmem:[#allocation5 + $0x18] sm:$0xff] }
 0xa42   : > { %5265 = vst.msk [vmem:[#allocation5 + $0x28] sm:$0xff] %vm4599_vm9, %v5249_v27  ;;  %6366 = vmatmul.mubr.msk.f32.gmra.mrb[2].mxu0 %vm5296_vm10, %v5279_v49  ;;  %v5291_v56 = vld [vmem:[#allocation5 + $0x78] sm:$0xff] }
 0xa43   : > { %v5197_v50 = vpop.permute.xlu1 %5196  ;;  %6381 = vmatmul.mubr.msk.f32.gmra.mrb[4].mxu1 %vm5296_vm10, %v5289_v28 }
 0xa44   : > { %v5250_v20 = vmul.f32 %v5197_v50, %v5154_v33  ;;  %6383 = vmatprep.mubr.msk.f32.mxu1 %vm5296_vm10, %v5290_v60 }
 0xa45   : > { %v5280_v25 = vld [vmem:[#allocation5 + $0x20] sm:$0xff] }
 0xa46   : > { %5266 = vst.msk [vmem:[#allocation5 + $0x30] sm:$0xff] %vm4599_vm9, %v5250_v20  ;;  %6368 = vmatprep.mubr.msk.f32.mxu0 %vm5296_vm10, %v5280_v25 }
 0xa47   : > { %v5202_v36 = vpop.permute.xlu1 %5201  ;;  %6384 = vmatmul.mubr.msk.f32.gmra.mrb[6].mxu1 %vm5296_vm10, %v5291_v56 }
 0xa48   : > { %v5251_v5 = vmul.f32 %v5202_v36, %v5155_v8 }
 0xa49   : > { %v5281_v52 = vld [vmem:[#allocation5 + $0x28] sm:$0xff] }
 0xa4a   : > { %5267 = vst.msk [vmem:[#allocation5 + $0x38] sm:$0xff] %vm4599_vm9, %v5251_v5  ;;  %6369 = vmatmul.mubr.msk.f32.gmra.mrb[4].mxu0 %vm5296_vm10, %v5281_v52 }
 0xa4d   : > { %v5282_v0 = vld [vmem:[#allocation5 + $0x30] sm:$0xff] }
 0xa4e   : > { %6371 = vmatprep.mubr.msk.f32.mxu0 %vm5296_vm10, %v5282_v0 }
 0xa51   : > { %v5283_v22 = vld [vmem:[#allocation5 + $0x38] sm:$0xff] }
 0xa52   : > { %6372 = vmatmul.mubr.msk.f32.gmra.mrb[6].mxu0 %vm5296_vm10, %v5283_v22 }
 0xafc   : > { %v6376_v24 = vpop.f32.mrb[0].mxu1 }
 0xafd   : > { %5499 = vst.msk [vmem:[%s7283_s18 + $0x48] sm:$0xff] %vm5296_vm10, %v6376_v24  ;;  %v5451_v40 = vpop.f32.mrb[1].mxu1 }
 0xafe   : > { %5498 = vst.msk [vmem:[%s7283_s18 + $0x40] sm:$0xff] %vm5296_vm10, %v5451_v40 }
 0xaff   : > { %v6364_v57 = vpop.f32.mrb[0].mxu0 }
 0xb00   : > { %5491 = vst.msk [vmem:[%s7283_s18 + $0x8] sm:$0xff] %vm5296_vm10, %v6364_v57  ;;  %v5411_v9 = vpop.f32.mrb[1].mxu0 }
 0xb01   : > { %5490 = vst.msk [vmem:[%s7283_s18] sm:$0xff] %vm5296_vm10, %v5411_v9 }
 0xb12   : > { %v6379_v38 = vpop.f32.mrb[2].mxu1 }
 0xb13   : > { %5501 = vst.msk [vmem:[%s7283_s18 + $0x58] sm:$0xff] %vm5296_vm10, %v6379_v38  ;;  %v5461_v23 = vpop.f32.mrb[3].mxu1 }
 0xb14   : > { %5500 = vst.msk [vmem:[%s7283_s18 + $0x50] sm:$0xff] %vm5296_vm10, %v5461_v23 }
 0xb15   : > { %v6367_v42 = vpop.f32.mrb[2].mxu0 }
 0xb16   : > { %5493 = vst.msk [vmem:[%s7283_s18 + $0x18] sm:$0xff] %vm5296_vm10, %v6367_v42  ;;  %v5421_v21 = vpop.f32.mrb[3].mxu0  ;;  %v6382_v58 = vpop.f32.mrb[4].mxu1 }
 0xb17   : > { %5492 = vst.msk [vmem:[%s7283_s18 + $0x10] sm:$0xff] %vm5296_vm10, %v5421_v21  ;;  %5503 = vst.msk [vmem:[%s7283_s18 + $0x68] sm:$0xff] %vm5296_vm10, %v6382_v58  ;;  %v5471_v48 = vpop.f32.mrb[5].mxu1 }
 0xb18   : > { %5502 = vst.msk [vmem:[%s7283_s18 + $0x60] sm:$0xff] %vm5296_vm10, %v5471_v48 }
 0xb1a   : > { %v6385_v63 = vpop.f32.mrb[6].mxu1 }
 0xb1b   : > { %5505 = vst.msk [vmem:[%s7283_s18 + $0x78] sm:$0xff] %vm5296_vm10, %v6385_v63  ;;  %v5481_v61 = vpop.f32.mrb[7].mxu1 }
 0xb1c   : > { %5504 = vst.msk [vmem:[%s7283_s18 + $0x70] sm:$0xff] %vm5296_vm10, %v5481_v61 }
 0xb1d   : > { %v6370_v55 = vpop.f32.mrb[4].mxu0 }
 0xb1e   : > { %5495 = vst.msk [vmem:[%s7283_s18 + $0x28] sm:$0xff] %vm5296_vm10, %v6370_v55  ;;  %v5431_v16 = vpop.f32.mrb[5].mxu0 }
 0xb1f   : > { %5494 = vst.msk [vmem:[%s7283_s18 + $0x20] sm:$0xff] %vm5296_vm10, %v5431_v16 }
 0xb25   : > { %v6373_v62 = vpop.f32.mrb[6].mxu0 }
 0xb26   : > { %5497 = vst.msk [vmem:[%s7283_s18 + $0x38] sm:$0xff] %vm5296_vm10, %v6373_v62  ;;  %v5441_v26 = vpop.f32.mrb[7].mxu0 }
 0xb27   : > { %5496 = vst.msk [vmem:[%s7283_s18 + $0x30] sm:$0xff] %vm5296_vm10, %v5441_v26 }
 0xb28 PF: > { %s15_s26 = sadd.s32 1, %s7146_s26   ;;  %s10351_s11 = sld [smem:[#allocation7_spill]] }
 0xb29   : > { %p12_p2 = scmp.ge.s32.totalorder %s15_s26, 10   ;;  %s10352_s18 = smov %s7118_s19 }
 0xb2a   : > { %s10353_s19 = smov %s7259_s9  ;;  %s10354_s20 = smov %s7134_s23 }
 0xb2b   : > { %s10355_s21 = smov %s7138_s24  ;;  %s10356_s22 = smov %s7142_s25 }
 0xb2c   : > { %s10357_s23 = smov %s10361_s27  ;;  %s10358_s24 = smov %s10365_s28 }
 0xb2d   :  { %14 = sbr.rel (!%p12_p2) target bundleno = 7 (0x7), region = 127 }
 0xb2e   : > { %s10359_s25 = smov %s10351_s11 }

</bundles_post_ra>
